<compile_context>
chip_gen: v5e
topology: v5e:2x2
jax: 0.10.0
libtpu: 0.0.40
codegen_flags: <defaults>
</compile_context>

<pallas_src>
import jax
import jax.numpy as jnp
from jax.experimental import pallas as pl
from jax.experimental.pallas import tpu as pltpu


# ----------------------------------------------------------------------------
# In-kernel helpers (operate on values held in vregs).
# ----------------------------------------------------------------------------
def _maxpool2x2(y, H, W):
    """2x2 / stride-2 max-pool of a row-major flattened activation.

    y: (H*W, C) with row index h*W + w  ->  (H//2 * W//2, C), row h2*(W//2)+w2.
    """
    C = y.shape[-1]
    H2, W2 = H // 2, W // 2
    # Vertical pairs: rows h=2*h2 and 2*h2+1 are exactly W flat-rows apart, so a
    # leading-dim regrouping (layout-free reshape) + elementwise max does it.
    t = y.reshape(H2, 2, W, C)
    v = jnp.maximum(t[:, 0], t[:, 1]).reshape(H2 * W, C)      # row = h2*W + w
    # Horizontal pairs are adjacent flat rows (2*i, 2*i+1).  Compact even/odd
    # rows with 0/1 selection matmuls on the MXU (exact in f32) instead of
    # per-element slicing or strided shuffles.
    R = H2 * W2
    rows = jax.lax.broadcasted_iota(jnp.int32, (R, 2 * R), 0)
    cols = jax.lax.broadcasted_iota(jnp.int32, (R, 2 * R), 1)
    sel_even = (cols == 2 * rows).astype(y.dtype)
    sel_odd = (cols == 2 * rows + 1).astype(y.dtype)
    return jnp.maximum(
        jnp.dot(sel_even, v, preferred_element_type=jnp.float32),
        jnp.dot(sel_odd, v, preferred_element_type=jnp.float32))


def _conv3x3_relu(xpad_ref, w_ref, b_ref, H, W, Cin, Cout):
    """3x3 conv (zero padding already written into xpad_ref) + bias + ReLU.

    Nine accumulated (H*W, Cin) x (Cin, Cout) matmuls -> (H*W, Cout) in f32.
    """
    acc = jnp.zeros((H * W, Cout), jnp.float32)
    for dy in range(3):
        for dx in range(3):
            patch = xpad_ref[dy:dy + H, dx:dx + W, :].reshape(H * W, Cin)
            acc = acc + jnp.dot(patch, w_ref[dy, dx],
                                preferred_element_type=jnp.float32)
    return jnp.maximum(acc + b_ref[...], 0.0)


# ----------------------------------------------------------------------------
# Fused features kernel: conv1+ReLU -> pool -> conv2+ReLU -> pool
# (one image per grid step; everything stays in VMEM / vregs).
# ----------------------------------------------------------------------------
def features_kernel(x_ref, w1_ref, b1_ref, w2_ref, b2_ref, o_ref, xp1, xp2):
    _, H, W, Cin = x_ref.shape
    C1 = w1_ref.shape[-1]
    C2 = w2_ref.shape[-1]
    H2, W2 = H // 2, W // 2

    # conv block 1 (padding done in-kernel into VMEM scratch)
    xp1[...] = jnp.zeros_like(xp1)
    xp1[1:H + 1, 1:W + 1, :] = x_ref[0]
    y1 = _conv3x3_relu(xp1, w1_ref, b1_ref, H, W, Cin, C1)    # (H*W, C1)
    p1 = _maxpool2x2(y1, H, W)                                # (H2*W2, C1)

    # conv block 2
    xp2[...] = jnp.zeros_like(xp2)
    xp2[1:H2 + 1, 1:W2 + 1, :] = p1.reshape(H2, W2, C1)
    y2 = _conv3x3_relu(xp2, w2_ref, b2_ref, H2, W2, C1, C2)   # (H2*W2, C2)
    p2 = _maxpool2x2(y2, H2, W2)                              # (H4*W4, C2)

    # Flattened-per-image feature map in HWC order (fc1 rows are permuted to
    # match at init, preserving the PyTorch CHW flatten semantics).
    o_ref[0] = p2.astype(o_ref.dtype)


def vgg_features(x_nchw, w1, b1, w2, b2):
    N, Cin, H, W = x_nchw.shape
    C1, C2 = w1.shape[-1], w2.shape[-1]
    H2, W2, H4, W4 = H // 2, W // 2, H // 4, W // 4
    x_nhwc = jnp.transpose(x_nchw, (0, 2, 3, 1))              # NCHW -> NHWC
    return pl.pallas_call(
        features_kernel,
        out_shape=jax.ShapeDtypeStruct((N, H4 * W4, C2), x_nchw.dtype),
        grid=(N,),
        in_specs=[
            pl.BlockSpec((1, H, W, Cin), lambda n: (n, 0, 0, 0)),
            pl.BlockSpec((3, 3, Cin, C1), lambda n: (0, 0, 0, 0)),
            pl.BlockSpec((1, C1), lambda n: (0, 0)),
            pl.BlockSpec((3, 3, C1, C2), lambda n: (0, 0, 0, 0)),
            pl.BlockSpec((1, C2), lambda n: (0, 0)),
        ],
        out_specs=pl.BlockSpec((1, H4 * W4, C2), lambda n: (n, 0, 0)),
        scratch_shapes=[
            pltpu.VMEM((H + 2, W + 2, Cin), jnp.float32),     # padded conv1 input
            pltpu.VMEM((H2 + 2, W2 + 2, C1), jnp.float32),    # padded conv2 input
        ],
        compiler_params=pltpu.CompilerParams(
            dimension_semantics=("parallel",)),               # v7x: image per core
    )(x_nhwc, w1, b1, w2, b2)


# ----------------------------------------------------------------------------
# Fused classifier kernel: Linear+ReLU -> Linear+ReLU -> Linear
# (Dropout = identity in eval mode).
# ----------------------------------------------------------------------------
def classifier_kernel(x_ref, w1_ref, b1_ref, w2_ref, b2_ref, w3_ref, b3_ref,
                      o_ref):
    h = x_ref[0]                                              # (1, FLAT)
    h = jnp.dot(h, w1_ref[...], preferred_element_type=jnp.float32) + b1_ref[...]
    h = jnp.maximum(h, 0.0)
    # TODO(synk): nn.Dropout treated as identity (eval-mode inference).
    h = jnp.dot(h, w2_ref[...], preferred_element_type=jnp.float32) + b2_ref[...]
    h = jnp.maximum(h, 0.0)
    h = jnp.dot(h, w3_ref[...], preferred_element_type=jnp.float32) + b3_ref[...]
    o_ref[0] = h.astype(o_ref.dtype)


def vgg_classifier(x_flat, w1, b1, w2, b2, w3, b3):
    N, FLAT = x_flat.shape
    HID = w1.shape[-1]
    NC = w3.shape[-1]
    x3 = x_flat.reshape(N, 1, FLAT)                           # lane-dense rows
    out = pl.pallas_call(
        classifier_kernel,
        out_shape=jax.ShapeDtypeStruct((N, 1, NC), x_flat.dtype),
        grid=(N,),
        in_specs=[
            pl.BlockSpec((1, 1, FLAT), lambda n: (n, 0, 0)),
            pl.BlockSpec((FLAT, HID), lambda n: (0, 0)),
            pl.BlockSpec((1, HID), lambda n: (0, 0)),
            pl.BlockSpec((HID, HID), lambda n: (0, 0)),
            pl.BlockSpec((1, HID), lambda n: (0, 0)),
            pl.BlockSpec((HID, NC), lambda n: (0, 0)),
            pl.BlockSpec((1, NC), lambda n: (0, 0)),
        ],
        out_specs=pl.BlockSpec((1, 1, NC), lambda n: (n, 0, 0)),
        compiler_params=pltpu.CompilerParams(
            dimension_semantics=("parallel",)),               # v7x: image per core
    )(x3, w1, b1, w2, b2, w3, b3)
    return out.reshape(N, NC)


# ----------------------------------------------------------------------------
# Parameter init (mirrors VGG._initialize_weights, deterministic, in-script).
# ----------------------------------------------------------------------------
def init_params(key, cin=3, c1=8, c2=16, hidden=128, num_classes=16,
                spatial=16):
    ks = jax.random.split(key, 5)
    h4 = w4 = spatial // 4
    flat = c2 * h4 * w4

    def conv_w(k, ci, co):
        # kaiming_normal_(mode='fan_out', nonlinearity='relu')
        std = (2.0 / (co * 3 * 3)) ** 0.5
        return std * jax.random.normal(k, (3, 3, ci, co), jnp.float32)

    def lin_w(k, fi, fo):
        # nn.init.normal_(w, 0, 0.01); stored as (in, out)
        return 0.01 * jax.random.normal(k, (fi, fo), jnp.float32)

    # fc1 weight is generated with rows in the PyTorch CHW flatten order, then
    # permuted ONCE to the HWC order the fused features kernel emits.  This
    # replaces the per-forward NHWC->NCHW transpose of the activations.
    fc1_chw = lin_w(ks[2], flat, hidden)
    fc1_hwc = (fc1_chw.reshape(c2, h4, w4, hidden)
                      .transpose(1, 2, 0, 3)
                      .reshape(h4 * w4 * c2, hidden))

    return {
        "conv1_w": conv_w(ks[0], cin, c1),
        "conv1_b": jnp.zeros((1, c1), jnp.float32),
        "conv2_w": conv_w(ks[1], c1, c2),
        "conv2_b": jnp.zeros((1, c2), jnp.float32),
        "fc1_w": fc1_hwc,
        "fc1_b": jnp.zeros((1, hidden), jnp.float32),
        "fc2_w": lin_w(ks[3], hidden, hidden),
        "fc2_b": jnp.zeros((1, hidden), jnp.float32),
        "fc3_w": lin_w(ks[4], hidden, num_classes),
        "fc3_b": jnp.zeros((1, num_classes), jnp.float32),
    }


# ----------------------------------------------------------------------------
# Full forward pass (VGG.forward semantics): features -> flatten -> classifier.
# ----------------------------------------------------------------------------
def vgg_forward(params, x_nchw):
    feats = vgg_features(x_nchw, params["conv1_w"], params["conv1_b"],
                         params["conv2_w"], params["conv2_b"])   # (N, H4*W4, C2)
    flat = feats.reshape(feats.shape[0], -1)   # free XLA reshape, HWC order
    return vgg_classifier(flat, params["fc1_w"], params["fc1_b"],
                          params["fc2_w"], params["fc2_b"],
                          params["fc3_w"], params["fc3_b"])


if __name__ == "__main__":
    key = jax.random.PRNGKey(0)
    kp, kx = jax.random.split(key)

    N, CIN, S = 2, 3, 16
    NUM_CLASSES = 16
    params = init_params(kp, cin=CIN, spatial=S, num_classes=NUM_CLASSES)
    x = jax.random.normal(kx, (N, CIN, S, S), dtype=jnp.float32)  # NCHW (torch)

    out = jax.jit(vgg_forward)(params, x)
    out = jax.block_until_ready(out)

    assert out.shape == (N, NUM_CLASSES), out.shape
    assert bool(jnp.all(jnp.isfinite(out)))
    print("KERNEL_OK")
</pallas_src>

<mosaic_0001>
module attributes {stable_mosaic.version = 11 : i64} {
  func.func @features_kernel(%arg0: i32, %arg1: memref<1x16x16x3xf32, #tpu.memory_space<vmem>>, %arg2: memref<3x3x3x8xf32, #tpu.memory_space<vmem>>, %arg3: memref<1x8xf32, #tpu.memory_space<vmem>>, %arg4: memref<3x3x8x16xf32, #tpu.memory_space<vmem>>, %arg5: memref<1x16xf32, #tpu.memory_space<vmem>>, %arg6: memref<1x16x16xf32, #tpu.memory_space<vmem>>, %arg7: memref<18x18x3xf32, #tpu.memory_space<vmem>>, %arg8: memref<10x10x8xf32, #tpu.memory_space<vmem>>) attributes {dimension_semantics = [#tpu.dimension_semantics<parallel>], iteration_bounds = array<i64: 2>, scalar_prefetch = 0 : i64, scratch_operands = 2 : i64, tpu.core_type = #tpu.core_type<tc>, window_params = [{transform_indices = @transform_0, window_bounds = array<i64: 1, 16, 16, 3>}, {pipeline_mode = #tpu.pipeline_mode<synchronous>, transform_indices = @transform_1, window_bounds = array<i64: 3, 3, 3, 8>}, {pipeline_mode = #tpu.pipeline_mode<synchronous>, transform_indices = @transform_2, window_bounds = array<i64: 1, 8>}, {pipeline_mode = #tpu.pipeline_mode<synchronous>, transform_indices = @transform_3, window_bounds = array<i64: 3, 3, 8, 16>}, {pipeline_mode = #tpu.pipeline_mode<synchronous>, transform_indices = @transform_4, window_bounds = array<i64: 1, 16>}, {transform_indices = @transform_5, window_bounds = array<i64: 1, 16, 16>}]} {
    %cst = arith.constant 0.000000e+00 : f32
    %0 = vector.broadcast %cst : f32 to vector<18x18x3xf32>
    %c0 = arith.constant 0 : index
    %c0_0 = arith.constant 0 : index
    %c0_1 = arith.constant 0 : index
    %1 = vector.load %arg7[%c0, %c0_0, %c0_1] : memref<18x18x3xf32, #tpu.memory_space<vmem>>, vector<18x18x3xf32>
    tpu.vector_store %arg7[%c0, %c0_0, %c0_1], %0 {strides = array<i32>} : memref<18x18x3xf32, #tpu.memory_space<vmem>>, vector<18x18x3xf32>,
    %c0_2 = arith.constant 0 : index
    %c0_3 = arith.constant 0 : index
    %c0_4 = arith.constant 0 : index
    %c0_5 = arith.constant 0 : index
    %2 = vector.load %arg1[%c0_2, %c0_3, %c0_4, %c0_5] : memref<1x16x16x3xf32, #tpu.memory_space<vmem>>, vector<1x16x16x3xf32>
    %3 = vector.shape_cast %2 : vector<1x16x16x3xf32> to vector<16x16x3xf32>
    %c1 = arith.constant 1 : index
    %c1_6 = arith.constant 1 : index
    %c0_7 = arith.constant 0 : index
    %4 = vector.load %arg7[%c1, %c1_6, %c0_7] : memref<18x18x3xf32, #tpu.memory_space<vmem>>, vector<16x16x3xf32>
    tpu.vector_store %arg7[%c1, %c1_6, %c0_7], %3 {strides = array<i32>} : memref<18x18x3xf32, #tpu.memory_space<vmem>>, vector<16x16x3xf32>,
    %cst_8 = arith.constant 0.000000e+00 : f32
    %5 = vector.broadcast %cst_8 : f32 to vector<256x8xf32>
    %c0_9 = arith.constant 0 : index
    %c0_10 = arith.constant 0 : index
    %c0_11 = arith.constant 0 : index
    %6 = vector.load %arg7[%c0_9, %c0_10, %c0_11] : memref<18x18x3xf32, #tpu.memory_space<vmem>>, vector<16x16x3xf32>
    %7 = vector.shape_cast %6 : vector<16x16x3xf32> to vector<256x3xf32>
    %c0_12 = arith.constant 0 : index
    %c0_13 = arith.constant 0 : index
    %c0_14 = arith.constant 0 : index
    %c0_15 = arith.constant 0 : index
    %8 = vector.load %arg2[%c0_12, %c0_13, %c0_14, %c0_15] : memref<3x3x3x8xf32, #tpu.memory_space<vmem>>, vector<1x1x3x8xf32>
    %9 = vector.shape_cast %8 : vector<1x1x3x8xf32> to vector<3x8xf32>
    %cst_16 = arith.constant dense<0.000000e+00> : vector<256x8xf32>
    %10 = tpu.matmul %7, %9, %cst_16 {dimension_numbers = #tpu.dot_dimension_numbers<[1], [0], [0], [1], [0, 0, 1, 1], [], []>} : vector<256x3xf32>, vector<3x8xf32>, vector<256x8xf32> -> vector<256x8xf32>
    %11 = arith.addf %5, %10 : vector<256x8xf32>
    %c0_17 = arith.constant 0 : index
    %c1_18 = arith.constant 1 : index
    %c0_19 = arith.constant 0 : index
    %12 = vector.load %arg7[%c0_17, %c1_18, %c0_19] : memref<18x18x3xf32, #tpu.memory_space<vmem>>, vector<16x16x3xf32>
    %13 = vector.shape_cast %12 : vector<16x16x3xf32> to vector<256x3xf32>
    %c0_20 = arith.constant 0 : index
    %c1_21 = arith.constant 1 : index
    %c0_22 = arith.constant 0 : index
    %c0_23 = arith.constant 0 : index
    %14 = vector.load %arg2[%c0_20, %c1_21, %c0_22, %c0_23] : memref<3x3x3x8xf32, #tpu.memory_space<vmem>>, vector<1x1x3x8xf32>
    %15 = vector.shape_cast %14 : vector<1x1x3x8xf32> to vector<3x8xf32>
    %cst_24 = arith.constant dense<0.000000e+00> : vector<256x8xf32>
    %16 = tpu.matmul %13, %15, %cst_24 {dimension_numbers = #tpu.dot_dimension_numbers<[1], [0], [0], [1], [0, 0, 1, 1], [], []>} : vector<256x3xf32>, vector<3x8xf32>, vector<256x8xf32> -> vector<256x8xf32>
    %17 = arith.addf %11, %16 : vector<256x8xf32>
    %c0_25 = arith.constant 0 : index
    %c2 = arith.constant 2 : index
    %c0_26 = arith.constant 0 : index
    %18 = vector.load %arg7[%c0_25, %c2, %c0_26] : memref<18x18x3xf32, #tpu.memory_space<vmem>>, vector<16x16x3xf32>
    %19 = vector.shape_cast %18 : vector<16x16x3xf32> to vector<256x3xf32>
    %c0_27 = arith.constant 0 : index
    %c2_28 = arith.constant 2 : index
    %c0_29 = arith.constant 0 : index
    %c0_30 = arith.constant 0 : index
    %20 = vector.load %arg2[%c0_27, %c2_28, %c0_29, %c0_30] : memref<3x3x3x8xf32, #tpu.memory_space<vmem>>, vector<1x1x3x8xf32>
    %21 = vector.shape_cast %20 : vector<1x1x3x8xf32> to vector<3x8xf32>
    %cst_31 = arith.constant dense<0.000000e+00> : vector<256x8xf32>
    %22 = tpu.matmul %19, %21, %cst_31 {dimension_numbers = #tpu.dot_dimension_numbers<[1], [0], [0], [1], [0, 0, 1, 1], [], []>} : vector<256x3xf32>, vector<3x8xf32>, vector<256x8xf32> -> vector<256x8xf32>
    %23 = arith.addf %17, %22 : vector<256x8xf32>
    %c1_32 = arith.constant 1 : index
    %c0_33 = arith.constant 0 : index
    %c0_34 = arith.constant 0 : index
    %24 = vector.load %arg7[%c1_32, %c0_33, %c0_34] : memref<18x18x3xf32, #tpu.memory_space<vmem>>, vector<16x16x3xf32>
    %25 = vector.shape_cast %24 : vector<16x16x3xf32> to vector<256x3xf32>
    %c1_35 = arith.constant 1 : index
    %c0_36 = arith.constant 0 : index
    %c0_37 = arith.constant 0 : index
    %c0_38 = arith.constant 0 : index
    %26 = vector.load %arg2[%c1_35, %c0_36, %c0_37, %c0_38] : memref<3x3x3x8xf32, #tpu.memory_space<vmem>>, vector<1x1x3x8xf32>
    %27 = vector.shape_cast %26 : vector<1x1x3x8xf32> to vector<3x8xf32>
    %cst_39 = arith.constant dense<0.000000e+00> : vector<256x8xf32>
    %28 = tpu.matmul %25, %27, %cst_39 {dimension_numbers = #tpu.dot_dimension_numbers<[1], [0], [0], [1], [0, 0, 1, 1], [], []>} : vector<256x3xf32>, vector<3x8xf32>, vector<256x8xf32> -> vector<256x8xf32>
    %29 = arith.addf %23, %28 : vector<256x8xf32>
    %c1_40 = arith.constant 1 : index
    %c1_41 = arith.constant 1 : index
    %c0_42 = arith.constant 0 : index
    %30 = vector.load %arg7[%c1_40, %c1_41, %c0_42] : memref<18x18x3xf32, #tpu.memory_space<vmem>>, vector<16x16x3xf32>
    %31 = vector.shape_cast %30 : vector<16x16x3xf32> to vector<256x3xf32>
    %c1_43 = arith.constant 1 : index
    %c1_44 = arith.constant 1 : index
    %c0_45 = arith.constant 0 : index
    %c0_46 = arith.constant 0 : index
    %32 = vector.load %arg2[%c1_43, %c1_44, %c0_45, %c0_46] : memref<3x3x3x8xf32, #tpu.memory_space<vmem>>, vector<1x1x3x8xf32>
    %33 = vector.shape_cast %32 : vector<1x1x3x8xf32> to vector<3x8xf32>
    %cst_47 = arith.constant dense<0.000000e+00> : vector<256x8xf32>
    %34 = tpu.matmul %31, %33, %cst_47 {dimension_numbers = #tpu.dot_dimension_numbers<[1], [0], [0], [1], [0, 0, 1, 1], [], []>} : vector<256x3xf32>, vector<3x8xf32>, vector<256x8xf32> -> vector<256x8xf32>
    %35 = arith.addf %29, %34 : vector<256x8xf32>
    %c1_48 = arith.constant 1 : index
    %c2_49 = arith.constant 2 : index
    %c0_50 = arith.constant 0 : index
    %36 = vector.load %arg7[%c1_48, %c2_49, %c0_50] : memref<18x18x3xf32, #tpu.memory_space<vmem>>, vector<16x16x3xf32>
    %37 = vector.shape_cast %36 : vector<16x16x3xf32> to vector<256x3xf32>
    %c1_51 = arith.constant 1 : index
    %c2_52 = arith.constant 2 : index
    %c0_53 = arith.constant 0 : index
    %c0_54 = arith.constant 0 : index
    %38 = vector.load %arg2[%c1_51, %c2_52, %c0_53, %c0_54] : memref<3x3x3x8xf32, #tpu.memory_space<vmem>>, vector<1x1x3x8xf32>
    %39 = vector.shape_cast %38 : vector<1x1x3x8xf32> to vector<3x8xf32>
    %cst_55 = arith.constant dense<0.000000e+00> : vector<256x8xf32>
    %40 = tpu.matmul %37, %39, %cst_55 {dimension_numbers = #tpu.dot_dimension_numbers<[1], [0], [0], [1], [0, 0, 1, 1], [], []>} : vector<256x3xf32>, vector<3x8xf32>, vector<256x8xf32> -> vector<256x8xf32>
    %41 = arith.addf %35, %40 : vector<256x8xf32>
    %c2_56 = arith.constant 2 : index
    %c0_57 = arith.constant 0 : index
    %c0_58 = arith.constant 0 : index
    %42 = vector.load %arg7[%c2_56, %c0_57, %c0_58] : memref<18x18x3xf32, #tpu.memory_space<vmem>>, vector<16x16x3xf32>
    %43 = vector.shape_cast %42 : vector<16x16x3xf32> to vector<256x3xf32>
    %c2_59 = arith.constant 2 : index
    %c0_60 = arith.constant 0 : index
    %c0_61 = arith.constant 0 : index
    %c0_62 = arith.constant 0 : index
    %44 = vector.load %arg2[%c2_59, %c0_60, %c0_61, %c0_62] : memref<3x3x3x8xf32, #tpu.memory_space<vmem>>, vector<1x1x3x8xf32>
    %45 = vector.shape_cast %44 : vector<1x1x3x8xf32> to vector<3x8xf32>
    %cst_63 = arith.constant dense<0.000000e+00> : vector<256x8xf32>
    %46 = tpu.matmul %43, %45, %cst_63 {dimension_numbers = #tpu.dot_dimension_numbers<[1], [0], [0], [1], [0, 0, 1, 1], [], []>} : vector<256x3xf32>, vector<3x8xf32>, vector<256x8xf32> -> vector<256x8xf32>
    %47 = arith.addf %41, %46 : vector<256x8xf32>
    %c2_64 = arith.constant 2 : index
    %c1_65 = arith.constant 1 : index
    %c0_66 = arith.constant 0 : index
    %48 = vector.load %arg7[%c2_64, %c1_65, %c0_66] : memref<18x18x3xf32, #tpu.memory_space<vmem>>, vector<16x16x3xf32>
    %49 = vector.shape_cast %48 : vector<16x16x3xf32> to vector<256x3xf32>
    %c2_67 = arith.constant 2 : index
    %c1_68 = arith.constant 1 : index
    %c0_69 = arith.constant 0 : index
    %c0_70 = arith.constant 0 : index
    %50 = vector.load %arg2[%c2_67, %c1_68, %c0_69, %c0_70] : memref<3x3x3x8xf32, #tpu.memory_space<vmem>>, vector<1x1x3x8xf32>
    %51 = vector.shape_cast %50 : vector<1x1x3x8xf32> to vector<3x8xf32>
    %cst_71 = arith.constant dense<0.000000e+00> : vector<256x8xf32>
    %52 = tpu.matmul %49, %51, %cst_71 {dimension_numbers = #tpu.dot_dimension_numbers<[1], [0], [0], [1], [0, 0, 1, 1], [], []>} : vector<256x3xf32>, vector<3x8xf32>, vector<256x8xf32> -> vector<256x8xf32>
    %53 = arith.addf %47, %52 : vector<256x8xf32>
    %c2_72 = arith.constant 2 : index
    %c2_73 = arith.constant 2 : index
    %c0_74 = arith.constant 0 : index
    %54 = vector.load %arg7[%c2_72, %c2_73, %c0_74] : memref<18x18x3xf32, #tpu.memory_space<vmem>>, vector<16x16x3xf32>
    %55 = vector.shape_cast %54 : vector<16x16x3xf32> to vector<256x3xf32>
    %c2_75 = arith.constant 2 : index
    %c2_76 = arith.constant 2 : index
    %c0_77 = arith.constant 0 : index
    %c0_78 = arith.constant 0 : index
    %56 = vector.load %arg2[%c2_75, %c2_76, %c0_77, %c0_78] : memref<3x3x3x8xf32, #tpu.memory_space<vmem>>, vector<1x1x3x8xf32>
    %57 = vector.shape_cast %56 : vector<1x1x3x8xf32> to vector<3x8xf32>
    %cst_79 = arith.constant dense<0.000000e+00> : vector<256x8xf32>
    %58 = tpu.matmul %55, %57, %cst_79 {dimension_numbers = #tpu.dot_dimension_numbers<[1], [0], [0], [1], [0, 0, 1, 1], [], []>} : vector<256x3xf32>, vector<3x8xf32>, vector<256x8xf32> -> vector<256x8xf32>
    %59 = arith.addf %53, %58 : vector<256x8xf32>
    %c0_80 = arith.constant 0 : index
    %c0_81 = arith.constant 0 : index
    %60 = vector.load %arg3[%c0_80, %c0_81] : memref<1x8xf32, #tpu.memory_space<vmem>>, vector<1x8xf32>
    %61 = vector.broadcast %60 : vector<1x8xf32> to vector<256x8xf32>
    %62 = arith.addf %59, %61 : vector<256x8xf32>
    %cst_82 = arith.constant 0.000000e+00 : f32
    %63 = vector.broadcast %cst_82 : f32 to vector<256x8xf32>
    %64 = arith.maximumf %62, %63 : vector<256x8xf32>
    %65 = vector.shape_cast %64 : vector<256x8xf32> to vector<8x2x16x8xf32>
    %66 = vector.extract_strided_slice %65 {offsets = [0, 0, 0, 0], sizes = [8, 1, 16, 8], strides = [1, 1, 1, 1]} : vector<8x2x16x8xf32> to vector<8x1x16x8xf32>
    %67 = vector.shape_cast %66 : vector<8x1x16x8xf32> to vector<8x16x8xf32>
    %68 = vector.extract_strided_slice %65 {offsets = [0, 1, 0, 0], sizes = [8, 1, 16, 8], strides = [1, 1, 1, 1]} : vector<8x2x16x8xf32> to vector<8x1x16x8xf32>
    %69 = vector.shape_cast %68 : vector<8x1x16x8xf32> to vector<8x16x8xf32>
    %70 = arith.maximumf %67, %69 : vector<8x16x8xf32>
    %71 = vector.shape_cast %70 : vector<8x16x8xf32> to vector<128x8xf32>
    %72 = tpu.iota {dimensions = array<i32: 0>} : vector<64x128xi32>
    %73 = tpu.iota {dimensions = array<i32: 1>} : vector<64x128xi32>
    %c2_i32 = arith.constant 2 : i32
    %74 = vector.broadcast %c2_i32 : i32 to vector<64x128xi32>
    %75 = arith.muli %74, %72 : vector<64x128xi32>
    %76 = arith.cmpi eq, %73, %75 : vector<64x128xi32>
    %77 = arith.extui %76 : vector<64x128xi1> to vector<64x128xi32>
    %78 = arith.sitofp %77 : vector<64x128xi32> to vector<64x128xf32>
    %c2_i32_83 = arith.constant 2 : i32
    %79 = vector.broadcast %c2_i32_83 : i32 to vector<64x128xi32>
    %80 = arith.muli %79, %72 : vector<64x128xi32>
    %c1_i32 = arith.constant 1 : i32
    %81 = vector.broadcast %c1_i32 : i32 to vector<64x128xi32>
    %82 = arith.addi %80, %81 : vector<64x128xi32>
    %83 = arith.cmpi eq, %73, %82 : vector<64x128xi32>
    %84 = arith.extui %83 : vector<64x128xi1> to vector<64x128xi32>
    %85 = arith.sitofp %84 : vector<64x128xi32> to vector<64x128xf32>
    %cst_84 = arith.constant dense<0.000000e+00> : vector<64x8xf32>
    %86 = tpu.matmul %78, %71, %cst_84 {dimension_numbers = #tpu.dot_dimension_numbers<[1], [0], [0], [1], [0, 0, 1, 1], [], []>} : vector<64x128xf32>, vector<128x8xf32>, vector<64x8xf32> -> vector<64x8xf32>
    %cst_85 = arith.constant dense<0.000000e+00> : vector<64x8xf32>
    %87 = tpu.matmul %85, %71, %cst_85 {dimension_numbers = #tpu.dot_dimension_numbers<[1], [0], [0], [1], [0, 0, 1, 1], [], []>} : vector<64x128xf32>, vector<128x8xf32>, vector<64x8xf32> -> vector<64x8xf32>
    %88 = arith.maximumf %86, %87 : vector<64x8xf32>
    %cst_86 = arith.constant 0.000000e+00 : f32
    %89 = vector.broadcast %cst_86 : f32 to vector<10x10x8xf32>
    %c0_87 = arith.constant 0 : index
    %c0_88 = arith.constant 0 : index
    %c0_89 = arith.constant 0 : index
    %90 = vector.load %arg8[%c0_87, %c0_88, %c0_89] : memref<10x10x8xf32, #tpu.memory_space<vmem>>, vector<10x10x8xf32>
    tpu.vector_store %arg8[%c0_87, %c0_88, %c0_89], %89 {strides = array<i32>} : memref<10x10x8xf32, #tpu.memory_space<vmem>>, vector<10x10x8xf32>,
    %91 = vector.shape_cast %88 : vector<64x8xf32> to vector<8x8x8xf32>
    %c1_90 = arith.constant 1 : index
    %c1_91 = arith.constant 1 : index
    %c0_92 = arith.constant 0 : index
    %92 = vector.load %arg8[%c1_90, %c1_91, %c0_92] : memref<10x10x8xf32, #tpu.memory_space<vmem>>, vector<8x8x8xf32>
    tpu.vector_store %arg8[%c1_90, %c1_91, %c0_92], %91 {strides = array<i32>} : memref<10x10x8xf32, #tpu.memory_space<vmem>>, vector<8x8x8xf32>,
    %cst_93 = arith.constant 0.000000e+00 : f32
    %93 = vector.broadcast %cst_93 : f32 to vector<64x16xf32>
    %c0_94 = arith.constant 0 : index
    %c0_95 = arith.constant 0 : index
    %c0_96 = arith.constant 0 : index
    %94 = vector.load %arg8[%c0_94, %c0_95, %c0_96] : memref<10x10x8xf32, #tpu.memory_space<vmem>>, vector<8x8x8xf32>
    %95 = vector.shape_cast %94 : vector<8x8x8xf32> to vector<64x8xf32>
    %c0_97 = arith.constant 0 : index
    %c0_98 = arith.constant 0 : index
    %c0_99 = arith.constant 0 : index
    %c0_100 = arith.constant 0 : index
    %96 = vector.load %arg4[%c0_97, %c0_98, %c0_99, %c0_100] : memref<3x3x8x16xf32, #tpu.memory_space<vmem>>, vector<1x1x8x16xf32>
    %97 = vector.shape_cast %96 : vector<1x1x8x16xf32> to vector<8x16xf32>
    %cst_101 = arith.constant dense<0.000000e+00> : vector<64x16xf32>
    %98 = tpu.matmul %95, %97, %cst_101 {dimension_numbers = #tpu.dot_dimension_numbers<[1], [0], [0], [1], [0, 0, 1, 1], [], []>} : vector<64x8xf32>, vector<8x16xf32>, vector<64x16xf32> -> vector<64x16xf32>
    %99 = arith.addf %93, %98 : vector<64x16xf32>
    %c0_102 = arith.constant 0 : index
    %c1_103 = arith.constant 1 : index
    %c0_104 = arith.constant 0 : index
    %100 = vector.load %arg8[%c0_102, %c1_103, %c0_104] : memref<10x10x8xf32, #tpu.memory_space<vmem>>, vector<8x8x8xf32>
    %101 = vector.shape_cast %100 : vector<8x8x8xf32> to vector<64x8xf32>
    %c0_105 = arith.constant 0 : index
    %c1_106 = arith.constant 1 : index
    %c0_107 = arith.constant 0 : index
    %c0_108 = arith.constant 0 : index
    %102 = vector.load %arg4[%c0_105, %c1_106, %c0_107, %c0_108] : memref<3x3x8x16xf32, #tpu.memory_space<vmem>>, vector<1x1x8x16xf32>
    %103 = vector.shape_cast %102 : vector<1x1x8x16xf32> to vector<8x16xf32>
    %cst_109 = arith.constant dense<0.000000e+00> : vector<64x16xf32>
    %104 = tpu.matmul %101, %103, %cst_109 {dimension_numbers = #tpu.dot_dimension_numbers<[1], [0], [0], [1], [0, 0, 1, 1], [], []>} : vector<64x8xf32>, vector<8x16xf32>, vector<64x16xf32> -> vector<64x16xf32>
    %105 = arith.addf %99, %104 : vector<64x16xf32>
    %c0_110 = arith.constant 0 : index
    %c2_111 = arith.constant 2 : index
    %c0_112 = arith.constant 0 : index
    %106 = vector.load %arg8[%c0_110, %c2_111, %c0_112] : memref<10x10x8xf32, #tpu.memory_space<vmem>>, vector<8x8x8xf32>
    %107 = vector.shape_cast %106 : vector<8x8x8xf32> to vector<64x8xf32>
    %c0_113 = arith.constant 0 : index
    %c2_114 = arith.constant 2 : index
    %c0_115 = arith.constant 0 : index
    %c0_116 = arith.constant 0 : index
    %108 = vector.load %arg4[%c0_113, %c2_114, %c0_115, %c0_116] : memref<3x3x8x16xf32, #tpu.memory_space<vmem>>, vector<1x1x8x16xf32>
    %109 = vector.shape_cast %108 : vector<1x1x8x16xf32> to vector<8x16xf32>
    %cst_117 = arith.constant dense<0.000000e+00> : vector<64x16xf32>
    %110 = tpu.matmul %107, %109, %cst_117 {dimension_numbers = #tpu.dot_dimension_numbers<[1], [0], [0], [1], [0, 0, 1, 1], [], []>} : vector<64x8xf32>, vector<8x16xf32>, vector<64x16xf32> -> vector<64x16xf32>
    %111 = arith.addf %105, %110 : vector<64x16xf32>
    %c1_118 = arith.constant 1 : index
    %c0_119 = arith.constant 0 : index
    %c0_120 = arith.constant 0 : index
    %112 = vector.load %arg8[%c1_118, %c0_119, %c0_120] : memref<10x10x8xf32, #tpu.memory_space<vmem>>, vector<8x8x8xf32>
    %113 = vector.shape_cast %112 : vector<8x8x8xf32> to vector<64x8xf32>
    %c1_121 = arith.constant 1 : index
    %c0_122 = arith.constant 0 : index
    %c0_123 = arith.constant 0 : index
    %c0_124 = arith.constant 0 : index
    %114 = vector.load %arg4[%c1_121, %c0_122, %c0_123, %c0_124] : memref<3x3x8x16xf32, #tpu.memory_space<vmem>>, vector<1x1x8x16xf32>
    %115 = vector.shape_cast %114 : vector<1x1x8x16xf32> to vector<8x16xf32>
    %cst_125 = arith.constant dense<0.000000e+00> : vector<64x16xf32>
    %116 = tpu.matmul %113, %115, %cst_125 {dimension_numbers = #tpu.dot_dimension_numbers<[1], [0], [0], [1], [0, 0, 1, 1], [], []>} : vector<64x8xf32>, vector<8x16xf32>, vector<64x16xf32> -> vector<64x16xf32>
    %117 = arith.addf %111, %116 : vector<64x16xf32>
    %c1_126 = arith.constant 1 : index
    %c1_127 = arith.constant 1 : index
    %c0_128 = arith.constant 0 : index
    %118 = vector.load %arg8[%c1_126, %c1_127, %c0_128] : memref<10x10x8xf32, #tpu.memory_space<vmem>>, vector<8x8x8xf32>
    %119 = vector.shape_cast %118 : vector<8x8x8xf32> to vector<64x8xf32>
    %c1_129 = arith.constant 1 : index
    %c1_130 = arith.constant 1 : index
    %c0_131 = arith.constant 0 : index
    %c0_132 = arith.constant 0 : index
    %120 = vector.load %arg4[%c1_129, %c1_130, %c0_131, %c0_132] : memref<3x3x8x16xf32, #tpu.memory_space<vmem>>, vector<1x1x8x16xf32>
    %121 = vector.shape_cast %120 : vector<1x1x8x16xf32> to vector<8x16xf32>
    %cst_133 = arith.constant dense<0.000000e+00> : vector<64x16xf32>
    %122 = tpu.matmul %119, %121, %cst_133 {dimension_numbers = #tpu.dot_dimension_numbers<[1], [0], [0], [1], [0, 0, 1, 1], [], []>} : vector<64x8xf32>, vector<8x16xf32>, vector<64x16xf32> -> vector<64x16xf32>
    %123 = arith.addf %117, %122 : vector<64x16xf32>
    %c1_134 = arith.constant 1 : index
    %c2_135 = arith.constant 2 : index
    %c0_136 = arith.constant 0 : index
    %124 = vector.load %arg8[%c1_134, %c2_135, %c0_136] : memref<10x10x8xf32, #tpu.memory_space<vmem>>, vector<8x8x8xf32>
    %125 = vector.shape_cast %124 : vector<8x8x8xf32> to vector<64x8xf32>
    %c1_137 = arith.constant 1 : index
    %c2_138 = arith.constant 2 : index
    %c0_139 = arith.constant 0 : index
    %c0_140 = arith.constant 0 : index
    %126 = vector.load %arg4[%c1_137, %c2_138, %c0_139, %c0_140] : memref<3x3x8x16xf32, #tpu.memory_space<vmem>>, vector<1x1x8x16xf32>
    %127 = vector.shape_cast %126 : vector<1x1x8x16xf32> to vector<8x16xf32>
    %cst_141 = arith.constant dense<0.000000e+00> : vector<64x16xf32>
    %128 = tpu.matmul %125, %127, %cst_141 {dimension_numbers = #tpu.dot_dimension_numbers<[1], [0], [0], [1], [0, 0, 1, 1], [], []>} : vector<64x8xf32>, vector<8x16xf32>, vector<64x16xf32> -> vector<64x16xf32>
    %129 = arith.addf %123, %128 : vector<64x16xf32>
    %c2_142 = arith.constant 2 : index
    %c0_143 = arith.constant 0 : index
    %c0_144 = arith.constant 0 : index
    %130 = vector.load %arg8[%c2_142, %c0_143, %c0_144] : memref<10x10x8xf32, #tpu.memory_space<vmem>>, vector<8x8x8xf32>
    %131 = vector.shape_cast %130 : vector<8x8x8xf32> to vector<64x8xf32>
    %c2_145 = arith.constant 2 : index
    %c0_146 = arith.constant 0 : index
    %c0_147 = arith.constant 0 : index
    %c0_148 = arith.constant 0 : index
    %132 = vector.load %arg4[%c2_145, %c0_146, %c0_147, %c0_148] : memref<3x3x8x16xf32, #tpu.memory_space<vmem>>, vector<1x1x8x16xf32>
    %133 = vector.shape_cast %132 : vector<1x1x8x16xf32> to vector<8x16xf32>
    %cst_149 = arith.constant dense<0.000000e+00> : vector<64x16xf32>
    %134 = tpu.matmul %131, %133, %cst_149 {dimension_numbers = #tpu.dot_dimension_numbers<[1], [0], [0], [1], [0, 0, 1, 1], [], []>} : vector<64x8xf32>, vector<8x16xf32>, vector<64x16xf32> -> vector<64x16xf32>
    %135 = arith.addf %129, %134 : vector<64x16xf32>
    %c2_150 = arith.constant 2 : index
    %c1_151 = arith.constant 1 : index
    %c0_152 = arith.constant 0 : index
    %136 = vector.load %arg8[%c2_150, %c1_151, %c0_152] : memref<10x10x8xf32, #tpu.memory_space<vmem>>, vector<8x8x8xf32>
    %137 = vector.shape_cast %136 : vector<8x8x8xf32> to vector<64x8xf32>
    %c2_153 = arith.constant 2 : index
    %c1_154 = arith.constant 1 : index
    %c0_155 = arith.constant 0 : index
    %c0_156 = arith.constant 0 : index
    %138 = vector.load %arg4[%c2_153, %c1_154, %c0_155, %c0_156] : memref<3x3x8x16xf32, #tpu.memory_space<vmem>>, vector<1x1x8x16xf32>
    %139 = vector.shape_cast %138 : vector<1x1x8x16xf32> to vector<8x16xf32>
    %cst_157 = arith.constant dense<0.000000e+00> : vector<64x16xf32>
    %140 = tpu.matmul %137, %139, %cst_157 {dimension_numbers = #tpu.dot_dimension_numbers<[1], [0], [0], [1], [0, 0, 1, 1], [], []>} : vector<64x8xf32>, vector<8x16xf32>, vector<64x16xf32> -> vector<64x16xf32>
    %141 = arith.addf %135, %140 : vector<64x16xf32>
    %c2_158 = arith.constant 2 : index
    %c2_159 = arith.constant 2 : index
    %c0_160 = arith.constant 0 : index
    %142 = vector.load %arg8[%c2_158, %c2_159, %c0_160] : memref<10x10x8xf32, #tpu.memory_space<vmem>>, vector<8x8x8xf32>
    %143 = vector.shape_cast %142 : vector<8x8x8xf32> to vector<64x8xf32>
    %c2_161 = arith.constant 2 : index
    %c2_162 = arith.constant 2 : index
    %c0_163 = arith.constant 0 : index
    %c0_164 = arith.constant 0 : index
    %144 = vector.load %arg4[%c2_161, %c2_162, %c0_163, %c0_164] : memref<3x3x8x16xf32, #tpu.memory_space<vmem>>, vector<1x1x8x16xf32>
    %145 = vector.shape_cast %144 : vector<1x1x8x16xf32> to vector<8x16xf32>
    %cst_165 = arith.constant dense<0.000000e+00> : vector<64x16xf32>
    %146 = tpu.matmul %143, %145, %cst_165 {dimension_numbers = #tpu.dot_dimension_numbers<[1], [0], [0], [1], [0, 0, 1, 1], [], []>} : vector<64x8xf32>, vector<8x16xf32>, vector<64x16xf32> -> vector<64x16xf32>
    %147 = arith.addf %141, %146 : vector<64x16xf32>
    %c0_166 = arith.constant 0 : index
    %c0_167 = arith.constant 0 : index
    %148 = vector.load %arg5[%c0_166, %c0_167] : memref<1x16xf32, #tpu.memory_space<vmem>>, vector<1x16xf32>
    %149 = vector.broadcast %148 : vector<1x16xf32> to vector<64x16xf32>
    %150 = arith.addf %147, %149 : vector<64x16xf32>
    %cst_168 = arith.constant 0.000000e+00 : f32
    %151 = vector.broadcast %cst_168 : f32 to vector<64x16xf32>
    %152 = arith.maximumf %150, %151 : vector<64x16xf32>
    %153 = vector.shape_cast %152 : vector<64x16xf32> to vector<4x2x8x16xf32>
    %154 = vector.extract_strided_slice %153 {offsets = [0, 0, 0, 0], sizes = [4, 1, 8, 16], strides = [1, 1, 1, 1]} : vector<4x2x8x16xf32> to vector<4x1x8x16xf32>
    %155 = vector.shape_cast %154 : vector<4x1x8x16xf32> to vector<4x8x16xf32>
    %156 = vector.extract_strided_slice %153 {offsets = [0, 1, 0, 0], sizes = [4, 1, 8, 16], strides = [1, 1, 1, 1]} : vector<4x2x8x16xf32> to vector<4x1x8x16xf32>
    %157 = vector.shape_cast %156 : vector<4x1x8x16xf32> to vector<4x8x16xf32>
    %158 = arith.maximumf %155, %157 : vector<4x8x16xf32>
    %159 = vector.shape_cast %158 : vector<4x8x16xf32> to vector<32x16xf32>
    %160 = tpu.iota {dimensions = array<i32: 0>} : vector<16x32xi32>
    %161 = tpu.iota {dimensions = array<i32: 1>} : vector<16x32xi32>
    %c2_i32_169 = arith.constant 2 : i32
    %162 = vector.broadcast %c2_i32_169 : i32 to vector<16x32xi32>
    %163 = arith.muli %162, %160 : vector<16x32xi32>
    %164 = arith.cmpi eq, %161, %163 : vector<16x32xi32>
    %165 = arith.extui %164 : vector<16x32xi1> to vector<16x32xi32>
    %166 = arith.sitofp %165 : vector<16x32xi32> to vector<16x32xf32>
    %c2_i32_170 = arith.constant 2 : i32
    %167 = vector.broadcast %c2_i32_170 : i32 to vector<16x32xi32>
    %168 = arith.muli %167, %160 : vector<16x32xi32>
    %c1_i32_171 = arith.constant 1 : i32
    %169 = vector.broadcast %c1_i32_171 : i32 to vector<16x32xi32>
    %170 = arith.addi %168, %169 : vector<16x32xi32>
    %171 = arith.cmpi eq, %161, %170 : vector<16x32xi32>
    %172 = arith.extui %171 : vector<16x32xi1> to vector<16x32xi32>
    %173 = arith.sitofp %172 : vector<16x32xi32> to vector<16x32xf32>
    %cst_172 = arith.constant dense<0.000000e+00> : vector<16x16xf32>
    %174 = tpu.matmul %166, %159, %cst_172 {dimension_numbers = #tpu.dot_dimension_numbers<[1], [0], [0], [1], [0, 0, 1, 1], [], []>} : vector<16x32xf32>, vector<32x16xf32>, vector<16x16xf32> -> vector<16x16xf32>
    %cst_173 = arith.constant dense<0.000000e+00> : vector<16x16xf32>
    %175 = tpu.matmul %173, %159, %cst_173 {dimension_numbers = #tpu.dot_dimension_numbers<[1], [0], [0], [1], [0, 0, 1, 1], [], []>} : vector<16x32xf32>, vector<32x16xf32>, vector<16x16xf32> -> vector<16x16xf32>
    %176 = arith.maximumf %174, %175 : vector<16x16xf32>
    %c0_174 = arith.constant 0 : index
    %c0_175 = arith.constant 0 : index
    %c0_176 = arith.constant 0 : index
    %177 = vector.load %arg6[%c0_174, %c0_175, %c0_176] : memref<1x16x16xf32, #tpu.memory_space<vmem>>, vector<1x16x16xf32>
    %178 = vector.shape_cast %177 : vector<1x16x16xf32> to vector<16x16xf32>
    %179 = vector.shape_cast %176 : vector<16x16xf32> to vector<1x16x16xf32>
    tpu.vector_store %arg6[%c0_174, %c0_175, %c0_176], %179 {strides = array<i32>} : memref<1x16x16xf32, #tpu.memory_space<vmem>>, vector<1x16x16xf32>,
    return
  }
  func.func @transform_0(%arg0: i32) -> (i32, i32, i32, i32) {
    %c0_i32 = arith.constant 0 : i32
    %c0_i32_0 = arith.constant 0 : i32
    %c0_i32_1 = arith.constant 0 : i32
    %c0_i32_2 = arith.constant 0 : i32
    return %arg0, %c0_i32, %c0_i32_0, %c0_i32_1 : i32, i32, i32, i32
  }
  func.func @transform_1(%arg0: i32) -> (i32, i32, i32, i32) {
    %c0_i32 = arith.constant 0 : i32
    %c0_i32_0 = arith.constant 0 : i32
    %c0_i32_1 = arith.constant 0 : i32
    %c0_i32_2 = arith.constant 0 : i32
    %c0_i32_3 = arith.constant 0 : i32
    return %c0_i32, %c0_i32_0, %c0_i32_1, %c0_i32_2 : i32, i32, i32, i32
  }
  func.func @transform_2(%arg0: i32) -> (i32, i32) {
    %c0_i32 = arith.constant 0 : i32
    %c0_i32_0 = arith.constant 0 : i32
    %c0_i32_1 = arith.constant 0 : i32
    return %c0_i32, %c0_i32_0 : i32, i32
  }
  func.func @transform_3(%arg0: i32) -> (i32, i32, i32, i32) {
    %c0_i32 = arith.constant 0 : i32
    %c0_i32_0 = arith.constant 0 : i32
    %c0_i32_1 = arith.constant 0 : i32
    %c0_i32_2 = arith.constant 0 : i32
    %c0_i32_3 = arith.constant 0 : i32
    return %c0_i32, %c0_i32_0, %c0_i32_1, %c0_i32_2 : i32, i32, i32, i32
  }
  func.func @transform_4(%arg0: i32) -> (i32, i32) {
    %c0_i32 = arith.constant 0 : i32
    %c0_i32_0 = arith.constant 0 : i32
    %c0_i32_1 = arith.constant 0 : i32
    return %c0_i32, %c0_i32_0 : i32, i32
  }
  func.func @transform_5(%arg0: i32) -> (i32, i32, i32) {
    %c0_i32 = arith.constant 0 : i32
    %c0_i32_0 = arith.constant 0 : i32
    %c0_i32_1 = arith.constant 0 : i32
    return %arg0, %c0_i32, %c0_i32_0 : i32, i32, i32
  }
}

module attributes {stable_mosaic.version = 11 : i64} {
  func.func @classifier_kernel(%arg0: i32, %arg1: memref<1x1x256xf32, #tpu.memory_space<vmem>>, %arg2: memref<256x128xf32, #tpu.memory_space<vmem>>, %arg3: memref<1x128xf32, #tpu.memory_space<vmem>>, %arg4: memref<128x128xf32, #tpu.memory_space<vmem>>, %arg5: memref<1x128xf32, #tpu.memory_space<vmem>>, %arg6: memref<128x16xf32, #tpu.memory_space<vmem>>, %arg7: memref<1x16xf32, #tpu.memory_space<vmem>>, %arg8: memref<1x1x16xf32, #tpu.memory_space<vmem>>) attributes {dimension_semantics = [#tpu.dimension_semantics<parallel>], iteration_bounds = array<i64: 2>, scalar_prefetch = 0 : i64, scratch_operands = 0 : i64, tpu.core_type = #tpu.core_type<tc>, window_params = [{transform_indices = @transform_0, window_bounds = array<i64: 1, 1, 256>}, {pipeline_mode = #tpu.pipeline_mode<synchronous>, transform_indices = @transform_1, window_bounds = array<i64: 256, 128>}, {pipeline_mode = #tpu.pipeline_mode<synchronous>, transform_indices = @transform_2, window_bounds = array<i64: 1, 128>}, {pipeline_mode = #tpu.pipeline_mode<synchronous>, transform_indices = @transform_3, window_bounds = array<i64: 128, 128>}, {pipeline_mode = #tpu.pipeline_mode<synchronous>, transform_indices = @transform_4, window_bounds = array<i64: 1, 128>}, {pipeline_mode = #tpu.pipeline_mode<synchronous>, transform_indices = @transform_5, window_bounds = array<i64: 128, 16>}, {pipeline_mode = #tpu.pipeline_mode<synchronous>, transform_indices = @transform_6, window_bounds = array<i64: 1, 16>}, {transform_indices = @transform_7, window_bounds = array<i64: 1, 1, 16>}]} {
    %c0 = arith.constant 0 : index
    %c0_0 = arith.constant 0 : index
    %c0_1 = arith.constant 0 : index
    %0 = vector.load %arg1[%c0, %c0_0, %c0_1] : memref<1x1x256xf32, #tpu.memory_space<vmem>>, vector<1x1x256xf32>
    %1 = vector.shape_cast %0 : vector<1x1x256xf32> to vector<1x256xf32>
    %c0_2 = arith.constant 0 : index
    %c0_3 = arith.constant 0 : index
    %2 = vector.load %arg2[%c0_2, %c0_3] : memref<256x128xf32, #tpu.memory_space<vmem>>, vector<256x128xf32>
    %cst = arith.constant dense<0.000000e+00> : vector<1x128xf32>
    %3 = tpu.matmul %1, %2, %cst {dimension_numbers = #tpu.dot_dimension_numbers<[1], [0], [0], [1], [0, 0, 1, 1], [], []>} : vector<1x256xf32>, vector<256x128xf32>, vector<1x128xf32> -> vector<1x128xf32>
    %c0_4 = arith.constant 0 : index
    %c0_5 = arith.constant 0 : index
    %4 = vector.load %arg3[%c0_4, %c0_5] : memref<1x128xf32, #tpu.memory_space<vmem>>, vector<1x128xf32>
    %5 = arith.addf %3, %4 : vector<1x128xf32>
    %cst_6 = arith.constant 0.000000e+00 : f32
    %6 = vector.broadcast %cst_6 : f32 to vector<1x128xf32>
    %7 = arith.maximumf %5, %6 : vector<1x128xf32>
    %c0_7 = arith.constant 0 : index
    %c0_8 = arith.constant 0 : index
    %8 = vector.load %arg4[%c0_7, %c0_8] : memref<128x128xf32, #tpu.memory_space<vmem>>, vector<128x128xf32>
    %cst_9 = arith.constant dense<0.000000e+00> : vector<1x128xf32>
    %9 = tpu.matmul %7, %8, %cst_9 {dimension_numbers = #tpu.dot_dimension_numbers<[1], [0], [0], [1], [0, 0, 1, 1], [], []>} : vector<1x128xf32>, vector<128x128xf32>, vector<1x128xf32> -> vector<1x128xf32>
    %c0_10 = arith.constant 0 : index
    %c0_11 = arith.constant 0 : index
    %10 = vector.load %arg5[%c0_10, %c0_11] : memref<1x128xf32, #tpu.memory_space<vmem>>, vector<1x128xf32>
    %11 = arith.addf %9, %10 : vector<1x128xf32>
    %cst_12 = arith.constant 0.000000e+00 : f32
    %12 = vector.broadcast %cst_12 : f32 to vector<1x128xf32>
    %13 = arith.maximumf %11, %12 : vector<1x128xf32>
    %c0_13 = arith.constant 0 : index
    %c0_14 = arith.constant 0 : index
    %14 = vector.load %arg6[%c0_13, %c0_14] : memref<128x16xf32, #tpu.memory_space<vmem>>, vector<128x16xf32>
    %cst_15 = arith.constant dense<0.000000e+00> : vector<1x16xf32>
    %15 = tpu.matmul %13, %14, %cst_15 {dimension_numbers = #tpu.dot_dimension_numbers<[1], [0], [0], [1], [0, 0, 1, 1], [], []>} : vector<1x128xf32>, vector<128x16xf32>, vector<1x16xf32> -> vector<1x16xf32>
    %c0_16 = arith.constant 0 : index
    %c0_17 = arith.constant 0 : index
    %16 = vector.load %arg7[%c0_16, %c0_17] : memref<1x16xf32, #tpu.memory_space<vmem>>, vector<1x16xf32>
    %17 = arith.addf %15, %16 : vector<1x16xf32>
    %c0_18 = arith.constant 0 : index
    %c0_19 = arith.constant 0 : index
    %c0_20 = arith.constant 0 : index
    %18 = vector.load %arg8[%c0_18, %c0_19, %c0_20] : memref<1x1x16xf32, #tpu.memory_space<vmem>>, vector<1x1x16xf32>
    %19 = vector.shape_cast %18 : vector<1x1x16xf32> to vector<1x16xf32>
    %20 = vector.shape_cast %17 : vector<1x16xf32> to vector<1x1x16xf32>
    tpu.vector_store %arg8[%c0_18, %c0_19, %c0_20], %20 {strides = array<i32>} : memref<1x1x16xf32, #tpu.memory_space<vmem>>, vector<1x1x16xf32>,
    return
  }
  func.func @transform_0(%arg0: i32) -> (i32, i32, i32) {
    %c0_i32 = arith.constant 0 : i32
    %c0_i32_0 = arith.constant 0 : i32
    %c0_i32_1 = arith.constant 0 : i32
    return %arg0, %c0_i32, %c0_i32_0 : i32, i32, i32
  }
  func.func @transform_1(%arg0: i32) -> (i32, i32) {
    %c0_i32 = arith.constant 0 : i32
    %c0_i32_0 = arith.constant 0 : i32
    %c0_i32_1 = arith.constant 0 : i32
    return %c0_i32, %c0_i32_0 : i32, i32
  }
  func.func @transform_2(%arg0: i32) -> (i32, i32) {
    %c0_i32 = arith.constant 0 : i32
    %c0_i32_0 = arith.constant 0 : i32
    %c0_i32_1 = arith.constant 0 : i32
    return %c0_i32, %c0_i32_0 : i32, i32
  }
  func.func @transform_3(%arg0: i32) -> (i32, i32) {
    %c0_i32 = arith.constant 0 : i32
    %c0_i32_0 = arith.constant 0 : i32
    %c0_i32_1 = arith.constant 0 : i32
    return %c0_i32, %c0_i32_0 : i32, i32
  }
  func.func @transform_4(%arg0: i32) -> (i32, i32) {
    %c0_i32 = arith.constant 0 : i32
    %c0_i32_0 = arith.constant 0 : i32
    %c0_i32_1 = arith.constant 0 : i32
    return %c0_i32, %c0_i32_0 : i32, i32
  }
  func.func @transform_5(%arg0: i32) -> (i32, i32) {
    %c0_i32 = arith.constant 0 : i32
    %c0_i32_0 = arith.constant 0 : i32
    %c0_i32_1 = arith.constant 0 : i32
    return %c0_i32, %c0_i32_0 : i32, i32
  }
  func.func @transform_6(%arg0: i32) -> (i32, i32) {
    %c0_i32 = arith.constant 0 : i32
    %c0_i32_0 = arith.constant 0 : i32
    %c0_i32_1 = arith.constant 0 : i32
    return %c0_i32, %c0_i32_0 : i32, i32
  }
  func.func @transform_7(%arg0: i32) -> (i32, i32, i32) {
    %c0_i32 = arith.constant 0 : i32
    %c0_i32_0 = arith.constant 0 : i32
    %c0_i32_1 = arith.constant 0 : i32
    return %arg0, %c0_i32, %c0_i32_0 : i32, i32, i32
  }
}

</mosaic_0001>

<bundles_post_ra>
// kernel: vgg_forward.3
= control target key start
LH: loop header
LB: loop body
LE: loop exit
PB: predicated region body
PF: predicated region fallthrough
CT: control target
= control target key end

     0   :  { %12 = vsyncpa [#allocation3], 0  ;;  %s936_s0 = inlined_call_operand.vmem [shape: f32[2,1,256], index: 0, kind: input, shape index: {}]   ;;  %s937_s1 = inlined_call_operand.vmem [shape: f32[256,128], index: 1, kind: input, shape index: {}]   ;;  %s938_s2 = inlined_call_operand.vmem [shape: f32[1,128], index: 2, kind: input, shape index: {}]   ;;  %s939_s3 = inlined_call_operand.vmem [shape: f32[128,128], index: 3, kind: input, shape index: {}]   ;;  %s940_s4 = inlined_call_operand.vmem [shape: f32[1,128], index: 4, kind: input, shape index: {}]   ;;  %s941_s5 = inlined_call_operand.vmem [shape: f32[128,16], index: 5, kind: input, shape index: {}]   ;;  %s942_s6 = inlined_call_operand.vmem [shape: f32[1,16], index: 6, kind: input, shape index: {}]   ;;  %s943_s7 = inlined_call_operand.hbm [shape: f32[2,1,16], index: 7, kind: output, shape index: {}]  }
   0x1   :  { %14 = vsyncpa [#allocation3 + $0x1], 0  ;;  %s648_s24 = smov 0   ;;  %s650_s25 = smov 0  }
   0x2   :  { %s652_s26 = smov 0   ;;  %s654_s27 = smov 0  }
   0x3 LB: > { %s669_s28 = sadd.s32 4294967295, %s606_s27   ;;  %s498_s29 = sadd.s32 4294967294, %s606_s27   ;;  %s606_s27 = sphi %s654_s27, %s949_s27   ;;  %s602_s26 = sphi %s652_s26, %s948_s26   ;;  %s598_s25 = sphi %s650_s25, %s947_s25   ;;  %s594_s24 = sphi %s648_s24, %s946_s24  }
   0x4   : > { %s673_s30 = sadd.s32 1, %s606_s27   ;;  %s179_s8 = sadd.s32 1, %s602_s26 }
   0x5   : > { %s176_s9 = ssub.s32 %s606_s27, %s673_s30  ;;  %p189_p0 = scmp.ne.s32.totalorder %s602_s26, %s598_s25 }
   0x6   : > { %p177_p1 = scmp.eq.s32.totalorder %s176_s9, 0  ;;  %p190_p2 = scmp.eq.s32.totalorder %s669_s28, 1 }
   0x7   : > { %p195_p3 = scmp.ne.s32.totalorder %s598_s25, %s594_s24  ;;  %p196_p4 = scmp.eq.s32.totalorder %s498_s29, 1 }
   0x8   : > { %s684_s10 = scalar_select %p177_p1, %s602_s26, %s179_s8  }
   0x9   : > { %p686_p5 = por %p190_p2, %p189_p0  ;;  %p690_p6 = por %p196_p4, %p195_p3 }
   0xa   : > { %p501_p7 = scmp.ge.s32.totalorder %s606_s27, 1  ;;  %p239_p8 = scmp.lt.s32.totalorder %s606_s27, 3 }
   0xc   : > { %p240_p9 = pnand %p501_p7, %p239_p8 }
   0xd   : > { %p269_p10 = scmp.lt.s32.totalorder (!%p240_p9), %s669_s28, 1  ;;  %s267_s29 = sand.u32 (!%p240_p9), 1, %s598_s25  }
   0xe   : > { %243 = sbr.rel (%p240_p9) target bundleno = 456 (0x1c8), region = 48  ;;  %s439_s16 = scalar_lea.hbm (!%p240_p9), %s943_s7, %s669_s28 }
   0xf   : > { %s268_s18 = scalar_lea.vmem (!%p240_p9), [#allocation2], %s267_s29  ;;  %s443_s20 = sshll.u32 (!%p240_p9), %s439_s16, 4  ;;  %s444_s20 = int_to_ptr.hbm [resolvable:$true] %s443_s20 }
  0x10   : > { %s441_s19 = sshll.u32 (!%p240_p9), %s268_s18, 4  ;;  %s431_s21 = scalar_lea.sflag (!%p240_p9), [#allocation3], %s267_s29  ;;  %s442_s19 = int_to_ptr.vmem [resolvable:$true] %s441_s19 }
  0x11   : > { %s564_s23 = scalar_lea.hbm (!%p240_p9), %s943_s7, 2 }
  0x13   : > { %v289_v0 = vld [vmem:[%s937_s1 + $0x78] sm:$0xff]  ;;  %v288_v1 = vld [vmem:[%s937_s1 + $0x70] sm:$0xff]  ;;  %v287_v4 = vld [vmem:[%s937_s1 + $0x68] sm:$0xff]  ;;  %s270_s13 = scalar_select %p269_p10, %s669_s28, 1  ;;  %vm428_vm0 = vcmask 122880  }
  0x14   : > { %v305_v2 = vld [vmem:[%s937_s1 + $0xf8] sm:$0xff]  ;;  %312 = vmatpush.msra.mxu0 %v289_v0  ;;  %v304_v3 = vld [vmem:[%s937_s1 + $0xf0] sm:$0xff]  ;;  %v303_v5 = vld [vmem:[%s937_s1 + $0xe8] sm:$0xff] }
  0x15   : > { %332 = vmatpush.msra.mxu1 %v305_v2  ;;  %v286_v6 = vld [vmem:[%s937_s1 + $0x60] sm:$0xff]  ;;  %v285_v8 = vld [vmem:[%s937_s1 + $0x58] sm:$0xff]  ;;  %v284_v10 = vld [vmem:[%s937_s1 + $0x50] sm:$0xff]  ;;  %s502_s9 = sshll.u32 %s270_s13, 1 }
  0x16   : > { %313 = vmatpush.msra.mxu0 %v288_v1  ;;  %v302_v7 = vld [vmem:[%s937_s1 + $0xe0] sm:$0xff]  ;;  %v301_v9 = vld [vmem:[%s937_s1 + $0xd8] sm:$0xff]  ;;  %v300_v11 = vld [vmem:[%s937_s1 + $0xd0] sm:$0xff]  ;;  %s272_s15 = scalar_lea.vmem %s936_s0, %s502_s9  ;;  %s558_s9 = sshra.s32 %s444_s20, 4  ;;  %s559_s9 = int_to_ptr.hbm [resolvable:$true] %s558_s9 }
  0x17   : > { %333 = vmatpush.msra.mxu1 %v304_v3  ;;  %v283_v12 = vld [vmem:[%s937_s1 + $0x48] sm:$0xff]  ;;  %v368_v14 = vld [vmem:[%s939_s3 + $0x78] sm:$0xff]  ;;  %v367_v15 = vld [vmem:[%s939_s3 + $0x70] sm:$0xff]  ;;  %s560_s13 = scalar_lea.hbm %s559_s9, 1  ;;  %p565_p0 = scmp.lt.s32.totalorder %s559_s9, %s943_s7 }
  0x18   : > { %314 = vmatpush.msra.mxu0 %v287_v4  ;;  %v299_v13 = vld [vmem:[%s937_s1 + $0xc8] sm:$0xff]  ;;  %v282_v16 = vld [vmem:[%s937_s1 + $0x40] sm:$0xff]  ;;  %370 = vmatpush.msra.mxu2 %v368_v14  ;;  %v281_v19 = vld [vmem:[%s937_s1 + $0x38] sm:$0xff]  ;;  %p561_p11 = scmp.ne.s32.totalorder %s559_s9, %s560_s13  ;;  %p566_p1 = scmp.lt.s32.totalorder %s564_s23, %s560_s13 }
  0x19   : > { %334 = vmatpush.msra.mxu1 %v303_v5  ;;  %v298_v17 = vld [vmem:[%s937_s1 + $0xc0] sm:$0xff]  ;;  %v366_v18 = vld [vmem:[%s939_s3 + $0x68] sm:$0xff]  ;;  %v297_v20 = vld [vmem:[%s937_s1 + $0xb8] sm:$0xff] }
  0x1a   : > { %315 = vmatpush.msra.mxu0 %v286_v6  ;;  %371 = vmatpush.msra.mxu2 %v367_v15  ;;  %v365_v21 = vld [vmem:[%s939_s3 + $0x60] sm:$0xff]  ;;  %v280_v22 = vld [vmem:[%s937_s1 + $0x30] sm:$0xff]  ;;  %v364_v24 = vld [vmem:[%s939_s3 + $0x58] sm:$0xff]  ;;  %p562_p12 = pnand %p561_p11, %p686_p5  ;;  %p567_p2 = por %p566_p1, %p565_p0 }
  0x1b   : > { %335 = vmatpush.msra.mxu1 %v302_v7  ;;  %v296_v23 = vld [vmem:[%s937_s1 + $0xb0] sm:$0xff]  ;;  %v279_v25 = vld [vmem:[%s937_s1 + $0x28] sm:$0xff]  ;;  %v278_v28 = vld [vmem:[%s937_s1 + $0x20] sm:$0xff] }
  0x1c   : > { %316 = vmatpush.msra.mxu0 %v285_v8  ;;  %372 = vmatpush.msra.mxu2 %v366_v18  ;;  %v295_v26 = vld [vmem:[%s937_s1 + $0xa8] sm:$0xff]  ;;  %v363_v27 = vld [vmem:[%s939_s3 + $0x50] sm:$0xff]  ;;  %v294_v29 = vld [vmem:[%s937_s1 + $0xa0] sm:$0xff]  ;;  %p563_p13 = pneg %p562_p12 }
  0x1d   : > { %336 = vmatpush.msra.mxu1 %v301_v9  ;;  %v362_v30 = vld [vmem:[%s939_s3 + $0x48] sm:$0xff]  ;;  %v277_v31 = vld [vmem:[%s937_s1 + $0x18] sm:$0xff]  ;;  %v361_v33 = vld [vmem:[%s939_s3 + $0x40] sm:$0xff] }
  0x1e   : > { %317 = vmatpush.msra.mxu0 %v284_v10  ;;  %373 = vmatpush.msra.mxu2 %v365_v21  ;;  %v293_v32 = vld [vmem:[%s937_s1 + $0x98] sm:$0xff]  ;;  %v276_v34 = vld [vmem:[%s937_s1 + $0x10] sm:$0xff]  ;;  %v273_v36 = vld [vmem:[%s272_s15] sm:$0x3]  ;;  %p568_p3 = pnand %p567_p2, %p563_p13 }
  0x1f   : > { %337 = vmatpush.msra.mxu1 %v300_v11  ;;  %v292_v35 = vld [vmem:[%s937_s1 + $0x90] sm:$0xff]  ;;  %v360_v37 = vld [vmem:[%s939_s3 + $0x38] sm:$0xff]  ;;  %v275_v38 = vld [vmem:[%s937_s1 + $0x8] sm:$0xff]  ;;  %v308_v42 = vperm.slane %v273_v36, 0  ;;  %v309_v44 = vperm.slane %v273_v36, 1 }
  0x20   : > { %318 = vmatpush.msra.mxu0 %v283_v12  ;;  %374 = vmatpush.msra.mxu2 %v364_v24  ;;  %v291_v39 = vld [vmem:[%s937_s1 + $0x88] sm:$0xff]  ;;  %v359_v40 = vld [vmem:[%s939_s3 + $0x30] sm:$0xff]  ;;  %v274_v41 = vld [vmem:[%s937_s1] sm:$0xff] }
  0x21   : > { %338 = vmatpush.msra.mxu1 %v299_v13  ;;  %v290_v43 = vld [vmem:[%s937_s1 + $0x80] sm:$0xff]  ;;  %v358_v45 = vld [vmem:[%s939_s3 + $0x28] sm:$0xff]  ;;  %v356_v47 = vld [vmem:[%s939_s3 + $0x18] sm:$0xff] }
  0x22   : > { %319 = vmatpush.msra.mxu0 %v282_v16  ;;  %375 = vmatpush.msra.mxu2 %v363_v27  ;;  %v357_v46 = vld [vmem:[%s939_s3 + $0x20] sm:$0xff]  ;;  %v355_v48 = vld [vmem:[%s939_s3 + $0x10] sm:$0xff]  ;;  %v354_v49 = vld [vmem:[%s939_s3 + $0x8] sm:$0xff] }
  0x23   : > { %339 = vmatpush.msra.mxu1 %v298_v17  ;;  %v353_v50 = vld [vmem:[%s939_s3] sm:$0xff]  ;;  %v406_v51 = vld [vmem:[%s941_s5 + $0x78] sm:$0xff]  ;;  %v405_v52 = vld [vmem:[%s941_s5 + $0x70] sm:$0xff] }
  0x24   : > { %320 = vmatpush.msra.mxu0 %v281_v19  ;;  %376 = vmatpush.msra.mxu2 %v362_v30  ;;  %v404_v53 = vld [vmem:[%s941_s5 + $0x68] sm:$0xff]  ;;  %v403_v54 = vld [vmem:[%s941_s5 + $0x60] sm:$0xff]  ;;  %v402_v55 = vld [vmem:[%s941_s5 + $0x58] sm:$0xff] }
  0x25   : > { %340 = vmatpush.msra.mxu1 %v297_v20  ;;  %408 = vmatpush.msra.mxu3 %v406_v51  ;;  %v401_v56 = vld [vmem:[%s941_s5 + $0x50] sm:$0xff]  ;;  %v400_v57 = vld [vmem:[%s941_s5 + $0x48] sm:$0xff]  ;;  %v399_v58 = vld [vmem:[%s941_s5 + $0x40] sm:$0xff] }
  0x26   : > { %321 = vmatpush.msra.mxu0 %v280_v22  ;;  %377 = vmatpush.msra.mxu2 %v361_v33  ;;  %v398_v59 = vld [vmem:[%s941_s5 + $0x38] sm:$0xff]  ;;  %v397_v60 = vld [vmem:[%s941_s5 + $0x30] sm:$0xff]  ;;  %v396_v61 = vld [vmem:[%s941_s5 + $0x28] sm:$0xff] }
  0x27   : > { %341 = vmatpush.msra.mxu1 %v296_v23  ;;  %409 = vmatpush.msra.mxu3 %v405_v52  ;;  %v395_v62 = vld [vmem:[%s941_s5 + $0x20] sm:$0xff]  ;;  %v394_v63 = vld [vmem:[%s941_s5 + $0x18] sm:$0xff]  ;;  %v393_v6 = vld [vmem:[%s941_s5 + $0x10] sm:$0xff] }
  0x28   : > { %322 = vmatpush.msra.mxu0 %v279_v25  ;;  %378 = vmatpush.msra.mxu2 %v360_v37  ;;  %v306_v0 = vld [vmem:[%s938_s2] sm:$0x1]  ;;  %v392_v7 = vld [vmem:[%s941_s5 + $0x8] sm:$0xff] }
  0x29   : > { %342 = vmatpush.msra.mxu1 %v295_v26  ;;  %410 = vmatpush.msra.mxu3 %v404_v53  ;;  %v391_v8 = vld [vmem:[%s941_s5] sm:$0xff] }
  0x2a   : > { %323 = vmatpush.msra.mxu0 %v278_v28  ;;  %379 = vmatpush.msra.mxu2 %v359_v40  ;;  %v369_v9 = vld [vmem:[%s940_s4] sm:$0x1] }
  0x2b   : > { %343 = vmatpush.msra.mxu1 %v294_v29  ;;  %411 = vmatpush.msra.mxu3 %v403_v54  ;;  %v407_v13 = vld [vmem:[%s942_s6] sm:$0x1] }
  0x2c   : > { %324 = vmatpush.msra.mxu0 %v277_v31  ;;  %380 = vmatpush.msra.mxu2 %v358_v45 }
  0x2d   : > { %344 = vmatpush.msra.mxu1 %v293_v32  ;;  %412 = vmatpush.msra.mxu3 %v402_v55 }
  0x2e   : > { %325 = vmatpush.msra.mxu0 %v276_v34  ;;  %381 = vmatpush.msra.mxu2 %v357_v46 }
  0x2f   : > { %345 = vmatpush.msra.mxu1 %v292_v35  ;;  %413 = vmatpush.msra.mxu3 %v401_v56 }
  0x30   : > { %326 = vmatpush.msra.mxu0 %v275_v38  ;;  %382 = vmatpush.msra.mxu2 %v356_v47 }
  0x31   : > { %346 = vmatpush.msra.mxu1 %v291_v39  ;;  %414 = vmatpush.msra.mxu3 %v400_v57 }
  0x32   : > { %327 = vmatpush.msra.mxu0 %v274_v41  ;;  %383 = vmatpush.msra.mxu2 %v355_v48 }
  0x33   : > { %347 = vmatpush.msra.mxu1 %v290_v43  ;;  %328 = vmatmul.f32.vlgmr.msra.gmra.mxu0 %v308_v42 }
  0x34   : > { %348 = vmatmul.f32.vlgmr.msra.gmra.mxu1 %v309_v44  ;;  %384 = vmatpush.msra.mxu2 %v354_v49 }
  0x35   : > { %415 = vmatpush.msra.mxu3 %v399_v58 }
  0x36   : > { %385 = vmatpush.msra.mxu2 %v353_v50 }
  0x37   : > { %416 = vmatpush.msra.mxu3 %v398_v59 }
  0x39   : > { %417 = vmatpush.msra.mxu3 %v397_v60 }
  0x3b   : > { %418 = vmatpush.msra.mxu3 %v396_v61 }
  0x3d   : > { %419 = vmatpush.msra.mxu3 %v395_v62 }
  0x3f   : > { %420 = vmatpush.msra.mxu3 %v394_v63 }
  0x41   : > { %421 = vmatpush.msra.mxu3 %v393_v6 }
  0x43   : > { %422 = vmatpush.msra.mxu3 %v392_v7 }
  0x45   : > { %423 = vmatpush.msra.mxu3 %v391_v8 }
  0xb0   : > { %v329_v1 = vpop.f32.mrf.mxu0 }
  0xb1   : > { %v349_v2 = vpop.f32.mrf.mxu1  ;;  %v330_v3 = vadd.f32 %v329_v1, %v306_v0 }
  0xb3   : > { %v350_v4 = vadd.f32 %v349_v2, %v330_v3 }
  0xb5   : > { %v352_v5 = vmax.f32 %v350_v4, 0.0 }
  0xb7   : > { %386 = vmatmul.f32.vlgmr.msra.gmra.mxu2 %v352_v5 }
 0x13a   : > { %v387_v10 = vpop.f32.mrf.mxu2 }
 0x13b   : > { %v388_v11 = vadd.f32 %v387_v10, %v369_v9 }
 0x13d   : > { %v390_v12 = vmax.f32 %v388_v11, 0.0 }
 0x13f   : > { %424 = vmatmul.f32.vlgmr.msra.gmra.mxu3 %v390_v12 }
 0x1c2   : > { %v425_v14 = vpop.f32.mrf.mxu3 }
 0x1c3   : > { %v426_v15 = vadd.f32 %v425_v14, %v407_v13 }
 0x1c5   : > { %429 = vst.msk [vmem:[%s268_s18] sm:$0x1] %vm428_vm0, %v426_v15 }
 0x1c6   : > { %571 = shalt.err (!%p568_p3)
}
 0x1c7   : > { %505 = dma.vmem_to_hbm [thread:$0]  (%p686_p5), %s442_s19, 16, %s444_s20, %s431_s21  }
 0x1c8 PF: > { %p511_p4 = scmp.ge.s32.totalorder %s606_s27, 2  ;;  %s455_s29 = sand.u32 1, %s594_s24  }
 0x1c9   : > { %s456_s16 = scalar_lea.sflag [#allocation3], %s455_s29 }
 0x1ca   : > { %p508_p7 = pnand %p511_p4, %p690_p6 }
 0x1cc   : > { %p509_p8 = pneg %p508_p7 }
 0x1ce   : > { %589 = dma.done.wait (%p509_p8), %s456_s16, 16  }
 0x1cf   : > { %591 = vsyncadd (%p509_p8), %s456_s16, 4294967280  ;;  %p17_p9 = scmp.ge.s32.totalorder %s673_s30, 4   ;;  %s946_s24 = smov %s598_s25 }
 0x1d0   : > { %s947_s25 = smov %s602_s26  ;;  %s948_s26 = smov %s684_s10 }
 0x1d1   : > { %s949_s27 = smov %s673_s30  ;;  %19 = sbr.rel (!%p17_p9) target bundleno = 3 (0x3), region = 83 }
 0x1d6   :  { %461 = vsyncpa [#allocation3], 1 }
 0x1d7   :  { %463 = vsyncpa [#allocation3 + $0x1], 1 }

// kernel: vgg_forward.2
= control target key start
LH: loop header
LB: loop body
LE: loop exit
PB: predicated region body
PF: predicated region fallthrough
CT: control target
= control target key end

     0   :  { %s4428_s18 = smov 0   ;;  %s6059_s0 = inlined_call_operand.vmem [shape: f32[2,16,16,3], index: 0, kind: input, shape index: {}]   ;;  %s6060_s1 = inlined_call_operand.vmem [shape: f32[3,3,3,8], index: 1, kind: input, shape index: {}]   ;;  %s6061_s2 = inlined_call_operand.vmem [shape: f32[1,8], index: 2, kind: input, shape index: {}]   ;;  %s6062_s3 = inlined_call_operand.vmem [shape: f32[3,3,8,16], index: 3, kind: input, shape index: {}]   ;;  %s6063_s4 = inlined_call_operand.vmem [shape: f32[1,16], index: 4, kind: input, shape index: {}]   ;;  %s6064_s5 = inlined_call_operand.vmem [shape: f32[2,16,16], index: 5, kind: output, shape index: {}]  }
   0x1 LB: > { %s3939_s19 = sadd.s32 4294967295, %s4394_s18   ;;  %p3943_p0 = scmp.ge.s32.totalorder %s4394_s18, 1  ;;  %s4394_s18 = sphi %s4428_s18, %s15_s18  }
   0x2   : > { %p187_p1 = scmp.lt.s32.totalorder %s4394_s18, 3 }
   0x4   : > { %p188_p2 = pnand %p3943_p0, %p187_p1 }
   0x6   : > { %191 = sbr.rel (%p188_p2) target bundleno = 1606 (0x646), region = 40 }
   0xb   : > { %v3948_v0 = vld [vmem:[%s6060_s1 + $0x4] sm:$0x7]  ;;  %vm509_vm0 = vcmask 1042432   ;;  %v378_v1 = vld [vmem:[%s6060_s1] sm:$0x7]  ;;  %vm225_vm1 = vcmask 23552  }
   0xc   : > { %3949 = vmatpush.msk.msra.mxu0 %vm509_vm0, %v3948_v0  ;;  %3982 = vmatpush.msk.msra.mxu1 %vm509_vm0, %v378_v1  ;;  %v4447_v2 = vld [vmem:[%s6060_s1 + $0x8] sm:$0x7]  ;;  %v6065_v3 = vmov 0.0   ;;  %p215_p3 = scmp.lt.s32.totalorder %s3939_s19, 1  ;;  %vm228_vm2 = vcmask 17408  }
   0xd   : > { %4016 = vmatpush.msk.msra.mxu2 %vm509_vm0, %v4447_v2  ;;  %226 = vst.msk [vmem:[#allocation2] sm:$0xff] %vm225_vm1, %v6065_v3  ;;  %4373 = vmatpush.msk.msra.mxu3 %vm509_vm0, %v3948_v0  ;;  %v4049_v20 = vld [vmem:[%s6060_s1 + $0xc] sm:$0x7] }
   0xe   : > { %227 = vst.msk [vmem:[#allocation2 + $0x8] sm:$0xff] %vm225_vm1, %v6065_v3  ;;  %s6294_s19 = smov (!%p215_p3, %s3939_s19), 1 }
   0xf   : > { %4374 = vmatpush.msk.msrb.mxu3 %vm509_vm0, %v378_v1  ;;  %230 = vst.msk [vmem:[#allocation2 + $0x18] sm:$0xff] %vm225_vm1, %v6065_v3  ;;  %s4371_s26 = sshll.u32 %s6294_s19, 8  ;;  %s4372_s16 = sshll.u32 %s6294_s19, 4 }
  0x10   : > { %231 = vst.msk [vmem:[#allocation2 + $0x20] sm:$0xff] %vm225_vm1, %v6065_v3  ;;  %s4531_s29 = scalar_lea.vmem %s6059_s0, %s4371_s26  ;;  %s224_s21 = scalar_lea.vmem %s6064_s5, %s4372_s16 }
  0x11   : > { %233 = vst.msk [vmem:[#allocation2 + $0x30] sm:$0xff] %vm225_vm1, %v6065_v3  ;;  %v310_v8 = vld [vmem:[%s4531_s29 + $0xe8] sm:$0xff]  ;;  %v309_v12 = vld [vmem:[%s4531_s29 + $0xe0] sm:$0xff]  ;;  %v283_v15 = vld [vmem:[%s4531_s29 + $0x10] sm:$0xff] }
  0x12   : > { %234 = vst.msk [vmem:[#allocation2 + $0x38] sm:$0xff] %vm225_vm1, %v6065_v3  ;;  %v281_v13 = vld [vmem:[%s4531_s29] sm:$0xff]  ;;  %v282_v14 = vld [vmem:[%s4531_s29 + $0x8] sm:$0xff]  ;;  %v284_v16 = vld [vmem:[%s4531_s29 + $0x18] sm:$0xff] }
  0x13   : > { %236 = vst.msk [vmem:[#allocation2 + $0x48] sm:$0xff] %vm225_vm1, %v6065_v3  ;;  %v285_v17 = vld [vmem:[%s4531_s29 + $0x20] sm:$0xff]  ;;  %v286_v18 = vld [vmem:[%s4531_s29 + $0x28] sm:$0xff]  ;;  %v287_v28 = vld [vmem:[%s4531_s29 + $0x30] sm:$0xff] }
  0x14   : > { %237 = vst.msk [vmem:[#allocation2 + $0x50] sm:$0xff] %vm225_vm1, %v6065_v3  ;;  %v346_v4 = vld [vmem:[#allocation2] sm:$0xff]  ;;  %v288_v29 = vld [vmem:[%s4531_s29 + $0x38] sm:$0xff]  ;;  %v290_v37 = vld [vmem:[%s4531_s29 + $0x48] sm:$0xff] }
  0x15   : > { %v379_v5 = vld [vmem:[#allocation2 + $0x1] sm:$0xff]  ;;  %239 = vst.msk [vmem:[#allocation2 + $0x60] sm:$0xff] %vm225_vm1, %v6065_v3  ;;  %3983 = vmatmul.msk.f32.vlgmr.msra.gmra.mxu1 %vm225_vm1, %v346_v4  ;;  %v291_v44 = vld [vmem:[%s4531_s29 + $0x50] sm:$0xff]  ;;  %v292_v45 = vld [vmem:[%s4531_s29 + $0x58] sm:$0xff] }
  0x16   : > { %v838_v6 = vld [vmem:[#allocation2 + $0x2] sm:$0xff]  ;;  %3950 = vmatmul.msk.f32.vlgmr.msra.gmra.mxu0 %vm225_vm1, %v379_v5  ;;  %240 = vst.msk [vmem:[#allocation2 + $0x68] sm:$0xff] %vm225_vm1, %v6065_v3  ;;  %v295_v60 = vld [vmem:[%s4531_s29 + $0x70] sm:$0xff]  ;;  %v296_v61 = vld [vmem:[%s4531_s29 + $0x78] sm:$0xff] }
  0x17   : > { %4017 = vmatmul.msk.f32.vlgmr.msra.gmra.mxu2 %vm225_vm1, %v838_v6  ;;  %242 = vst.msk [vmem:[#allocation2 + $0x78] sm:$0xff] %vm225_vm1, %v6065_v3  ;;  %v347_v7 = vld [vmem:[#allocation2 + $0x8] sm:$0xff]  ;;  %v289_v36 = vld [vmem:[%s4531_s29 + $0x40] sm:$0xff] }
  0x18   : > { %243 = vst.msk [vmem:[#allocation2 + $0x80] sm:$0xff] %vm225_vm1, %v6065_v3  ;;  %v293_v52 = vld [vmem:[%s4531_s29 + $0x60] sm:$0xff]  ;;  %v294_v53 = vld [vmem:[%s4531_s29 + $0x68] sm:$0xff] }
  0x19   : > { %245 = vst.msk [vmem:[#allocation2 + $0x90] sm:$0xff] %vm225_vm1, %v6065_v3  ;;  %v297_v5 = vld [vmem:[%s4531_s29 + $0x80] sm:$0xff]  ;;  %v298_v6 = vld [vmem:[%s4531_s29 + $0x88] sm:$0xff] }
  0x1a   : > { %246 = vst.msk [vmem:[#allocation2 + $0x98] sm:$0xff] %vm225_vm1, %v6065_v3 }
  0x1b   : > { %248 = vst.msk [vmem:[#allocation2 + $0xa8] sm:$0xff] %vm225_vm1, %v6065_v3 }
  0x1c   : > { %249 = vst.msk [vmem:[#allocation2 + $0xb0] sm:$0xff] %vm225_vm1, %v6065_v3 }
  0x1d   : > { %251 = vst.msk [vmem:[#allocation2 + $0xc0] sm:$0xff] %vm225_vm1, %v6065_v3  ;;  %3984 = vmatmul.msk.f32.gmra.mxu1 %vm225_vm1, %v347_v7 }
  0x1e   : > { %252 = vst.msk [vmem:[#allocation2 + $0xc8] sm:$0xff] %vm225_vm1, %v6065_v3 }
  0x1f   : > { %254 = vst.msk [vmem:[#allocation2 + $0xd8] sm:$0xff] %vm225_vm1, %v6065_v3 }
  0x20   : > { %255 = vst.msk [vmem:[#allocation2 + $0xe0] sm:$0xff] %vm225_vm1, %v6065_v3 }
  0x21   : > { %257 = vst.msk [vmem:[#allocation2 + $0xf0] sm:$0xff] %vm225_vm1, %v6065_v3 }
  0x22   : > { %258 = vst.msk [vmem:[#allocation2 + $0xf8] sm:$0xff] %vm225_vm1, %v6065_v3 }
  0x23   : > { %260 = vst.msk [vmem:[#allocation2 + $0x108] sm:$0xff] %vm225_vm1, %v6065_v3 }
  0x24   : > { %261 = vst.msk [vmem:[#allocation2 + $0x110] sm:$0xff] %vm225_vm1, %v6065_v3 }
  0x25   : > { %263 = vst.msk [vmem:[#allocation2 + $0x120] sm:$0xff] %vm225_vm1, %v6065_v3 }
  0x26   : > { %264 = vst.msk [vmem:[#allocation2 + $0x128] sm:$0xff] %vm225_vm1, %v6065_v3 }
  0x27   : > { %266 = vst.msk [vmem:[#allocation2 + $0x138] sm:$0xff] %vm225_vm1, %v6065_v3 }
  0x28   : > { %267 = vst.msk [vmem:[#allocation2 + $0x140] sm:$0xff] %vm225_vm1, %v6065_v3 }
  0x29   : > { %269 = vst.msk [vmem:[#allocation2 + $0x150] sm:$0xff] %vm225_vm1, %v6065_v3 }
  0x2a   : > { %270 = vst.msk [vmem:[#allocation2 + $0x158] sm:$0xff] %vm225_vm1, %v6065_v3 }
  0x2b   : > { %272 = vst.msk [vmem:[#allocation2 + $0x168] sm:$0xff] %vm225_vm1, %v6065_v3 }
  0x2c   : > { %273 = vst.msk [vmem:[#allocation2 + $0x170] sm:$0xff] %vm225_vm1, %v6065_v3 }
  0x2d   : > { %275 = vst.msk [vmem:[#allocation2 + $0x180] sm:$0xff] %vm225_vm1, %v6065_v3 }
  0x2e   : > { %276 = vst.msk [vmem:[#allocation2 + $0x188] sm:$0xff] %vm225_vm1, %v6065_v3 }
  0x2f   : > { %278 = vst.msk [vmem:[#allocation2 + $0x198] sm:$0xff] %vm225_vm1, %v6065_v3 }
  0x30   : > { %279 = vst.msk [vmem:[#allocation2 + $0x1a0] sm:$0xff] %vm225_vm1, %v6065_v3 }
  0x31   : > { %274 = vst.msk [vmem:[#allocation2 + $0x178] sm:$0x3] %vm228_vm2, %v6065_v3 }
  0x32   : > { %343 = vst.msk [vmem:[#allocation2 + $0x171] sm:$0xff] %vm225_vm1, %v310_v8 }
  0x33   : > { %229 = vst.msk [vmem:[#allocation2 + $0x10] sm:$0x3] %vm228_vm2, %v6065_v3 }
  0x34   : > { %232 = vst.msk [vmem:[#allocation2 + $0x28] sm:$0x3] %vm228_vm2, %v6065_v3 }
  0x35   : > { %235 = vst.msk [vmem:[#allocation2 + $0x40] sm:$0x3] %vm228_vm2, %v6065_v3 }
  0x36   : > { %238 = vst.msk [vmem:[#allocation2 + $0x58] sm:$0x3] %vm228_vm2, %v6065_v3 }
  0x37   : > { %241 = vst.msk [vmem:[#allocation2 + $0x70] sm:$0x3] %vm228_vm2, %v6065_v3 }
  0x38   : > { %244 = vst.msk [vmem:[#allocation2 + $0x88] sm:$0x3] %vm228_vm2, %v6065_v3 }
  0x39   : > { %v410_v9 = vld [vmem:[#allocation2 + $0x171] sm:$0xff]  ;;  %247 = vst.msk [vmem:[#allocation2 + $0xa0] sm:$0x3] %vm228_vm2, %v6065_v3 }
  0x3a   : > { %3981 = vmatmul.msk.f32.vlgmr.msra.gmra.mxu3 %vm225_vm1, %v410_v9  ;;  %250 = vst.msk [vmem:[#allocation2 + $0xb8] sm:$0x3] %vm228_vm2, %v6065_v3  ;;  %v380_v10 = vld [vmem:[#allocation2 + $0x9] sm:$0xff]  ;;  %v869_v24 = vld [vmem:[#allocation2 + $0x172] sm:$0xff] }
  0x3b   : > { %v839_v11 = vld [vmem:[#allocation2 + $0xa] sm:$0xff]  ;;  %253 = vst.msk [vmem:[#allocation2 + $0xd0] sm:$0x3] %vm228_vm2, %v6065_v3  ;;  %3951 = vmatmul.msk.f32.gmra.mxu0 %vm225_vm1, %v380_v10  ;;  %4375 = vmatpush.msk.msra.mxu3 %vm509_vm0, %v4447_v2 }
  0x3c   : > { %4018 = vmatmul.msk.f32.gmra.mxu2 %vm225_vm1, %v839_v11  ;;  %256 = vst.msk [vmem:[#allocation2 + $0xe8] sm:$0x3] %vm228_vm2, %v6065_v3 }
  0x3d   : > { %259 = vst.msk [vmem:[#allocation2 + $0x100] sm:$0x3] %vm228_vm2, %v6065_v3 }
  0x3e   : > { %262 = vst.msk [vmem:[#allocation2 + $0x118] sm:$0x3] %vm228_vm2, %v6065_v3 }
  0x3f   : > { %265 = vst.msk [vmem:[#allocation2 + $0x130] sm:$0x3] %vm228_vm2, %v6065_v3 }
  0x40   : > { %268 = vst.msk [vmem:[#allocation2 + $0x148] sm:$0x3] %vm228_vm2, %v6065_v3 }
  0x41   : > { %271 = vst.msk [vmem:[#allocation2 + $0x160] sm:$0x3] %vm228_vm2, %v6065_v3 }
  0x42   : > { %277 = vst.msk [vmem:[#allocation2 + $0x190] sm:$0x3] %vm228_vm2, %v6065_v3 }
  0x43   : > { %280 = vst.msk [vmem:[#allocation2 + $0x1a8] sm:$0x3] %vm228_vm2, %v6065_v3 }
  0x44   : > { %342 = vst.msk [vmem:[#allocation2 + $0x169] sm:$0xff] %vm225_vm1, %v309_v12 }
  0x45   : > { %314 = vst.msk [vmem:[#allocation2 + $0x19] sm:$0xff] %vm225_vm1, %v281_v13  ;;  %v299_v13 = vld [vmem:[%s4531_s29 + $0x90] sm:$0xff] }
  0x46   : > { %315 = vst.msk [vmem:[#allocation2 + $0x21] sm:$0xff] %vm225_vm1, %v282_v14 }
  0x47   : > { %316 = vst.msk [vmem:[#allocation2 + $0x31] sm:$0xff] %vm225_vm1, %v283_v15 }
  0x48   : > { %317 = vst.msk [vmem:[#allocation2 + $0x39] sm:$0xff] %vm225_vm1, %v284_v16  ;;  %v300_v16 = vld [vmem:[%s4531_s29 + $0x98] sm:$0xff] }
  0x49   : > { %318 = vst.msk [vmem:[#allocation2 + $0x49] sm:$0xff] %vm225_vm1, %v285_v17 }
  0x4a   : > { %319 = vst.msk [vmem:[#allocation2 + $0x51] sm:$0xff] %vm225_vm1, %v286_v18 }
  0x4b   : > { %v4598_v19 = vld [vmem:[#allocation2 + $0x170] sm:$0xff]  ;;  %320 = vst.msk [vmem:[#allocation2 + $0x61] sm:$0xff] %vm225_vm1, %v287_v28 }
  0x4c   : > { %4014 = vmatmul.msk.f32.vlgmr.msrb.gmra.mxu3 %vm225_vm1, %v4598_v19  ;;  %v4605_v21 = vld [vmem:[#allocation2 + $0x19] sm:$0xff]  ;;  %321 = vst.msk [vmem:[#allocation2 + $0x69] sm:$0xff] %vm225_vm1, %v288_v29 }
  0x4d   : > { %v348_v22 = vld [vmem:[#allocation2 + $0x18] sm:$0xff]  ;;  %3952 = vmatmul.msk.f32.gmra.mxu0 %vm225_vm1, %v4605_v21  ;;  %4050 = vmatpush.msk.msrb.mxu3 %vm509_vm0, %v4049_v20  ;;  %v4615_v25 = vld [vmem:[#allocation2 + $0x21] sm:$0xff]  ;;  %322 = vst.msk [vmem:[#allocation2 + $0x79] sm:$0xff] %vm225_vm1, %v289_v36 }
  0x4e   : > { %3985 = vmatmul.msk.f32.gmra.mxu1 %vm225_vm1, %v348_v22  ;;  %v4610_v23 = vld [vmem:[#allocation2 + $0x1a] sm:$0xff]  ;;  %v4617_v27 = vld [vmem:[#allocation2 + $0x22] sm:$0xff]  ;;  %v4629_v30 = vld [vmem:[#allocation2 + $0x31] sm:$0xff]  ;;  %323 = vst.msk [vmem:[#allocation2 + $0x81] sm:$0xff] %vm225_vm1, %v290_v37 }
  0x4f   : > { %4019 = vmatmul.msk.f32.gmra.mxu2 %vm225_vm1, %v4610_v23  ;;  %v349_v26 = vld [vmem:[#allocation2 + $0x20] sm:$0xff]  ;;  %v4631_v31 = vld [vmem:[#allocation2 + $0x30] sm:$0xff]  ;;  %v4644_v34 = vld [vmem:[#allocation2 + $0x38] sm:$0xff]  ;;  %324 = vst.msk [vmem:[#allocation2 + $0x91] sm:$0xff] %vm225_vm1, %v291_v44 }
  0x50   : > { %v4633_v32 = vld [vmem:[#allocation2 + $0x32] sm:$0xff]  ;;  %v4646_v35 = vld [vmem:[#allocation2 + $0x3a] sm:$0xff]  ;;  %v4659_v38 = vld [vmem:[#allocation2 + $0x49] sm:$0xff]  ;;  %325 = vst.msk [vmem:[#allocation2 + $0x99] sm:$0xff] %vm225_vm1, %v292_v45 }
  0x51   : > { %v4642_v33 = vld [vmem:[#allocation2 + $0x39] sm:$0xff]  ;;  %v4661_v39 = vld [vmem:[#allocation2 + $0x48] sm:$0xff]  ;;  %v4673_v41 = vld [vmem:[#allocation2 + $0x51] sm:$0xff]  ;;  %326 = vst.msk [vmem:[#allocation2 + $0xa9] sm:$0xff] %vm225_vm1, %v293_v52 }
  0x52   : > { %v4663_v40 = vld [vmem:[#allocation2 + $0x4a] sm:$0xff]  ;;  %v4677_v43 = vld [vmem:[#allocation2 + $0x52] sm:$0xff]  ;;  %v4691_v46 = vld [vmem:[#allocation2 + $0x61] sm:$0xff]  ;;  %327 = vst.msk [vmem:[#allocation2 + $0xb1] sm:$0xff] %vm225_vm1, %v294_v53 }
  0x53   : > { %v4675_v42 = vld [vmem:[#allocation2 + $0x50] sm:$0xff]  ;;  %v4693_v47 = vld [vmem:[#allocation2 + $0x60] sm:$0xff]  ;;  %v4707_v50 = vld [vmem:[#allocation2 + $0x68] sm:$0xff]  ;;  %328 = vst.msk [vmem:[#allocation2 + $0xc1] sm:$0xff] %vm225_vm1, %v295_v60 }
  0x54   : > { %4048 = vmatmul.msk.f32.vlgmr.msra.gmra.mxu3 %vm225_vm1, %v869_v24  ;;  %v4695_v48 = vld [vmem:[#allocation2 + $0x62] sm:$0xff]  ;;  %v4709_v51 = vld [vmem:[#allocation2 + $0x6a] sm:$0xff]  ;;  %v4723_v54 = vld [vmem:[#allocation2 + $0x79] sm:$0xff]  ;;  %329 = vst.msk [vmem:[#allocation2 + $0xc9] sm:$0xff] %vm225_vm1, %v296_v61 }
  0x55   : > { %3953 = vmatmul.msk.f32.gmra.mxu0 %vm225_vm1, %v4615_v25  ;;  %v4705_v49 = vld [vmem:[#allocation2 + $0x69] sm:$0xff]  ;;  %v4725_v55 = vld [vmem:[#allocation2 + $0x78] sm:$0xff]  ;;  %v4737_v57 = vld [vmem:[#allocation2 + $0x81] sm:$0xff]  ;;  %330 = vst.msk [vmem:[#allocation2 + $0xd9] sm:$0xff] %vm225_vm1, %v297_v5 }
  0x56   : > { %3986 = vmatmul.msk.f32.gmra.mxu1 %vm225_vm1, %v349_v26  ;;  %v4727_v56 = vld [vmem:[#allocation2 + $0x7a] sm:$0xff]  ;;  %v4741_v59 = vld [vmem:[#allocation2 + $0x82] sm:$0xff]  ;;  %v4755_v62 = vld [vmem:[#allocation2 + $0x91] sm:$0xff]  ;;  %331 = vst.msk [vmem:[#allocation2 + $0xe1] sm:$0xff] %vm225_vm1, %v298_v6 }
  0x57   : > { %4020 = vmatmul.msk.f32.gmra.mxu2 %vm225_vm1, %v4617_v27  ;;  %v4739_v58 = vld [vmem:[#allocation2 + $0x80] sm:$0xff]  ;;  %v4757_v63 = vld [vmem:[#allocation2 + $0x90] sm:$0xff]  ;;  %v4771_v2 = vld [vmem:[#allocation2 + $0x98] sm:$0xff]  ;;  %332 = vst.msk [vmem:[#allocation2 + $0xf1] sm:$0xff] %vm225_vm1, %v299_v13 }
  0x58   : > { %v4759_v0 = vld [vmem:[#allocation2 + $0x92] sm:$0xff]  ;;  %v4773_v4 = vld [vmem:[#allocation2 + $0x9a] sm:$0xff]  ;;  %v4787_v7 = vld [vmem:[#allocation2 + $0xa9] sm:$0xff]  ;;  %333 = vst.msk [vmem:[#allocation2 + $0xf9] sm:$0xff] %vm225_vm1, %v300_v16 }
  0x59   : > { %v4769_v1 = vld [vmem:[#allocation2 + $0x99] sm:$0xff]  ;;  %6124 = vst [vmem:[#allocation4_spill] sm:$0xff] %v4787_v7  ;;  %v4789_v8 = vld [vmem:[#allocation2 + $0xa8] sm:$0xff]  ;;  %v4801_v10 = vld [vmem:[#allocation2 + $0xb1] sm:$0xff] }
  0x5a   : > { %v4791_v9 = vld [vmem:[#allocation2 + $0xaa] sm:$0xff]  ;;  %6126 = vst [vmem:[#allocation6_spill] sm:$0xff] %v4801_v10  ;;  %v4805_v12 = vld [vmem:[#allocation2 + $0xb2] sm:$0xff]  ;;  %v4823_v17 = vld [vmem:[#allocation2 + $0xc1] sm:$0xff] }
  0x5b   : > { %6125 = vst [vmem:[#allocation5_spill] sm:$0xff] %v4791_v9  ;;  %v4803_v11 = vld [vmem:[#allocation2 + $0xb0] sm:$0xff]  ;;  %v4825_v18 = vld [vmem:[#allocation2 + $0xc0] sm:$0xff]  ;;  %v4845_v29 = vld [vmem:[#allocation2 + $0xc8] sm:$0xff] }
  0x5c   : > { %4051 = vmatmul.msk.f32.vlgmr.msrb.gmra.mxu3 %vm225_vm1, %v348_v22  ;;  %6127 = vst [vmem:[#allocation7_spill] sm:$0xff] %v4805_v12  ;;  %v4827_v20 = vld [vmem:[#allocation2 + $0xc2] sm:$0xff]  ;;  %v4847_v36 = vld [vmem:[#allocation2 + $0xca] sm:$0xff]  ;;  %v4863_v61 = vld [vmem:[#allocation2 + $0xd9] sm:$0xff] }
  0x5d   : > { %3954 = vmatmul.msk.f32.gmra.mxu0 %vm225_vm1, %v4629_v30  ;;  %6130 = vst [vmem:[#allocation10_spill] sm:$0xff] %v4823_v17  ;;  %v4843_v28 = vld [vmem:[#allocation2 + $0xc9] sm:$0xff]  ;;  %v301_v44 = vld [vmem:[%s4531_s29 + $0xa0] sm:$0xff]  ;;  %v4865_v5 = vld [vmem:[#allocation2 + $0xd8] sm:$0xff] }
  0x5e   : > { %3987 = vmatmul.msk.f32.gmra.mxu1 %vm225_vm1, %v4631_v31  ;;  %6131 = vst [vmem:[#allocation11_spill] sm:$0xff] %v4825_v18  ;;  %v302_v45 = vld [vmem:[%s4531_s29 + $0xa8] sm:$0xff]  ;;  %v4867_v6 = vld [vmem:[#allocation2 + $0xda] sm:$0xff] }
  0x5f   : > { %4021 = vmatmul.msk.f32.gmra.mxu2 %vm225_vm1, %v4633_v32  ;;  %6132 = vst [vmem:[#allocation12_spill] sm:$0xff] %v4827_v20 }
  0x60   : > { %6136 = vst [vmem:[#allocation16_spill] sm:$0xff] %v4843_v28 }
  0x61   : > { %6137 = vst [vmem:[#allocation17_spill] sm:$0xff] %v4845_v29 }
  0x62   : > { %6138 = vst [vmem:[#allocation18_spill] sm:$0xff] %v4847_v36 }
  0x63   : > { %334 = vst.msk [vmem:[#allocation2 + $0x109] sm:$0xff] %vm225_vm1, %v301_v44 }
  0x64   : > { %4052 = vmatmul.msk.f32.gmra.mxu3 %vm225_vm1, %v349_v26  ;;  %335 = vst.msk [vmem:[#allocation2 + $0x111] sm:$0xff] %vm225_vm1, %v302_v45 }
  0x65   : > { %3955 = vmatmul.msk.f32.gmra.mxu0 %vm225_vm1, %v4642_v33  ;;  %6140 = vst [vmem:[#allocation20_spill] sm:$0xff] %v4863_v61 }
  0x66   : > { %3988 = vmatmul.msk.f32.gmra.mxu1 %vm225_vm1, %v4644_v34  ;;  %6141 = vst [vmem:[#allocation21_spill] sm:$0xff] %v4865_v5 }
  0x67   : > { %4022 = vmatmul.msk.f32.gmra.mxu2 %vm225_vm1, %v4646_v35  ;;  %6142 = vst [vmem:[#allocation22_spill] sm:$0xff] %v4867_v6 }
  0x6c   : > { %4053 = vmatmul.msk.f32.gmra.mxu3 %vm225_vm1, %v4631_v31 }
  0x6d   : > { %3956 = vmatmul.msk.f32.gmra.mxu0 %vm225_vm1, %v4659_v38 }
  0x6e   : > { %3989 = vmatmul.msk.f32.gmra.mxu1 %vm225_vm1, %v4661_v39 }
  0x6f   : > { %4023 = vmatmul.msk.f32.gmra.mxu2 %vm225_vm1, %v4663_v40 }
  0x74   : > { %4054 = vmatmul.msk.f32.gmra.mxu3 %vm225_vm1, %v4644_v34 }
  0x75   : > { %3957 = vmatmul.msk.f32.gmra.mxu0 %vm225_vm1, %v4673_v41 }
  0x76   : > { %3990 = vmatmul.msk.f32.gmra.mxu1 %vm225_vm1, %v4675_v42 }
  0x77   : > { %4024 = vmatmul.msk.f32.gmra.mxu2 %vm225_vm1, %v4677_v43 }
  0x7c   : > { %4055 = vmatmul.msk.f32.gmra.mxu3 %vm225_vm1, %v4661_v39 }
  0x7d   : > { %3958 = vmatmul.msk.f32.gmra.mxu0 %vm225_vm1, %v4691_v46 }
  0x7e   : > { %3991 = vmatmul.msk.f32.gmra.mxu1 %vm225_vm1, %v4693_v47 }
  0x7f   : > { %4025 = vmatmul.msk.f32.gmra.mxu2 %vm225_vm1, %v4695_v48 }
  0x84   : > { %4056 = vmatmul.msk.f32.gmra.mxu3 %vm225_vm1, %v4675_v42 }
  0x85   : > { %3959 = vmatmul.msk.f32.gmra.mxu0 %vm225_vm1, %v4705_v49 }
  0x86   : > { %3992 = vmatmul.msk.f32.gmra.mxu1 %vm225_vm1, %v4707_v50 }
  0x87   : > { %4026 = vmatmul.msk.f32.gmra.mxu2 %vm225_vm1, %v4709_v51 }
  0x8c   : > { %4057 = vmatmul.msk.f32.gmra.mxu3 %vm225_vm1, %v4693_v47 }
  0x8d   : > { %3960 = vmatmul.msk.f32.gmra.mxu0 %vm225_vm1, %v4723_v54 }
  0x8e   : > { %3993 = vmatmul.msk.f32.gmra.mxu1 %vm225_vm1, %v4725_v55 }
  0x8f   : > { %4027 = vmatmul.msk.f32.gmra.mxu2 %vm225_vm1, %v4727_v56 }
  0x92   : > { %v4818_v15 = vpop.f32.mrf.mxu1 }
  0x93   : > { %v4816_v14 = vpop.f32.mrf.mxu0  ;;  %6129 = vst [vmem:[#allocation9_spill] sm:$0xff] %v4818_v15  ;;  %v4901_v15 = vld [vmem:[#allocation2 + $0xf0] sm:$0xff] }
  0x94   : > { %4058 = vmatmul.msk.f32.gmra.mxu3 %vm225_vm1, %v4707_v50  ;;  %6128 = vst [vmem:[#allocation8_spill] sm:$0xff] %v4816_v14  ;;  %v4903_v14 = vld [vmem:[#allocation2 + $0xf2] sm:$0xff] }
  0x95   : > { %3961 = vmatmul.msk.f32.gmra.mxu0 %vm225_vm1, %v4737_v57  ;;  %6148 = vst [vmem:[#allocation28_spill] sm:$0xff] %v4901_v15 }
  0x96   : > { %3994 = vmatmul.msk.f32.gmra.mxu1 %vm225_vm1, %v4739_v58  ;;  %6149 = vst [vmem:[#allocation29_spill] sm:$0xff] %v4903_v14 }
  0x97   : > { %4028 = vmatmul.msk.f32.gmra.mxu2 %vm225_vm1, %v4741_v59 }
  0x9a   : > { %v4835_v22 = vpop.f32.mrf.mxu2  ;;  %v4841_v26 = vpop.f32.mrf.mxu1 }
  0x9b   : > { %6133 = vst [vmem:[#allocation13_spill] sm:$0xff] %v4835_v22 }
  0x9c   : > { %4059 = vmatmul.msk.f32.gmra.mxu3 %vm225_vm1, %v4725_v55  ;;  %6135 = vst [vmem:[#allocation15_spill] sm:$0xff] %v4841_v26  ;;  %v4879_v26 = vld [vmem:[#allocation2 + $0xe0] sm:$0xff] }
  0x9d   : > { %3962 = vmatmul.msk.f32.gmra.mxu0 %vm225_vm1, %v4755_v62  ;;  %6144 = vst [vmem:[#allocation24_spill] sm:$0xff] %v4879_v26 }
  0x9e   : > { %3995 = vmatmul.msk.f32.gmra.mxu1 %vm225_vm1, %v4757_v63 }
  0x9f   : > { %4029 = vmatmul.msk.f32.gmra.mxu2 %vm225_vm1, %v4759_v0 }
  0xa4   : > { %4060 = vmatmul.msk.f32.gmra.mxu3 %vm225_vm1, %v4739_v58 }
  0xa5   : > { %3963 = vmatmul.msk.f32.gmra.mxu0 %vm225_vm1, %v4769_v1 }
  0xa6   : > { %3996 = vmatmul.msk.f32.gmra.mxu1 %vm225_vm1, %v4771_v2 }
  0xa7   : > { %4030 = vmatmul.msk.f32.gmra.mxu2 %vm225_vm1, %v4773_v4 }
  0xac   : > { %4061 = vmatmul.msk.f32.gmra.mxu3 %vm225_vm1, %v4757_v63 }
  0xad   : > { %3964 = vmatmul.msk.f32.gmra.mxu0 %vm225_vm1, %v4787_v7 }
  0xae   : > { %3997 = vmatmul.msk.f32.gmra.mxu1 %vm225_vm1, %v4789_v8 }
  0xaf   : > { %4031 = vmatmul.msk.f32.gmra.mxu2 %vm225_vm1, %v4791_v9 }
  0xb4   : > { %4062 = vmatmul.msk.f32.gmra.mxu3 %vm225_vm1, %v4771_v2 }
  0xb5   : > { %3965 = vmatmul.msk.f32.gmra.mxu0 %vm225_vm1, %v4801_v10 }
  0xb6   : > { %3998 = vmatmul.msk.f32.gmra.mxu1 %vm225_vm1, %v4803_v11 }
  0xb7   : > { %4032 = vmatmul.msk.f32.gmra.mxu2 %vm225_vm1, %v4805_v12  ;;  %v4947_v12 = vld [vmem:[#allocation2 + $0x10a] sm:$0xff] }
  0xb8   : > { %v4839_v24 = vpop.f32.mrf.mxu0  ;;  %6157 = vst [vmem:[#allocation37_spill] sm:$0xff] %v4947_v12 }
  0xb9   : > { %6134 = vst [vmem:[#allocation14_spill] sm:$0xff] %v4839_v24  ;;  %v4881_v24 = vld [vmem:[#allocation2 + $0xe2] sm:$0xff] }
  0xba   : > { %6145 = vst [vmem:[#allocation25_spill] sm:$0xff] %v4881_v24 }
  0xbc   : > { %4063 = vmatmul.msk.f32.gmra.mxu3 %vm225_vm1, %v4789_v8 }
  0xbd   : > { %3966 = vmatmul.msk.f32.gmra.mxu0 %vm225_vm1, %v4823_v17  ;;  %v623_v37 = vpop.f32.mrf.mxu3 }
  0xbe   : > { %3999 = vmatmul.msk.f32.gmra.mxu1 %vm225_vm1, %v4825_v18 }
  0xbf   : > { %4033 = vmatmul.msk.f32.gmra.mxu2 %vm225_vm1, %v4827_v20  ;;  %v4860_v52 = vpop.f32.mrf.mxu2 }
  0xc0   : > { %6139 = vst [vmem:[#allocation19_spill] sm:$0xff] %v4860_v52  ;;  %v4877_v52 = vld [vmem:[#allocation2 + $0xe1] sm:$0xff] }
  0xc1   : > { %6143 = vst [vmem:[#allocation23_spill] sm:$0xff] %v4877_v52 }
  0xc4   : > { %4064 = vmatmul.msk.f32.gmra.mxu3 %vm225_vm1, %v4803_v11 }
  0xc5   : > { %3967 = vmatmul.msk.f32.gmra.mxu0 %vm225_vm1, %v4843_v28 }
  0xc6   : > { %4000 = vmatmul.msk.f32.gmra.mxu1 %vm225_vm1, %v4845_v29 }
  0xc7   : > { %4034 = vmatmul.msk.f32.gmra.mxu2 %vm225_vm1, %v4847_v36 }
  0xca   : > { %v536_v53 = vpop.f32.mrf.mxu0 }
  0xcb   : > { %v748_v60 = vpop.f32.mrf.mxu1 }
  0xcc   : > { %4065 = vmatmul.msk.f32.gmra.mxu3 %vm225_vm1, %v4825_v18  ;;  %v749_v10 = vadd.f32 %v748_v60, %v536_v53  ;;  %v4967_v18 = vld [vmem:[#allocation2 + $0x112] sm:$0xff] }
  0xcd   : > { %3968 = vmatmul.msk.f32.gmra.mxu0 %vm225_vm1, %v4863_v61  ;;  %6161 = vst [vmem:[#allocation41_spill] sm:$0xff] %v4967_v18 }
  0xce   : > { %4001 = vmatmul.msk.f32.gmra.mxu1 %vm225_vm1, %v4865_v5 }
  0xcf   : > { %4035 = vmatmul.msk.f32.gmra.mxu2 %vm225_vm1, %v4867_v6  ;;  %v835_v13 = vpop.f32.mrf.mxu3  ;;  %v303_v6 = vld [vmem:[%s4531_s29 + $0xb0] sm:$0xff] }
  0xd0   : > { %v836_v16 = vadd.f32 %v835_v13, %v623_v37  ;;  %336 = vst.msk [vmem:[#allocation2 + $0x121] sm:$0xff] %vm225_vm1, %v303_v6  ;;  %v304_v37 = vld [vmem:[%s4531_s29 + $0xb8] sm:$0xff] }
  0xd1   : > { %337 = vst.msk [vmem:[#allocation2 + $0x129] sm:$0xff] %vm225_vm1, %v304_v37 }
  0xd2   : > { %v994_v44 = vpop.f32.mrf.mxu2  ;;  %v539_v45 = vpop.f32.mrf.mxu0 }
  0xd3   : > { %v751_v3 = vpop.f32.mrf.mxu1 }
  0xd4   : > { %4066 = vmatmul.msk.f32.gmra.mxu3 %vm225_vm1, %v4845_v29  ;;  %v4945_v29 = vld [vmem:[#allocation2 + $0x108] sm:$0xff]  ;;  %v752_v9 = vadd.f32 %v751_v3, %v539_v45 }
  0xd5   : > { %3969 = vmatmul.msk.f32.gmra.mxu0 %vm225_vm1, %v4877_v52  ;;  %v4899_v52 = vld [vmem:[#allocation2 + $0xf1] sm:$0xff]  ;;  %6156 = vst [vmem:[#allocation36_spill] sm:$0xff] %v4945_v29 }
  0xd6   : > { %4002 = vmatmul.msk.f32.gmra.mxu1 %vm225_vm1, %v4879_v26  ;;  %6147 = vst [vmem:[#allocation27_spill] sm:$0xff] %v4899_v52 }
  0xd7   : > { %4036 = vmatmul.msk.f32.gmra.mxu2 %vm225_vm1, %v4881_v24  ;;  %v1081_v13 = vpop.f32.mrf.mxu3  ;;  %v4921_v24 = vld [vmem:[#allocation2 + $0xf8] sm:$0xff] }
  0xd8   : > { %v4895_v61 = vadd.f32 %v1081_v13, %v836_v16  ;;  %6152 = vst [vmem:[#allocation32_spill] sm:$0xff] %v4921_v24 }
  0xda   : > { %6146 = vst [vmem:[#allocation26_spill] sm:$0xff] %v4895_v61  ;;  %v997_v22 = vpop.f32.mrf.mxu2  ;;  %v4897_v36 = vpop.f32.mrf.mxu0  ;;  %v4919_v61 = vld [vmem:[#allocation2 + $0xf9] sm:$0xff] }
  0xdb   : > { %v754_v28 = vpop.f32.mrf.mxu1  ;;  %6151 = vst [vmem:[#allocation31_spill] sm:$0xff] %v4919_v61 }
  0xdc   : > { %4067 = vmatmul.msk.f32.gmra.mxu3 %vm225_vm1, %v4865_v5  ;;  %v4923_v5 = vld [vmem:[#allocation2 + $0xfa] sm:$0xff] }
  0xdd   : > { %3970 = vmatmul.msk.f32.gmra.mxu0 %vm225_vm1, %v4899_v52  ;;  %6153 = vst [vmem:[#allocation33_spill] sm:$0xff] %v4923_v5  ;;  %v306_v52 = vld [vmem:[%s4531_s29 + $0xc8] sm:$0xff] }
  0xde   : > { %4003 = vmatmul.msk.f32.gmra.mxu1 %vm225_vm1, %v4901_v15  ;;  %339 = vst.msk [vmem:[#allocation2 + $0x141] sm:$0xff] %vm225_vm1, %v306_v52 }
  0xdf   : > { %4037 = vmatmul.msk.f32.gmra.mxu2 %vm225_vm1, %v4903_v14  ;;  %v4913_v6 = vpop.f32.mrf.mxu3  ;;  %v305_v14 = vld [vmem:[%s4531_s29 + $0xc0] sm:$0xff] }
  0xe0   : > { %6150 = vst [vmem:[#allocation30_spill] sm:$0xff] %v4913_v6 }
  0xe1   : > { %338 = vst.msk [vmem:[#allocation2 + $0x139] sm:$0xff] %vm225_vm1, %v305_v14  ;;  %v1086_v14 = vadd.f32 %v994_v44, %v749_v10  ;;  %v307_v10 = vld [vmem:[%s4531_s29 + $0xd0] sm:$0xff]  ;;  %v1087_v44 = vadd.f32 %v997_v22, %v752_v9  ;;  %v4991_v9 = vld [vmem:[#allocation2 + $0x122] sm:$0xff]  ;;  %v755_v22 = vadd.f32 %v754_v28, %v4897_v36 }
  0xe2   : > { %v1000_v16 = vpop.f32.mrf.mxu2  ;;  %v4915_v37 = vpop.f32.mrf.mxu0  ;;  %340 = vst.msk [vmem:[#allocation2 + $0x151] sm:$0xff] %vm225_vm1, %v307_v10  ;;  %v4083_v28 = vld [vmem:[%s6060_s1 + $0x10] sm:$0x7] }
  0xe3   : > { %v4917_v13 = vpop.f32.mrf.mxu1  ;;  %6165 = vst [vmem:[#allocation45_spill] sm:$0xff] %v4991_v9  ;;  %v1088_v10 = vadd.f32 %v1000_v16, %v755_v22  ;;  %4084 = vmatpush.msk.msrb.mxu0 %vm509_vm0, %v4083_v28  ;;  %v5014_v16 = vld [vmem:[#allocation2 + $0x128] sm:$0xff] }
  0xe4   : > { %4068 = vmatmul.msk.f32.gmra.mxu3 %vm225_vm1, %v4879_v26  ;;  %6168 = vst [vmem:[#allocation48_spill] sm:$0xff] %v5014_v16  ;;  %v5016_v22 = vld [vmem:[#allocation2 + $0x12a] sm:$0xff] }
  0xe5   : > { %3971 = vmatmul.msk.f32.gmra.mxu0 %vm225_vm1, %v4919_v61  ;;  %v4943_v61 = vld [vmem:[#allocation2 + $0x109] sm:$0xff]  ;;  %6169 = vst [vmem:[#allocation49_spill] sm:$0xff] %v5016_v22 }
  0xe6   : > { %4004 = vmatmul.msk.f32.gmra.mxu1 %vm225_vm1, %v4921_v24  ;;  %6155 = vst [vmem:[#allocation35_spill] sm:$0xff] %v4943_v61 }
  0xe7   : > { %4038 = vmatmul.msk.f32.gmra.mxu2 %vm225_vm1, %v4923_v5  ;;  %v4936_v6 = vpop.f32.mrf.mxu3 }
  0xe8   : > { %6154 = vst [vmem:[#allocation34_spill] sm:$0xff] %v4936_v6 }
  0xea   : > { %v1003_v20 = vpop.f32.mrf.mxu2  ;;  %v4939_v17 = vpop.f32.mrf.mxu0 }
  0xeb   : > { %v4941_v26 = vpop.f32.mrf.mxu1 }
  0xec   : > { %4069 = vmatmul.msk.f32.gmra.mxu3 %vm225_vm1, %v4901_v15  ;;  %v4963_v15 = vld [vmem:[#allocation2 + $0x111] sm:$0xff] }
  0xed   : > { %3972 = vmatmul.msk.f32.gmra.mxu0 %vm225_vm1, %v4943_v61  ;;  %6159 = vst [vmem:[#allocation39_spill] sm:$0xff] %v4963_v15  ;;  %v4965_v61 = vld [vmem:[#allocation2 + $0x110] sm:$0xff] }
  0xee   : > { %4005 = vmatmul.msk.f32.gmra.mxu1 %vm225_vm1, %v4945_v29  ;;  %6160 = vst [vmem:[#allocation40_spill] sm:$0xff] %v4965_v61 }
  0xef   : > { %4039 = vmatmul.msk.f32.gmra.mxu2 %vm225_vm1, %v4947_v12  ;;  %v1272_v52 = vpop.f32.mrf.mxu3 }
  0xf0   : > { %v4957_v5 = vadd.f32 %v1272_v52, %v1086_v14  ;;  %v308_v14 = vld [vmem:[%s4531_s29 + $0xd8] sm:$0xff] }
  0xf1   : > { %341 = vst.msk [vmem:[#allocation2 + $0x159] sm:$0xff] %vm225_vm1, %v308_v14 }
  0xf2   : > { %6158 = vst [vmem:[#allocation38_spill] sm:$0xff] %v4957_v5  ;;  %v1006_v6 = vpop.f32.mrf.mxu2  ;;  %v4959_v53 = vpop.f32.mrf.mxu0  ;;  %v4987_v5 = vld [vmem:[#allocation2 + $0x121] sm:$0xff] }
  0xf3   : > { %v4961_v60 = vpop.f32.mrf.mxu1  ;;  %6163 = vst [vmem:[#allocation43_spill] sm:$0xff] %v4987_v5 }
  0xf4   : > { %4070 = vmatmul.msk.f32.gmra.mxu3 %vm225_vm1, %v4921_v24  ;;  %v4989_v24 = vld [vmem:[#allocation2 + $0x120] sm:$0xff] }
  0xf5   : > { %3973 = vmatmul.msk.f32.gmra.mxu0 %vm225_vm1, %v4963_v15  ;;  %6164 = vst [vmem:[#allocation44_spill] sm:$0xff] %v4989_v24 }
  0xf6   : > { %4006 = vmatmul.msk.f32.gmra.mxu1 %vm225_vm1, %v4965_v61 }
  0xf7   : > { %4040 = vmatmul.msk.f32.gmra.mxu2 %vm225_vm1, %v4967_v18  ;;  %v1275_v52 = vpop.f32.mrf.mxu3  ;;  %v5012_v18 = vld [vmem:[#allocation2 + $0x129] sm:$0xff] }
  0xf8   : > { %v4981_v3 = vadd.f32 %v1275_v52, %v1087_v44  ;;  %6167 = vst [vmem:[#allocation47_spill] sm:$0xff] %v5012_v18 }
  0xfa   : > { %6162 = vst [vmem:[#allocation42_spill] sm:$0xff] %v4981_v3  ;;  %v1009_v45 = vpop.f32.mrf.mxu2  ;;  %v4983_v12 = vpop.f32.mrf.mxu0 }
  0xfb   : > { %v4985_v15 = vpop.f32.mrf.mxu1 }
  0xfc   : > { %4071 = vmatmul.msk.f32.gmra.mxu3 %vm225_vm1, %v4945_v29 }
  0xfd   : > { %3974 = vmatmul.msk.f32.gmra.mxu0 %vm225_vm1, %v4987_v5 }
  0xfe   : > { %4007 = vmatmul.msk.f32.gmra.mxu1 %vm225_vm1, %v4989_v24 }
  0xff   : > { %4041 = vmatmul.msk.f32.gmra.mxu2 %vm225_vm1, %v4991_v9  ;;  %v1278_v44 = vpop.f32.mrf.mxu3 }
 0x100   : > { %v5002_v14 = vadd.f32 %v1278_v44, %v1088_v10  ;;  %v758_v10 = vadd.f32 %v4917_v13, %v4915_v37  ;;  %v5034_v13 = vld [vmem:[#allocation2 + $0x139] sm:$0xff] }
 0x101   : > { %6171 = vst [vmem:[#allocation51_spill] sm:$0xff] %v5034_v13 }
 0x102   : > { %6166 = vst [vmem:[#allocation46_spill] sm:$0xff] %v5002_v14  ;;  %v1012_v36 = vpop.f32.mrf.mxu2  ;;  %v5008_v52 = vpop.f32.mrf.mxu0  ;;  %v1089_v44 = vadd.f32 %v1003_v20, %v758_v10  ;;  %v761_v20 = vadd.f32 %v4941_v26, %v4939_v17  ;;  %v5056_v26 = vld [vmem:[#allocation2 + $0x141] sm:$0xff] }
 0x103   : > { %v5010_v5 = vpop.f32.mrf.mxu1  ;;  %6175 = vst [vmem:[#allocation55_spill] sm:$0xff] %v5056_v26 }
 0x104   : > { %4072 = vmatmul.msk.f32.gmra.mxu3 %vm225_vm1, %v4965_v61  ;;  %v5036_v61 = vld [vmem:[#allocation2 + $0x138] sm:$0xff]  ;;  %v1090_v10 = vadd.f32 %v1006_v6, %v761_v20  ;;  %v764_v6 = vadd.f32 %v4961_v60, %v4959_v53  ;;  %v4117_v53 = vld [vmem:[%s6060_s1 + $0x14] sm:$0x7] }
 0x105   : > { %3975 = vmatmul.msk.f32.gmra.mxu0 %vm225_vm1, %v5012_v18  ;;  %6172 = vst [vmem:[#allocation52_spill] sm:$0xff] %v5036_v61  ;;  %v5038_v18 = vld [vmem:[#allocation2 + $0x13a] sm:$0xff]  ;;  %4118 = vmatpush.msk.msrb.mxu1 %vm509_vm0, %v4117_v53 }
 0x106   : > { %4008 = vmatmul.msk.f32.gmra.mxu1 %vm225_vm1, %v5014_v16  ;;  %6173 = vst [vmem:[#allocation53_spill] sm:$0xff] %v5038_v18  ;;  %v4151_v20 = vld [vmem:[%s6060_s1 + $0x18] sm:$0x7] }
 0x107   : > { %4042 = vmatmul.msk.f32.gmra.mxu2 %vm225_vm1, %v5016_v22  ;;  %v1281_v28 = vpop.f32.mrf.mxu3 }
 0x108   : > { %v5028_v9 = vadd.f32 %v1281_v28, %v1089_v44  ;;  %4152 = vmatpush.msk.msrb.mxu2 %vm509_vm0, %v4151_v20 }
 0x10a   : > { %6170 = vst [vmem:[#allocation50_spill] sm:$0xff] %v5028_v9  ;;  %v1015_v14 = vpop.f32.mrf.mxu2  ;;  %v5030_v3 = vpop.f32.mrf.mxu0 }
 0x10b   : > { %v5032_v37 = vpop.f32.mrf.mxu1 }
 0x10c   : > { %4073 = vmatmul.msk.f32.gmra.mxu3 %vm225_vm1, %v4989_v24  ;;  %v5058_v24 = vld [vmem:[#allocation2 + $0x140] sm:$0xff]  ;;  %v773_v7 = vadd.f32 %v5032_v37, %v5030_v3 }
 0x10d   : > { %3976 = vmatmul.msk.f32.gmra.mxu0 %vm225_vm1, %v5034_v13  ;;  %6176 = vst [vmem:[#allocation56_spill] sm:$0xff] %v5058_v24  ;;  %v5060_v13 = vld [vmem:[#allocation2 + $0x142] sm:$0xff] }
 0x10e   : > { %4009 = vmatmul.msk.f32.gmra.mxu1 %vm225_vm1, %v5036_v61  ;;  %6177 = vst [vmem:[#allocation57_spill] sm:$0xff] %v5060_v13 }
 0x10f   : > { %4043 = vmatmul.msk.f32.gmra.mxu2 %vm225_vm1, %v5038_v18  ;;  %v1284_v44 = vpop.f32.mrf.mxu3 }
 0x110   : > { %v5050_v28 = vadd.f32 %v1284_v44, %v1090_v10  ;;  %v1091_v10 = vadd.f32 %v1009_v45, %v764_v6  ;;  %v5084_v45 = vld [vmem:[#allocation2 + $0x150] sm:$0xff] }
 0x111   : > { %v5086_v6 = vld [vmem:[#allocation2 + $0x152] sm:$0xff] }
 0x112   : > { %6174 = vst [vmem:[#allocation54_spill] sm:$0xff] %v5050_v28  ;;  %v1018_v22 = vpop.f32.mrf.mxu2  ;;  %v5052_v9 = vpop.f32.mrf.mxu0 }
 0x113   : > { %v5054_v17 = vpop.f32.mrf.mxu1  ;;  %6180 = vst [vmem:[#allocation60_spill] sm:$0xff] %v5086_v6 }
 0x114   : > { %4074 = vmatmul.msk.f32.gmra.mxu3 %vm225_vm1, %v5014_v16  ;;  %v5082_v16 = vld [vmem:[#allocation2 + $0x151] sm:$0xff] }
 0x115   : > { %3977 = vmatmul.msk.f32.gmra.mxu0 %vm225_vm1, %v5056_v26  ;;  %6179 = vst [vmem:[#allocation59_spill] sm:$0xff] %v5082_v16 }
 0x116   : > { %4010 = vmatmul.msk.f32.gmra.mxu1 %vm225_vm1, %v5058_v24 }
 0x117   : > { %4044 = vmatmul.msk.f32.gmra.mxu2 %vm225_vm1, %v5060_v13  ;;  %v1287_v60 = vpop.f32.mrf.mxu3  ;;  %v767_v13 = vadd.f32 %v4985_v15, %v4983_v12  ;;  %v5100_v12 = vld [vmem:[#allocation2 + $0x159] sm:$0xff] }
 0x118   : > { %v5080_v44 = vadd.f32 %v1287_v60, %v1091_v10  ;;  %6182 = vst [vmem:[#allocation62_spill] sm:$0xff] %v5100_v12  ;;  %v5102_v15 = vld [vmem:[#allocation2 + $0x158] sm:$0xff] }
 0x119   : > { %v1092_v20 = vadd.f32 %v1012_v36, %v767_v13  ;;  %v770_v36 = vadd.f32 %v5010_v5, %v5008_v52 }
 0x11a   : > { %6178 = vst [vmem:[#allocation58_spill] sm:$0xff] %v5080_v44  ;;  %v1021_v18 = vpop.f32.mrf.mxu2  ;;  %v566_v26 = vpop.f32.mrf.mxu0 }
 0x11b   : > { %v778_v28 = vpop.f32.mrf.mxu1  ;;  %v1093_v13 = vadd.f32 %v1015_v14, %v770_v36  ;;  %v1094_v14 = vadd.f32 %v1018_v22, %v773_v7 }
 0x11c   : > { %4075 = vmatmul.msk.f32.gmra.mxu3 %vm225_vm1, %v5036_v61  ;;  %v5104_v61 = vld [vmem:[#allocation2 + $0x15a] sm:$0xff] }
 0x11d   : > { %3978 = vmatmul.msk.f32.gmra.mxu0 %vm225_vm1, %v5082_v16  ;;  %v311_v16 = vld [vmem:[%s4531_s29 + $0xf0] sm:$0xff] }
 0x11e   : > { %4011 = vmatmul.msk.f32.gmra.mxu1 %vm225_vm1, %v5084_v45  ;;  %344 = vst.msk [vmem:[#allocation2 + $0x181] sm:$0xff] %vm225_vm1, %v311_v16  ;;  %v5124_v16 = vld [vmem:[#allocation2 + $0x16a] sm:$0xff] }
 0x11f   : > { %4045 = vmatmul.msk.f32.gmra.mxu2 %vm225_vm1, %v5086_v6  ;;  %v1290_v10 = vpop.f32.mrf.mxu3  ;;  %v5120_v6 = vld [vmem:[#allocation2 + $0x169] sm:$0xff] }
 0x120   : > { %v5098_v53 = vadd.f32 %v1290_v10, %v1092_v20 }
 0x122   : > { %6181 = vst [vmem:[#allocation61_spill] sm:$0xff] %v5098_v53  ;;  %v1024_v60 = vpop.f32.mrf.mxu2  ;;  %v569_v44 = vpop.f32.mrf.mxu0 }
 0x123   : > { %v781_v29 = vpop.f32.mrf.mxu1 }
 0x124   : > { %4076 = vmatmul.msk.f32.gmra.mxu3 %vm225_vm1, %v5058_v24  ;;  %v5122_v24 = vld [vmem:[#allocation2 + $0x168] sm:$0xff] }
 0x125   : > { %3979 = vmatmul.msk.f32.gmra.mxu0 %vm225_vm1, %v5100_v12  ;;  %v312_v12 = vld [vmem:[%s4531_s29 + $0xf8] sm:$0xff] }
 0x126   : > { %4012 = vmatmul.msk.f32.gmra.mxu1 %vm225_vm1, %v5102_v15  ;;  %345 = vst.msk [vmem:[#allocation2 + $0x189] sm:$0xff] %vm225_vm1, %v312_v12 }
 0x127   : > { %4046 = vmatmul.msk.f32.gmra.mxu2 %vm225_vm1, %v5104_v61  ;;  %v1293_v20 = vpop.f32.mrf.mxu3 }
 0x128   : > { %v5118_v10 = vadd.f32 %v1293_v20, %v1093_v13 }
 0x12a   : > { %6183 = vst [vmem:[#allocation63_spill] sm:$0xff] %v5118_v10  ;;  %v1027_v53 = vpop.f32.mrf.mxu2  ;;  %v572_v5 = vpop.f32.mrf.mxu0  ;;  %v776_v10 = vadd.f32 %v5054_v17, %v5052_v9  ;;  %v4185_v9 = vld [vmem:[%s6060_s1 + $0x1c] sm:$0x7] }
 0x12b   : > { %v784_v52 = vpop.f32.mrf.mxu1  ;;  %4186 = vmatpush.msk.msra.mxu3 %vm509_vm0, %v4185_v9 }
 0x12c   : > { %4077 = vmatmul.msk.f32.gmra.mxu3 %vm225_vm1, %v5084_v45  ;;  %v1095_v7 = vadd.f32 %v1021_v18, %v776_v10 }
 0x12d   : > { %3980 = vmatmul.msk.f32.gmra.mxu0 %vm225_vm1, %v5120_v6  ;;  %v5188_v9 = vld [vmem:[#allocation2 + $0x188] sm:$0xff] }
 0x12e   : > { %4013 = vmatmul.msk.f32.gmra.mxu1 %vm225_vm1, %v5122_v24 }
 0x12f   : > { %4047 = vmatmul.msk.f32.gmra.mxu2 %vm225_vm1, %v5124_v16  ;;  %v1296_v36 = vpop.f32.mrf.mxu3 }
 0x130   : > { %v5138_v13 = vadd.f32 %v1296_v36, %v1094_v14 }
 0x132   : > { %6184 = vst [vmem:[#allocation64_spill] sm:$0xff] %v5138_v13  ;;  %v1030_v20 = vpop.f32.mrf.mxu2  ;;  %v575_v3 = vpop.f32.mrf.mxu0 }
 0x133   : > { %v787_v37 = vpop.f32.mrf.mxu1 }
 0x134   : > { %4078 = vmatmul.msk.f32.gmra.mxu3 %vm225_vm1, %v5102_v15 }
 0x135   : > { %4085 = vmatmul.msk.f32.vlgmr.msrb.gmra.mxu0 %vm225_vm1, %v4605_v21  ;;  %v779_v21 = vadd.f32 %v778_v28, %v566_v26  ;;  %v782_v28 = vadd.f32 %v781_v29, %v569_v44 }
 0x136   : > { %4119 = vmatmul.msk.f32.vlgmr.msrb.gmra.mxu1 %vm225_vm1, %v4610_v23 }
 0x137   : > { %4153 = vmatmul.msk.f32.vlgmr.msrb.gmra.mxu2 %vm225_vm1, %v4631_v31  ;;  %v1299_v22 = vpop.f32.mrf.mxu3  ;;  %v1096_v23 = vadd.f32 %v1024_v60, %v779_v21  ;;  %v5176_v60 = vld [vmem:[#allocation2 + $0x180] sm:$0xff]  ;;  %v788_v21 = vadd.f32 %v787_v37, %v575_v3 }
 0x138   : > { %v5150_v12 = vadd.f32 %v1299_v22, %v1095_v7  ;;  %v785_v22 = vadd.f32 %v784_v52, %v572_v5 }
 0x13a   : > { %v1033_v14 = vpop.f32.mrf.mxu2  ;;  %v578_v36 = vpop.f32.mrf.mxu0 }
 0x13b   : > { %v790_v13 = vpop.f32.mrf.mxu1 }
 0x13c   : > { %4079 = vmatmul.msk.f32.gmra.mxu3 %vm225_vm1, %v5122_v24  ;;  %v791_v3 = vadd.f32 %v790_v13, %v578_v36 }
 0x13d   : > { %4086 = vmatmul.msk.f32.gmra.mxu0 %vm225_vm1, %v4615_v25  ;;  %v1097_v25 = vadd.f32 %v1027_v53, %v782_v28 }
 0x13e   : > { %4120 = vmatmul.msk.f32.gmra.mxu1 %vm225_vm1, %v4617_v27 }
 0x13f   : > { %4154 = vmatmul.msk.f32.gmra.mxu2 %vm225_vm1, %v4644_v34  ;;  %v1302_v31 = vpop.f32.mrf.mxu3 }
 0x140   : > { %v5164_v18 = vadd.f32 %v1302_v31, %v1096_v23 }
 0x142   : > { %v1036_v17 = vpop.f32.mrf.mxu2  ;;  %v581_v10 = vpop.f32.mrf.mxu0 }
 0x143   : > { %v793_v7 = vpop.f32.mrf.mxu1 }
 0x144   : > { %4080 = vmatmul.msk.f32.gmra.mxu3 %vm225_vm1, %v4598_v19  ;;  %v1098_v19 = vadd.f32 %v1030_v20, %v785_v22  ;;  %v794_v13 = vadd.f32 %v793_v7, %v581_v10 }
 0x145   : > { %4087 = vmatmul.msk.f32.gmra.mxu0 %vm225_vm1, %v4629_v30 }
 0x146   : > { %4121 = vmatmul.msk.f32.gmra.mxu1 %vm225_vm1, %v4633_v32 }
 0x147   : > { %4155 = vmatmul.msk.f32.gmra.mxu2 %vm225_vm1, %v4661_v39  ;;  %v1305_v27 = vpop.f32.mrf.mxu3 }
 0x148   : > { %v5174_v34 = vadd.f32 %v1305_v27, %v1097_v25 }
 0x14a   : > { %v1039_v26 = vpop.f32.mrf.mxu2  ;;  %v584_v29 = vpop.f32.mrf.mxu0 }
 0x14b   : > { %v796_v44 = vpop.f32.mrf.mxu1 }
 0x14c   : > { %4081 = vmatmul.msk.f32.gmra.mxu3 %vm225_vm1, %v5176_v60  ;;  %v797_v10 = vadd.f32 %v796_v44, %v584_v29 }
 0x14d   : > { %4088 = vmatmul.msk.f32.gmra.mxu0 %vm225_vm1, %v4642_v33 }
 0x14e   : > { %4122 = vmatmul.msk.f32.gmra.mxu1 %vm225_vm1, %v4646_v35  ;;  %v1099_v35 = vadd.f32 %v1033_v14, %v788_v21 }
 0x14f   : > { %4156 = vmatmul.msk.f32.gmra.mxu2 %vm225_vm1, %v4675_v42  ;;  %v1308_v32 = vpop.f32.mrf.mxu3 }
 0x150   : > { %v5186_v39 = vadd.f32 %v1308_v32, %v1098_v19 }
 0x152   : > { %v1042_v53 = vpop.f32.mrf.mxu2  ;;  %v587_v5 = vpop.f32.mrf.mxu0 }
 0x153   : > { %v799_v52 = vpop.f32.mrf.mxu1 }
 0x154   : > { %4082 = vmatmul.msk.f32.gmra.mxu3 %vm225_vm1, %v5188_v9  ;;  %v800_v29 = vadd.f32 %v799_v52, %v587_v5 }
 0x155   : > { %4089 = vmatmul.msk.f32.gmra.mxu0 %vm225_vm1, %v4659_v38 }
 0x156   : > { %4123 = vmatmul.msk.f32.gmra.mxu1 %vm225_vm1, %v4663_v40  ;;  %v1100_v40 = vadd.f32 %v1036_v17, %v791_v3 }
 0x157   : > { %4157 = vmatmul.msk.f32.gmra.mxu2 %vm225_vm1, %v4693_v47  ;;  %v1311_v42 = vpop.f32.mrf.mxu3 }
 0x158   : > { %v5198_v20 = vadd.f32 %v1311_v42, %v1099_v35 }
 0x15a   : > { %v1045_v23 = vpop.f32.mrf.mxu2  ;;  %v590_v31 = vpop.f32.mrf.mxu0 }
 0x15b   : > { %v802_v28 = vpop.f32.mrf.mxu1 }
 0x15c   : > { %4187 = vmatmul.msk.f32.vlgmr.msra.gmra.mxu3 %vm225_vm1, %v4629_v30  ;;  %v1101_v30 = vadd.f32 %v1039_v26, %v794_v13  ;;  %v803_v5 = vadd.f32 %v802_v28, %v590_v31  ;;  %v6187_v13 = vld [vmem:[#allocation11_spill] sm:$0xff] }
 0x15d   : > { %4090 = vmatmul.msk.f32.gmra.mxu0 %vm225_vm1, %v4673_v41 }
 0x15e   : > { %4124 = vmatmul.msk.f32.gmra.mxu1 %vm225_vm1, %v4677_v43 }
 0x15f   : > { %4158 = vmatmul.msk.f32.gmra.mxu2 %vm225_vm1, %v4707_v50  ;;  %v1314_v47 = vpop.f32.mrf.mxu3 }
 0x160   : > { %v5208_v37 = vadd.f32 %v1314_v47, %v1100_v40 }
 0x162   : > { %v1048_v14 = vpop.f32.mrf.mxu2  ;;  %v593_v25 = vpop.f32.mrf.mxu0 }
 0x163   : > { %v805_v27 = vpop.f32.mrf.mxu1 }
 0x164   : > { %4188 = vmatmul.msk.f32.gmra.mxu3 %vm225_vm1, %v4642_v33  ;;  %v1102_v33 = vadd.f32 %v1042_v53, %v797_v10  ;;  %v806_v42 = vadd.f32 %v805_v27, %v593_v25  ;;  %v6186_v27 = vld [vmem:[#allocation5_spill] sm:$0xff]  ;;  %v6190_v10 = vld [vmem:[#allocation7_spill] sm:$0xff] }
 0x165   : > { %4091 = vmatmul.msk.f32.gmra.mxu0 %vm225_vm1, %v4691_v46 }
 0x166   : > { %4125 = vmatmul.msk.f32.gmra.mxu1 %vm225_vm1, %v4695_v48 }
 0x167   : > { %4159 = vmatmul.msk.f32.gmra.mxu2 %vm225_vm1, %v4725_v55  ;;  %v1317_v43 = vpop.f32.mrf.mxu3 }
 0x168   : > { %v5218_v50 = vadd.f32 %v1317_v43, %v1101_v30 }
 0x16a   : > { %v1051_v36 = vpop.f32.mrf.mxu2  ;;  %v596_v17 = vpop.f32.mrf.mxu0 }
 0x16b   : > { %v808_v22 = vpop.f32.mrf.mxu1 }
 0x16c   : > { %4189 = vmatmul.msk.f32.gmra.mxu3 %vm225_vm1, %v4659_v38  ;;  %v1103_v38 = vadd.f32 %v1045_v23, %v800_v29  ;;  %v809_v3 = vadd.f32 %v808_v22, %v596_v17 }
 0x16d   : > { %4092 = vmatmul.msk.f32.gmra.mxu0 %vm225_vm1, %v4705_v49 }
 0x16e   : > { %4126 = vmatmul.msk.f32.gmra.mxu1 %vm225_vm1, %v4709_v51 }
 0x16f   : > { %4160 = vmatmul.msk.f32.gmra.mxu2 %vm225_vm1, %v4739_v58  ;;  %v1320_v48 = vpop.f32.mrf.mxu3 }
 0x170   : > { %v5228_v55 = vadd.f32 %v1320_v48, %v1102_v33  ;;  %v6191_v48 = vld [vmem:[#allocation17_spill] sm:$0xff] }
 0x172   : > { %v1054_v7 = vpop.f32.mrf.mxu2  ;;  %v599_v26 = vpop.f32.mrf.mxu0 }
 0x173   : > { %v811_v19 = vpop.f32.mrf.mxu1 }
 0x174   : > { %4190 = vmatmul.msk.f32.gmra.mxu3 %vm225_vm1, %v4673_v41  ;;  %v1104_v41 = vadd.f32 %v1048_v14, %v803_v5  ;;  %v812_v25 = vadd.f32 %v811_v19, %v599_v26 }
 0x175   : > { %4093 = vmatmul.msk.f32.gmra.mxu0 %vm225_vm1, %v4723_v54 }
 0x176   : > { %4127 = vmatmul.msk.f32.gmra.mxu1 %vm225_vm1, %v4727_v56 }
 0x177   : > { %4161 = vmatmul.msk.f32.gmra.mxu2 %vm225_vm1, %v4757_v63  ;;  %v1323_v51 = vpop.f32.mrf.mxu3 }
 0x178   : > { %v5238_v58 = vadd.f32 %v1323_v51, %v1103_v38 }
 0x17a   : > { %v1057_v44 = vpop.f32.mrf.mxu2  ;;  %v602_v32 = vpop.f32.mrf.mxu0 }
 0x17b   : > { %v814_v53 = vpop.f32.mrf.mxu1 }
 0x17c   : > { %4191 = vmatmul.msk.f32.gmra.mxu3 %vm225_vm1, %v4691_v46  ;;  %v1105_v46 = vadd.f32 %v1051_v36, %v806_v42  ;;  %v815_v22 = vadd.f32 %v814_v53, %v602_v32  ;;  %v6195_v53 = vld [vmem:[#allocation21_spill] sm:$0xff] }
 0x17d   : > { %4094 = vmatmul.msk.f32.gmra.mxu0 %vm225_vm1, %v4737_v57  ;;  %v6198_v42 = vld [vmem:[#allocation9_spill] sm:$0xff] }
 0x17e   : > { %4128 = vmatmul.msk.f32.gmra.mxu1 %vm225_vm1, %v4741_v59 }
 0x17f   : > { %4162 = vmatmul.msk.f32.gmra.mxu2 %vm225_vm1, %v4771_v2  ;;  %v1326_v56 = vpop.f32.mrf.mxu3 }
 0x180   : > { %v5248_v63 = vadd.f32 %v1326_v56, %v1104_v41 }
 0x182   : > { %v1060_v52 = vpop.f32.mrf.mxu2  ;;  %v605_v21 = vpop.f32.mrf.mxu0 }
 0x183   : > { %v817_v35 = vpop.f32.mrf.mxu1  ;;  %v1108_v33 = vadd.f32 %v1060_v52, %v815_v22 }
 0x184   : > { %4192 = vmatmul.msk.f32.gmra.mxu3 %vm225_vm1, %v4705_v49  ;;  %v1106_v49 = vadd.f32 %v1054_v7, %v809_v3  ;;  %v818_v51 = vadd.f32 %v817_v35, %v605_v21 }
 0x185   : > { %4095 = vmatmul.msk.f32.gmra.mxu0 %vm225_vm1, %v4755_v62 }
 0x186   : > { %4129 = vmatmul.msk.f32.gmra.mxu1 %vm225_vm1, %v4759_v0 }
 0x187   : > { %4163 = vmatmul.msk.f32.gmra.mxu2 %vm225_vm1, %v4789_v8  ;;  %v1329_v59 = vpop.f32.mrf.mxu3 }
 0x188   : > { %v5258_v2 = vadd.f32 %v1329_v59, %v1105_v46  ;;  %v6199_v59 = vld [vmem:[#allocation16_spill] sm:$0xff] }
 0x18a   : > { %v1063_v23 = vpop.f32.mrf.mxu2  ;;  %v608_v31 = vpop.f32.mrf.mxu0 }
 0x18b   : > { %v820_v28 = vpop.f32.mrf.mxu1  ;;  %v1109_v32 = vadd.f32 %v1063_v23, %v818_v51  ;;  %v6200_v23 = vld [vmem:[#allocation18_spill] sm:$0xff]  ;;  %v6207_v51 = vld [vmem:[#allocation20_spill] sm:$0xff] }
 0x18c   : > { %4193 = vmatmul.msk.f32.gmra.mxu3 %vm225_vm1, %v4723_v54  ;;  %v6185_v54 = vld [vmem:[#allocation4_spill] sm:$0xff]  ;;  %v821_v35 = vadd.f32 %v820_v28, %v608_v31  ;;  %v6204_v28 = vld [vmem:[#allocation30_spill] sm:$0xff] }
 0x18d   : > { %4096 = vmatmul.msk.f32.gmra.mxu0 %vm225_vm1, %v4769_v1 }
 0x18e   : > { %4130 = vmatmul.msk.f32.gmra.mxu1 %vm225_vm1, %v4773_v4  ;;  %v1107_v4 = vadd.f32 %v1057_v44, %v812_v25  ;;  %v6194_v44 = vld [vmem:[#allocation12_spill] sm:$0xff] }
 0x18f   : > { %4164 = vmatmul.msk.f32.gmra.mxu2 %vm225_vm1, %v4803_v11  ;;  %v1332_v0 = vpop.f32.mrf.mxu3 }
 0x190   : > { %v5268_v8 = vadd.f32 %v1332_v0, %v1106_v49  ;;  %v6201_v49 = vld [vmem:[#allocation24_spill] sm:$0xff]  ;;  %v6202_v0 = vld [vmem:[#allocation13_spill] sm:$0xff] }
 0x192   : > { %v1066_v40 = vpop.f32.mrf.mxu2  ;;  %v611_v47 = vpop.f32.mrf.mxu0 }
 0x193   : > { %v823_v14 = vpop.f32.mrf.mxu1  ;;  %v1110_v3 = vadd.f32 %v1066_v40, %v821_v35  ;;  %v6206_v40 = vld [vmem:[#allocation15_spill] sm:$0xff] }
 0x194   : > { %4194 = vmatmul.msk.f32.gmra.mxu3 %vm225_vm1, %v4737_v57  ;;  %v6189_v57 = vld [vmem:[#allocation6_spill] sm:$0xff] }
 0x195   : > { %4097 = vmatmul.msk.f32.gmra.mxu0 %vm225_vm1, %v6185_v54 }
 0x196   : > { %4131 = vmatmul.msk.f32.gmra.mxu1 %vm225_vm1, %v6186_v27 }
 0x197   : > { %4165 = vmatmul.msk.f32.gmra.mxu2 %vm225_vm1, %v6187_v13  ;;  %v1335_v11 = vpop.f32.mrf.mxu3 }
 0x198   : > { %v5278_v30 = vadd.f32 %v1335_v11, %v1107_v4 }
 0x19a   : > { %6188 = vst [vmem:[#allocation4_spill] sm:$0xff] %v5278_v30  ;;  %v1069_v43 = vpop.f32.mrf.mxu2  ;;  %v614_v36 = vpop.f32.mrf.mxu0 }
 0x19b   : > { %v826_v17 = vpop.f32.mrf.mxu1 }
 0x19c   : > { %4195 = vmatmul.msk.f32.gmra.mxu3 %vm225_vm1, %v4755_v62  ;;  %v6193_v62 = vld [vmem:[#allocation10_spill] sm:$0xff] }
 0x19d   : > { %4098 = vmatmul.msk.f32.gmra.mxu0 %vm225_vm1, %v6189_v57 }
 0x19e   : > { %4132 = vmatmul.msk.f32.gmra.mxu1 %vm225_vm1, %v6190_v10  ;;  %v824_v10 = vadd.f32 %v823_v14, %v611_v47 }
 0x19f   : > { %4166 = vmatmul.msk.f32.gmra.mxu2 %vm225_vm1, %v6191_v48  ;;  %v1338_v7 = vpop.f32.mrf.mxu3 }
 0x1a0   : > { %v5288_v26 = vadd.f32 %v1338_v7, %v1108_v33  ;;  %v6205_v33 = vld [vmem:[#allocation14_spill] sm:$0xff] }
 0x1a1   : > { %v746_v48 = vadd.f32 %v6206_v40, %v6205_v33  ;;  %v6217_v33 = vld [vmem:[#allocation38_spill] sm:$0xff] }
 0x1a2   : > { %6192 = vst [vmem:[#allocation5_spill] sm:$0xff] %v5288_v26  ;;  %v1072_v19 = vpop.f32.mrf.mxu2  ;;  %v617_v29 = vpop.f32.mrf.mxu0 }
 0x1a3   : > { %v829_v38 = vpop.f32.mrf.mxu1 }
 0x1a4   : > { %4196 = vmatmul.msk.f32.gmra.mxu3 %vm225_vm1, %v4769_v1  ;;  %v6197_v1 = vld [vmem:[#allocation8_spill] sm:$0xff] }
 0x1a5   : > { %4099 = vmatmul.msk.f32.gmra.mxu0 %vm225_vm1, %v6193_v62  ;;  %v743_v46 = vadd.f32 %v6198_v42, %v6197_v1  ;;  %v6208_v62 = vld [vmem:[#allocation22_spill] sm:$0xff] }
 0x1a6   : > { %4133 = vmatmul.msk.f32.gmra.mxu1 %vm225_vm1, %v6194_v44  ;;  %v1111_v44 = vadd.f32 %v1069_v43, %v824_v10  ;;  %v2241_v42 = vld [vmem:[#allocation2 + $0xc1] sm:$0xff] }
 0x1a7   : > { %4167 = vmatmul.msk.f32.gmra.mxu2 %vm225_vm1, %v6195_v53  ;;  %v1341_v5 = vpop.f32.mrf.mxu3  ;;  %v1084_v25 = vadd.f32 %v6202_v0, %v743_v46  ;;  %v6210_v53 = vld [vmem:[#allocation19_spill] sm:$0xff] }
 0x1a8   : > { %v5298_v41 = vadd.f32 %v1341_v5, %v1109_v32  ;;  %v6209_v32 = vld [vmem:[#allocation28_spill] sm:$0xff]  ;;  %v1085_v5 = vadd.f32 %v6210_v53, %v746_v48  ;;  %v6213_v0 = vld [vmem:[#allocation23_spill] sm:$0xff]  ;;  %v830_v48 = vadd.f32 %v829_v38, %v617_v29 }
 0x1aa   : > { %6196 = vst [vmem:[#allocation11_spill] sm:$0xff] %v5298_v41  ;;  %v1075_v56 = vpop.f32.mrf.mxu2  ;;  %v5300_v52 = vpop.f32.mrf.mxu0 }
 0x1ab   : > { %v5302_v21 = vpop.f32.mrf.mxu1 }
 0x1ac   : > { %4197 = vmatmul.msk.f32.gmra.mxu3 %vm225_vm1, %v6185_v54  ;;  %v1362_v54 = vadd.f32 %v6204_v28, %v1084_v25  ;;  %v6214_v25 = vld [vmem:[#allocation25_spill] sm:$0xff]  ;;  %v6215_v28 = vld [vmem:[#allocation32_spill] sm:$0xff] }
 0x1ad   : > { %4100 = vmatmul.msk.f32.gmra.mxu0 %vm225_vm1, %v6199_v59 }
 0x1ae   : > { %4134 = vmatmul.msk.f32.gmra.mxu1 %vm225_vm1, %v6200_v23 }
 0x1af   : > { %4168 = vmatmul.msk.f32.gmra.mxu2 %vm225_vm1, %v6201_v49  ;;  %v1344_v27 = vpop.f32.mrf.mxu3  ;;  %v827_v49 = vadd.f32 %v826_v17, %v614_v36 }
 0x1b0   : > { %v5315_v31 = vadd.f32 %v1344_v27, %v1110_v3 }
 0x1b1   : > { %v1112_v27 = vadd.f32 %v1072_v19, %v827_v49  ;;  %v6219_v19 = vld [vmem:[#allocation29_spill] sm:$0xff]  ;;  %v6225_v49 = vld [vmem:[#allocation40_spill] sm:$0xff] }
 0x1b2   : > { %6203 = vst [vmem:[#allocation6_spill] sm:$0xff] %v5315_v31  ;;  %v1078_v4 = vpop.f32.mrf.mxu2  ;;  %v1544_v13 = vpop.f32.mrf.mxu0 }
 0x1b3   : > { %v1822_v11 = vpop.f32.mrf.mxu1  ;;  %v1640_v22 = vadd.f32 %v1544_v13, %v1362_v54 }
 0x1b4   : > { %4198 = vmatmul.msk.f32.gmra.mxu3 %vm225_vm1, %v6189_v57  ;;  %v6212_v57 = vld [vmem:[#allocation34_spill] sm:$0xff] }
 0x1b5   : > { %v1918_v7 = vadd.f32 %v1822_v11, %v1640_v22  ;;  %4101 = vmatmul.msk.f32.gmra.mxu0 %vm225_vm1, %v6207_v51  ;;  %v1363_v35 = vadd.f32 %v6212_v57, %v1085_v5  ;;  %v2242_v22 = vld [vmem:[#allocation2 + $0xc9] sm:$0xff] }
 0x1b6   : > { %4135 = vmatmul.msk.f32.gmra.mxu1 %vm225_vm1, %v6208_v62  ;;  %v6218_v51 = vld [vmem:[#allocation27_spill] sm:$0xff]  ;;  %v1113_v62 = vadd.f32 %v1075_v56, %v830_v48 }
 0x1b7   : > { %4169 = vmatmul.msk.f32.gmra.mxu2 %vm225_vm1, %v6209_v32  ;;  %v1347_v47 = vpop.f32.mrf.mxu3  ;;  %v6223_v56 = vld [vmem:[#allocation31_spill] sm:$0xff] }
 0x1b8   : > { %v5329_v14 = vadd.f32 %v1347_v47, %v1111_v44  ;;  %v6220_v44 = vld [vmem:[#allocation36_spill] sm:$0xff]  ;;  %v2243_v47 = vld [vmem:[#allocation2 + $0xd9] sm:$0xff] }
 0x1ba   : > { %6211 = vst [vmem:[#allocation7_spill] sm:$0xff] %v5329_v14  ;;  %v2101_v1 = vpop.f32.mrf.mxu2  ;;  %v1547_v59 = vpop.f32.mrf.mxu0 }
 0x1bb   : > { %v5332_v46 = vadd.f32 %v2101_v1, %v1918_v7  ;;  %v1825_v23 = vpop.f32.mrf.mxu1  ;;  %v1641_v3 = vadd.f32 %v1547_v59, %v1363_v35  ;;  %v6222_v35 = vld [vmem:[#allocation42_spill] sm:$0xff] }
 0x1bc   : > { %4199 = vmatmul.msk.f32.gmra.mxu3 %vm225_vm1, %v2241_v42  ;;  %v833_v42 = vadd.f32 %v5302_v21, %v5300_v52 }
 0x1bd   : > { %v1919_v43 = vadd.f32 %v1825_v23, %v1641_v3  ;;  %4102 = vmatmul.msk.f32.gmra.mxu0 %vm225_vm1, %v6213_v0  ;;  %v6224_v23 = vld [vmem:[#allocation33_spill] sm:$0xff] }
 0x1be   : > { %4136 = vmatmul.msk.f32.gmra.mxu1 %vm225_vm1, %v6214_v25  ;;  %v1114_v3 = vadd.f32 %v1078_v4, %v833_v42  ;;  %v6229_v4 = vld [vmem:[#allocation37_spill] sm:$0xff] }
 0x1bf   : > { %4170 = vmatmul.msk.f32.gmra.mxu2 %vm225_vm1, %v6215_v28  ;;  %v1350_v54 = vpop.f32.mrf.mxu3 }
 0x1c0   : > { %v5341_v13 = vadd.f32 %v1350_v54, %v1112_v27  ;;  %v2244_v27 = vld [vmem:[#allocation2 + $0xe1] sm:$0xff] }
 0x1c1   : > { %v6227_v54 = vld [vmem:[#allocation46_spill] sm:$0xff] }
 0x1c2   : > { %6216 = vst [vmem:[#allocation17_spill] sm:$0xff] %v5341_v13  ;;  %v2104_v11 = vpop.f32.mrf.mxu2  ;;  %v1550_v36 = vpop.f32.mrf.mxu0 }
 0x1c3   : > { %v5343_v10 = vadd.f32 %v2104_v11, %v1919_v43  ;;  %v1828_v17 = vpop.f32.mrf.mxu1  ;;  %v1642_v40 = vadd.f32 %v1550_v36, %v6217_v33  ;;  %v6228_v36 = vld [vmem:[#allocation35_spill] sm:$0xff] }
 0x1c4   : > { %4200 = vmatmul.msk.f32.gmra.mxu3 %vm225_vm1, %v2242_v22 }
 0x1c5   : > { %v1920_v7 = vadd.f32 %v1828_v17, %v1642_v40  ;;  %4103 = vmatmul.msk.f32.gmra.mxu0 %vm225_vm1, %v6218_v51  ;;  %v6230_v17 = vld [vmem:[#allocation44_spill] sm:$0xff]  ;;  %v6231_v40 = vld [vmem:[#allocation26_spill] sm:$0xff] }
 0x1c6   : > { %4137 = vmatmul.msk.f32.gmra.mxu1 %vm225_vm1, %v6219_v19 }
 0x1c7   : > { %4171 = vmatmul.msk.f32.gmra.mxu2 %vm225_vm1, %v6220_v44  ;;  %v1353_v32 = vpop.f32.mrf.mxu3 }
 0x1c8   : > { %v5353_v53 = vadd.f32 %v1353_v32, %v1113_v62  ;;  %v6233_v32 = vld [vmem:[#allocation50_spill] sm:$0xff] }
 0x1ca   : > { %6221 = vst [vmem:[#allocation10_spill] sm:$0xff] %v5353_v53  ;;  %v2107_v5 = vpop.f32.mrf.mxu2  ;;  %v1553_v29 = vpop.f32.mrf.mxu0 }
 0x1cb   : > { %v2199_v57 = vadd.f32 %v2107_v5, %v1920_v7  ;;  %v1831_v38 = vpop.f32.mrf.mxu1  ;;  %v1643_v1 = vadd.f32 %v1553_v29, %v6222_v35  ;;  %v6234_v29 = vld [vmem:[#allocation39_spill] sm:$0xff]  ;;  %v6236_v35 = vld [vmem:[#allocation48_spill] sm:$0xff] }
 0x1cc   : > { %4201 = vmatmul.msk.f32.gmra.mxu3 %vm225_vm1, %v2243_v47 }
 0x1cd   : > { %v1921_v59 = vadd.f32 %v1831_v38, %v1643_v1  ;;  %4104 = vmatmul.msk.f32.gmra.mxu0 %vm225_vm1, %v6223_v56  ;;  %v6235_v38 = vld [vmem:[#allocation41_spill] sm:$0xff] }
 0x1ce   : > { %4138 = vmatmul.msk.f32.gmra.mxu1 %vm225_vm1, %v6224_v23 }
 0x1cf   : > { %4172 = vmatmul.msk.f32.gmra.mxu2 %vm225_vm1, %v6225_v49  ;;  %v1356_v43 = vpop.f32.mrf.mxu3 }
 0x1d0   : > { %v5365_v0 = vadd.f32 %v1356_v43, %v1114_v3  ;;  %v6237_v43 = vld [vmem:[#allocation54_spill] sm:$0xff] }
 0x1d2   : > { %6226 = vst [vmem:[#allocation12_spill] sm:$0xff] %v5365_v0  ;;  %v2110_v25 = vpop.f32.mrf.mxu2  ;;  %v1556_v52 = vpop.f32.mrf.mxu0 }
 0x1d3   : > { %v2200_v28 = vadd.f32 %v2110_v25, %v1921_v59  ;;  %v1834_v21 = vpop.f32.mrf.mxu1  ;;  %v1644_v11 = vadd.f32 %v1556_v52, %v6227_v54  ;;  %v6239_v52 = vld [vmem:[#allocation45_spill] sm:$0xff] }
 0x1d4   : > { %4202 = vmatmul.msk.f32.gmra.mxu3 %vm225_vm1, %v2244_v27  ;;  %v6238_v27 = vld [vmem:[#allocation43_spill] sm:$0xff] }
 0x1d5   : > { %v1922_v22 = vadd.f32 %v1834_v21, %v1644_v11  ;;  %4105 = vmatmul.msk.f32.gmra.mxu0 %vm225_vm1, %v6228_v36  ;;  %v6240_v21 = vld [vmem:[#allocation52_spill] sm:$0xff] }
 0x1d6   : > { %4139 = vmatmul.msk.f32.gmra.mxu1 %vm225_vm1, %v6229_v4 }
 0x1d7   : > { %4173 = vmatmul.msk.f32.gmra.mxu2 %vm225_vm1, %v6230_v17  ;;  %v1359_v33 = vpop.f32.mrf.mxu3 }
 0x1d8   : > { %v5376_v48 = vadd.f32 %v1359_v33, %v6231_v40  ;;  %v6241_v33 = vld [vmem:[#allocation58_spill] sm:$0xff] }
 0x1da   : > { %6232 = vst [vmem:[#allocation21_spill] sm:$0xff] %v5376_v48  ;;  %v2113_v7 = vpop.f32.mrf.mxu2  ;;  %v1559_v62 = vpop.f32.mrf.mxu0 }
 0x1db   : > { %v2201_v19 = vadd.f32 %v2113_v7, %v1922_v22  ;;  %v1837_v44 = vpop.f32.mrf.mxu1  ;;  %v1645_v5 = vadd.f32 %v1559_v62, %v6233_v32  ;;  %v6242_v7 = vld [vmem:[#allocation47_spill] sm:$0xff]  ;;  %v6243_v62 = vld [vmem:[#allocation49_spill] sm:$0xff] }
 0x1dc   : > { %4203 = vmatmul.msk.f32.gmra.mxu3 %vm225_vm1, %v6218_v51 }
 0x1dd   : > { %v1923_v47 = vadd.f32 %v1837_v44, %v1645_v5  ;;  %4106 = vmatmul.msk.f32.gmra.mxu0 %vm225_vm1, %v6234_v29  ;;  %v6244_v44 = vld [vmem:[#allocation56_spill] sm:$0xff] }
 0x1de   : > { %4140 = vmatmul.msk.f32.gmra.mxu1 %vm225_vm1, %v6235_v38 }
 0x1df   : > { %4174 = vmatmul.msk.f32.gmra.mxu2 %vm225_vm1, %v6236_v35  ;;  %v2379_v1 = vpop.f32.mrf.mxu3  ;;  %v6246_v35 = vld [vmem:[#allocation53_spill] sm:$0xff] }
 0x1e0   : > { %v5388_v42 = vadd.f32 %v2379_v1, %v5332_v46 }
 0x1e2   : > { %v2116_v59 = vpop.f32.mrf.mxu2  ;;  %v1562_v3 = vpop.f32.mrf.mxu0 }
 0x1e3   : > { %v2202_v23 = vadd.f32 %v2116_v59, %v1923_v47  ;;  %v1840_v49 = vpop.f32.mrf.mxu1  ;;  %v1646_v51 = vadd.f32 %v1562_v3, %v6237_v43 }
 0x1e4   : > { %4204 = vmatmul.msk.f32.gmra.mxu3 %vm225_vm1, %v6223_v56 }
 0x1e5   : > { %v1924_v25 = vadd.f32 %v1840_v49, %v1646_v51  ;;  %4107 = vmatmul.msk.f32.gmra.mxu0 %vm225_vm1, %v6238_v27  ;;  %v6248_v49 = vld [vmem:[#allocation57_spill] sm:$0xff]  ;;  %v6249_v51 = vld [vmem:[#allocation59_spill] sm:$0xff] }
 0x1e6   : > { %4141 = vmatmul.msk.f32.gmra.mxu1 %vm225_vm1, %v6239_v52 }
 0x1e7   : > { %4175 = vmatmul.msk.f32.gmra.mxu2 %vm225_vm1, %v6240_v21  ;;  %v2382_v46 = vpop.f32.mrf.mxu3  ;;  %v6251_v21 = vld [vmem:[#allocation62_spill] sm:$0xff] }
 0x1e8   : > { %v5400_v54 = vadd.f32 %v2382_v46, %v5343_v10 }
 0x1ea   : > { %v2119_v11 = vpop.f32.mrf.mxu2  ;;  %v1565_v4 = vpop.f32.mrf.mxu0 }
 0x1eb   : > { %v2203_v22 = vadd.f32 %v2119_v11, %v1924_v25  ;;  %v1843_v17 = vpop.f32.mrf.mxu1  ;;  %v1647_v56 = vadd.f32 %v1565_v4, %v6241_v33  ;;  %v6250_v25 = vld [vmem:[#allocation60_spill] sm:$0xff]  ;;  %v5489_v33 = vld [vmem:[#allocation2 + $0x182] sm:$0xff] }
 0x1ec   : > { %4205 = vmatmul.msk.f32.gmra.mxu3 %vm225_vm1, %v6228_v36  ;;  %v6245_v36 = vld [vmem:[#allocation51_spill] sm:$0xff] }
 0x1ed   : > { %v1925_v40 = vadd.f32 %v1843_v17, %v1647_v56  ;;  %4108 = vmatmul.msk.f32.gmra.mxu0 %vm225_vm1, %v6242_v7  ;;  %v5478_v17 = vld [vmem:[#allocation2 + $0x172] sm:$0xff] }
 0x1ee   : > { %4142 = vmatmul.msk.f32.gmra.mxu1 %vm225_vm1, %v6243_v62  ;;  %v1981_v56 = vld [vmem:[#allocation2 + $0x198] sm:$0xff]  ;;  %v1982_v62 = vld [vmem:[#allocation2 + $0x1a0] sm:$0xff] }
 0x1ef   : > { %4176 = vmatmul.msk.f32.gmra.mxu2 %vm225_vm1, %v6244_v44  ;;  %v2385_v10 = vpop.f32.mrf.mxu3 }
 0x1f0   : > { %v5411_v32 = vadd.f32 %v2385_v10, %v2199_v57  ;;  %v4219_v57 = vld [vmem:[%s6060_s1 + $0x20] sm:$0x7]  ;;  %v2507_v10 = vld [vmem:[#allocation2 + $0x32] sm:$0xff] }
 0x1f1   : > { %4220 = vmatpush.msk.msra.mxu0 %vm509_vm0, %v4219_v57  ;;  %v2510_v57 = vld [vmem:[#allocation2 + $0x52] sm:$0xff] }
 0x1f2   : > { %v2122_v5 = vpop.f32.mrf.mxu2  ;;  %v5413_v38 = vpop.f32.mrf.mxu0 }
 0x1f3   : > { %v2204_v47 = vadd.f32 %v2122_v5, %v1925_v40 }
 0x1f4   : > { %4206 = vmatmul.msk.f32.gmra.mxu3 %vm225_vm1, %v6234_v29  ;;  %v6247_v29 = vld [vmem:[#allocation55_spill] sm:$0xff] }
 0x1f5   : > { %4109 = vmatmul.msk.f32.gmra.mxu0 %vm225_vm1, %v6245_v36 }
 0x1f6   : > { %4143 = vmatmul.msk.f32.gmra.mxu1 %vm225_vm1, %v6246_v35  ;;  %v2259_v35 = vld [vmem:[#allocation2 + $0x199] sm:$0xff] }
 0x1f7   : > { %4177 = vmatmul.msk.f32.gmra.mxu2 %vm225_vm1, %v5084_v45  ;;  %v2388_v1 = vpop.f32.mrf.mxu3 }
 0x1f8   : > { %v5423_v59 = vadd.f32 %v2388_v1, %v2200_v28 }
 0x1fa   : > { %v5429_v3 = vpop.f32.mrf.mxu0 }
 0x1fc   : > { %4207 = vmatmul.msk.f32.gmra.mxu3 %vm225_vm1, %v6238_v27 }
 0x1fd   : > { %4110 = vmatmul.msk.f32.gmra.mxu0 %vm225_vm1, %v6247_v29 }
 0x1fe   : > { %4144 = vmatmul.msk.f32.gmra.mxu1 %vm225_vm1, %v6248_v49 }
 0x1ff   : > { %4178 = vmatmul.msk.f32.gmra.mxu2 %vm225_vm1, %v5102_v15  ;;  %v2391_v45 = vpop.f32.mrf.mxu3 }
 0x200   : > { %v5439_v28 = vadd.f32 %v2391_v45, %v2201_v19  ;;  %v1978_v19 = vld [vmem:[#allocation2 + $0x170] sm:$0xff]  ;;  %v2511_v45 = vld [vmem:[#allocation2 + $0x62] sm:$0xff] }
 0x202   : > { %v5441_v43 = vpop.f32.mrf.mxu0 }
 0x204   : > { %4208 = vmatmul.msk.f32.gmra.mxu3 %vm225_vm1, %v6242_v7  ;;  %v1425_v7 = vld [vmem:[#allocation2 + $0x189] sm:$0xff] }
 0x205   : > { %4111 = vmatmul.msk.f32.gmra.mxu0 %vm225_vm1, %v6249_v51 }
 0x206   : > { %4145 = vmatmul.msk.f32.gmra.mxu1 %vm225_vm1, %v6250_v25  ;;  %v2512_v25 = vld [vmem:[#allocation2 + $0x6a] sm:$0xff] }
 0x207   : > { %4179 = vmatmul.msk.f32.gmra.mxu2 %vm225_vm1, %v5122_v24  ;;  %v2394_v27 = vpop.f32.mrf.mxu3 }
 0x208   : > { %v5451_v52 = vadd.f32 %v2394_v27, %v2202_v23 }
 0x20a   : > { %v5453_v15 = vpop.f32.mrf.mxu0 }
 0x20c   : > { %4209 = vmatmul.msk.f32.gmra.mxu3 %vm225_vm1, %v6245_v36  ;;  %v2509_v36 = vld [vmem:[#allocation2 + $0x4a] sm:$0xff] }
 0x20d   : > { %4112 = vmatmul.msk.f32.gmra.mxu0 %vm225_vm1, %v6251_v21 }
 0x20e   : > { %4146 = vmatmul.msk.f32.gmra.mxu1 %vm225_vm1, %v5104_v61 }
 0x20f   : > { %4180 = vmatmul.msk.f32.gmra.mxu2 %vm225_vm1, %v1978_v19  ;;  %v2397_v46 = vpop.f32.mrf.mxu3  ;;  %v2513_v19 = vld [vmem:[#allocation2 + $0x7a] sm:$0xff] }
 0x210   : > { %v5462_v11 = vadd.f32 %v2397_v46, %v2203_v22  ;;  %v1423_v22 = vld [vmem:[#allocation2 + $0x171] sm:$0xff]  ;;  %v2514_v46 = vld [vmem:[#allocation2 + $0x82] sm:$0xff] }
 0x212   : > { %v5464_v24 = vpop.f32.mrf.mxu0 }
 0x214   : > { %4210 = vmatmul.msk.f32.gmra.mxu3 %vm225_vm1, %v6247_v29  ;;  %v2260_v29 = vld [vmem:[#allocation2 + $0x1a1] sm:$0xff] }
 0x215   : > { %4113 = vmatmul.msk.f32.gmra.mxu0 %vm225_vm1, %v5120_v6 }
 0x216   : > { %4147 = vmatmul.msk.f32.gmra.mxu1 %vm225_vm1, %v5124_v16 }
 0x217   : > { %4181 = vmatmul.msk.f32.gmra.mxu2 %vm225_vm1, %v5176_v60  ;;  %v2400_v61 = vpop.f32.mrf.mxu3  ;;  %v1424_v60 = vld [vmem:[#allocation2 + $0x181] sm:$0xff] }
 0x218   : > { %v5474_v23 = vadd.f32 %v2400_v61, %v2204_v47  ;;  %v2508_v47 = vld [vmem:[#allocation2 + $0x3a] sm:$0xff] }
 0x21a   : > { %v5476_v4 = vpop.f32.mrf.mxu0 }
 0x21c   : > { %4211 = vmatmul.msk.f32.gmra.mxu3 %vm225_vm1, %v6249_v51 }
 0x21d   : > { %4114 = vmatmul.msk.f32.gmra.mxu0 %vm225_vm1, %v1423_v22 }
 0x21e   : > { %4148 = vmatmul.msk.f32.gmra.mxu1 %vm225_vm1, %v5478_v17 }
 0x21f   : > { %4182 = vmatmul.msk.f32.gmra.mxu2 %vm225_vm1, %v5188_v9  ;;  %v5499_v9 = vld [vmem:[#allocation2 + $0x18a] sm:$0xff] }
 0x222   : > { %v5487_v16 = vpop.f32.mrf.mxu0 }
 0x224   : > { %4212 = vmatmul.msk.f32.gmra.mxu3 %vm225_vm1, %v6251_v21 }
 0x225   : > { %4115 = vmatmul.msk.f32.gmra.mxu0 %vm225_vm1, %v1424_v60 }
 0x226   : > { %4149 = vmatmul.msk.f32.gmra.mxu1 %vm225_vm1, %v5489_v33 }
 0x227   : > { %4183 = vmatmul.msk.f32.gmra.mxu2 %vm225_vm1, %v1981_v56  ;;  %v2516_v56 = vld [vmem:[#allocation2 + $0x9a] sm:$0xff] }
 0x22a   : > { %v5497_v40 = vpop.f32.mrf.mxu0 }
 0x22c   : > { %4213 = vmatmul.msk.f32.gmra.mxu3 %vm225_vm1, %v5120_v6 }
 0x22d   : > { %4116 = vmatmul.msk.f32.gmra.mxu0 %vm225_vm1, %v1425_v7 }
 0x22e   : > { %4150 = vmatmul.msk.f32.gmra.mxu1 %vm225_vm1, %v5499_v9 }
 0x22f   : > { %4184 = vmatmul.msk.f32.gmra.mxu2 %vm225_vm1, %v1982_v62  ;;  %v2517_v62 = vld [vmem:[#allocation2 + $0xaa] sm:$0xff] }
 0x232   : > { %v5507_v44 = vpop.f32.mrf.mxu0 }
 0x234   : > { %4214 = vmatmul.msk.f32.gmra.mxu3 %vm225_vm1, %v1423_v22  ;;  %v2515_v22 = vld [vmem:[#allocation2 + $0x92] sm:$0xff] }
 0x235   : > { %4221 = vmatmul.msk.f32.vlgmr.msra.gmra.mxu0 %vm225_vm1, %v2507_v10 }
 0x23a   : > { %v5511_v5 = vpop.f32.mrf.mxu0 }
 0x23c   : > { %4215 = vmatmul.msk.f32.gmra.mxu3 %vm225_vm1, %v1424_v60 }
 0x23d   : > { %4222 = vmatmul.msk.f32.gmra.mxu0 %vm225_vm1, %v2508_v47  ;;  %v2518_v47 = vld [vmem:[#allocation2 + $0xb2] sm:$0xff] }
 0x242   : > { %v5515_v6 = vpop.f32.mrf.mxu0 }
 0x244   : > { %4216 = vmatmul.msk.f32.gmra.mxu3 %vm225_vm1, %v1425_v7 }
 0x245   : > { %4223 = vmatmul.msk.f32.gmra.mxu0 %vm225_vm1, %v2509_v36 }
 0x24a   : > { %v5519_v1 = vpop.f32.mrf.mxu0 }
 0x24c   : > { %4217 = vmatmul.msk.f32.gmra.mxu3 %vm225_vm1, %v2259_v35  ;;  %v2519_v35 = vld [vmem:[#allocation2 + $0xc2] sm:$0xff] }
 0x24d   : > { %4224 = vmatmul.msk.f32.gmra.mxu0 %vm225_vm1, %v2510_v57 }
 0x252   : > { %v5523_v49 = vpop.f32.mrf.mxu0 }
 0x254   : > { %4218 = vmatmul.msk.f32.gmra.mxu3 %vm225_vm1, %v2260_v29  ;;  %v2520_v29 = vld [vmem:[#allocation2 + $0xca] sm:$0xff] }
 0x255   : > { %4225 = vmatmul.msk.f32.gmra.mxu0 %vm225_vm1, %v2511_v45 }
 0x25a   : > { %v5527_v51 = vpop.f32.mrf.mxu0 }
 0x25d   : > { %4226 = vmatmul.msk.f32.gmra.mxu0 %vm225_vm1, %v2512_v25  ;;  %v2521_v25 = vld [vmem:[#allocation2 + $0xda] sm:$0xff] }
 0x262   : > { %v5530_v27 = vpop.f32.mrf.mxu0 }
 0x263   : > { %6252 = vst [vmem:[#allocation8_spill] sm:$0xff] %v5530_v27  ;;  %v6265_v27 = vld [vmem:[#allocation63_spill] sm:$0xff] }
 0x265   : > { %4227 = vmatmul.msk.f32.gmra.mxu0 %vm225_vm1, %v2513_v19 }
 0x26a   : > { %v5533_v21 = vpop.f32.mrf.mxu0 }
 0x26b   : > { %6253 = vst [vmem:[#allocation9_spill] sm:$0xff] %v5533_v21 }
 0x26d   : > { %4228 = vmatmul.msk.f32.gmra.mxu0 %vm225_vm1, %v2514_v46  ;;  %v2522_v46 = vld [vmem:[#allocation2 + $0xe2] sm:$0xff] }
 0x272   : > { %v5536_v61 = vpop.f32.mrf.mxu0 }
 0x273   : > { %6254 = vst [vmem:[#allocation16_spill] sm:$0xff] %v5536_v61 }
 0x275   : > { %4229 = vmatmul.msk.f32.gmra.mxu0 %vm225_vm1, %v2515_v22 }
 0x27a   : > { %v5539_v60 = vpop.f32.mrf.mxu0 }
 0x27b   : > { %6255 = vst [vmem:[#allocation18_spill] sm:$0xff] %v5539_v60  ;;  %v2526_v60 = vld [vmem:[#allocation2 + $0x112] sm:$0xff] }
 0x27d   : > { %4230 = vmatmul.msk.f32.gmra.mxu0 %vm225_vm1, %v2516_v56  ;;  %v2523_v56 = vld [vmem:[#allocation2 + $0xf2] sm:$0xff] }
 0x282   : > { %v5542_v7 = vpop.f32.mrf.mxu0 }
 0x283   : > { %6256 = vst [vmem:[#allocation24_spill] sm:$0xff] %v5542_v7 }
 0x285   : > { %4231 = vmatmul.msk.f32.gmra.mxu0 %vm225_vm1, %v2517_v62 }
 0x28a   : > { %v5545_v10 = vpop.f32.mrf.mxu0 }
 0x28b   : > { %6257 = vst [vmem:[#allocation13_spill] sm:$0xff] %v5545_v10 }
 0x28d   : > { %4232 = vmatmul.msk.f32.gmra.mxu0 %vm225_vm1, %v2518_v47  ;;  %v2524_v47 = vld [vmem:[#allocation2 + $0xfa] sm:$0xff] }
 0x292   : > { %v5548_v36 = vpop.f32.mrf.mxu0 }
 0x293   : > { %6258 = vst [vmem:[#allocation30_spill] sm:$0xff] %v5548_v36 }
 0x295   : > { %4233 = vmatmul.msk.f32.gmra.mxu0 %vm225_vm1, %v2519_v35  ;;  %v1846_v35 = vpop.f32.mrf.mxu1 }
 0x29a   : > { %v5551_v57 = vpop.f32.mrf.mxu0 }
 0x29b   : > { %6259 = vst [vmem:[#allocation14_spill] sm:$0xff] %v5551_v57  ;;  %v2525_v57 = vld [vmem:[#allocation2 + $0x10a] sm:$0xff] }
 0x29d   : > { %4234 = vmatmul.msk.f32.gmra.mxu0 %vm225_vm1, %v2520_v29  ;;  %v2125_v29 = vpop.f32.mrf.mxu2 }
 0x2a2   : > { %v5554_v45 = vpop.f32.mrf.mxu0 }
 0x2a3   : > { %6260 = vst [vmem:[#allocation15_spill] sm:$0xff] %v5554_v45 }
 0x2a5   : > { %4235 = vmatmul.msk.f32.gmra.mxu0 %vm225_vm1, %v2521_v25  ;;  %v5566_v25 = vld [vmem:[%s6061_s2] ss:$0 sm:$0xff]  ;;  %v2128_v36 = vpop.f32.mrf.mxu2 }
 0x2aa   : > { %v5557_v19 = vpop.f32.mrf.mxu0 }
 0x2ab   : > { %6261 = vst [vmem:[#allocation20_spill] sm:$0xff] %v5557_v19  ;;  %v5568_v19 = vpop.f32.mrf.mxu3 }
 0x2ad   : > { %4236 = vmatmul.msk.f32.gmra.mxu0 %vm225_vm1, %v2522_v46 }
 0x2b2   : > { %v2657_v22 = vpop.f32.mrf.mxu0 }
 0x2b3   : > { %v2753_v48 = vadd.f32 %v2657_v22, %v5388_v42  ;;  %v2406_v10 = vpop.f32.mrf.mxu3 }
 0x2b5   : > { %4237 = vmatmul.msk.f32.gmra.mxu0 %vm225_vm1, %v2523_v56  ;;  %v2789_v53 = vadd.f32 %v5566_v25, %v2753_v48 }
 0x2b7   : > { %v2821_v0 = vmax.f32 %v2789_v53, 0.0 }
 0x2ba   : > { %v2660_v62 = vpop.f32.mrf.mxu0 }
 0x2bb   : > { %v2754_v42 = vadd.f32 %v2660_v62, %v5400_v54  ;;  %v2131_v54 = vpop.f32.mrf.mxu2  ;;  %v2409_v62 = vpop.f32.mrf.mxu3 }
 0x2bd   : > { %4238 = vmatmul.msk.f32.gmra.mxu0 %vm225_vm1, %v2524_v47  ;;  %v1849_v47 = vpop.f32.mrf.mxu1  ;;  %v2790_v41 = vadd.f32 %v5566_v25, %v2754_v42  ;;  %v2528_v42 = vld [vmem:[#allocation2 + $0x12a] sm:$0xff] }
 0x2c2   : > { %v2663_v46 = vpop.f32.mrf.mxu0 }
 0x2c3   : > { %v2755_v56 = vadd.f32 %v2663_v46, %v5411_v32  ;;  %v5584_v7 = vpop.f32.mrf.mxu2 }
 0x2c5   : > { %v2791_v45 = vadd.f32 %v5566_v25, %v2755_v56  ;;  %4239 = vmatmul.msk.f32.gmra.mxu0 %vm225_vm1, %v2525_v57  ;;  %v2822_v57 = vmax.f32 %v2790_v41, 0.0  ;;  %v1852_v53 = vpop.f32.mrf.mxu1 }
 0x2c7   : > { %v2823_v22 = vmax.f32 %v2791_v45, 0.0 }
 0x2c9   : > { %v5575_v13 = vmax.f32 %v2821_v0, %v2823_v22  ;;  %v2527_v0 = vld [vmem:[#allocation2 + $0x122] sm:$0xff] }
 0x2ca   : > { %v2666_v14 = vpop.f32.mrf.mxu0 }
 0x2cb   : > { %6262 = vst [vmem:[#allocation22_spill] sm:$0xff] %v5575_v13  ;;  %v2756_v48 = vadd.f32 %v2666_v14, %v5423_v59  ;;  %v5587_v14 = vpop.f32.mrf.mxu3 }
 0x2cd   : > { %v2792_v32 = vadd.f32 %v5566_v25, %v2756_v48  ;;  %4240 = vmatmul.msk.f32.gmra.mxu0 %vm225_vm1, %v2526_v60  ;;  %v1855_v22 = vpop.f32.mrf.mxu1  ;;  %v2529_v60 = vld [vmem:[#allocation2 + $0x13a] sm:$0xff] }
 0x2cf   : > { %v2824_v46 = vmax.f32 %v2792_v32, 0.0 }
 0x2d1   : > { %v5581_v56 = vmax.f32 %v2822_v57, %v2824_v46 }
 0x2d2   : > { %v2669_v45 = vpop.f32.mrf.mxu0 }
 0x2d3   : > { %6263 = vst [vmem:[#allocation28_spill] sm:$0xff] %v5581_v56  ;;  %v2757_v41 = vadd.f32 %v2669_v45, %v5439_v28  ;;  %v5599_v61 = vpop.f32.mrf.mxu3  ;;  %v6264_v28 = vld [vmem:[#allocation61_spill] sm:$0xff] }
 0x2d4   : > { %v1648_v45 = vadd.f32 %v5413_v38, %v6264_v28 }
 0x2d5   : > { %4241 = vmatmul.msk.f32.gmra.mxu0 %vm225_vm1, %v2527_v0  ;;  %v2793_v48 = vadd.f32 %v5566_v25, %v2757_v41  ;;  %v5592_v57 = vpop.f32.mrf.mxu1  ;;  %v5596_v0 = vpop.f32.mrf.mxu2 }
 0x2d7   : > { %v2825_v56 = vmax.f32 %v2793_v48, 0.0 }
 0x2da   : > { %v2672_v13 = vpop.f32.mrf.mxu0 }
 0x2dd   : > { %4242 = vmatmul.msk.f32.gmra.mxu0 %vm225_vm1, %v2528_v42  ;;  %v2758_v42 = vadd.f32 %v2672_v13, %v5451_v52  ;;  %v1861_v13 = vpop.f32.mrf.mxu1  ;;  %v2140_v30 = vpop.f32.mrf.mxu2 }
 0x2df   : > { %v2794_v26 = vadd.f32 %v5566_v25, %v2758_v42  ;;  %v2418_v42 = vpop.f32.mrf.mxu3 }
 0x2e1   : > { %v2826_v48 = vmax.f32 %v2794_v26, 0.0 }
 0x2e2   : > { %v2675_v59 = vpop.f32.mrf.mxu0 }
 0x2e3   : > { %v2759_v32 = vadd.f32 %v2675_v59, %v5462_v11  ;;  %v2530_v59 = vld [vmem:[#allocation2 + $0x142] sm:$0xff] }
 0x2e5   : > { %v2795_v46 = vadd.f32 %v5566_v25, %v2759_v32  ;;  %4243 = vmatmul.msk.f32.gmra.mxu0 %vm225_vm1, %v2529_v60  ;;  %v1926_v60 = vadd.f32 %v1846_v35, %v1648_v45 }
 0x2e7   : > { %v2827_v31 = vmax.f32 %v2795_v46, 0.0  ;;  %v2205_v52 = vadd.f32 %v2125_v29, %v1926_v60  ;;  %v6266_v29 = vld [vmem:[#allocation64_spill] sm:$0xff] }
 0x2e8   : > { %v1650_v26 = vadd.f32 %v5441_v43, %v6266_v29 }
 0x2e9   : > { %v5603_v41 = vmax.f32 %v2825_v56, %v2827_v31  ;;  %v1649_v31 = vadd.f32 %v5429_v3, %v6265_v27  ;;  %v2483_v38 = vadd.f32 %v5568_v19, %v2205_v52  ;;  %v2532_v3 = vld [vmem:[#allocation2 + $0x15a] sm:$0xff]  ;;  %v2421_v19 = vpop.f32.mrf.mxu3 }
 0x2ea   : > { %v2678_v11 = vpop.f32.mrf.mxu0  ;;  %v1928_v52 = vadd.f32 %v1852_v53, %v1650_v26 }
 0x2eb   : > { %v2760_v32 = vadd.f32 %v2678_v11, %v5474_v23  ;;  %v2531_v23 = vld [vmem:[#allocation2 + $0x152] sm:$0xff]  ;;  %v1927_v45 = vadd.f32 %v1849_v47, %v1649_v31  ;;  %v1651_v47 = vadd.f32 %v5453_v15, %v5150_v12  ;;  %v1652_v12 = vadd.f32 %v5464_v24, %v5164_v18 }
 0x2ed   : > { %v2796_v21 = vadd.f32 %v5566_v25, %v2760_v32  ;;  %4244 = vmatmul.msk.f32.gmra.mxu0 %vm225_vm1, %v2530_v59  ;;  %v2206_v11 = vadd.f32 %v2128_v36, %v1927_v45  ;;  %v1864_v59 = vpop.f32.mrf.mxu1  ;;  %v2143_v32 = vpop.f32.mrf.mxu2 }
 0x2ef   : > { %v2828_v46 = vmax.f32 %v2796_v21, 0.0  ;;  %v2484_v21 = vadd.f32 %v2406_v10, %v2206_v11 }
 0x2f1   : > { %v5612_v56 = vmax.f32 %v2826_v48, %v2828_v46  ;;  %v2207_v48 = vadd.f32 %v2131_v54, %v1928_v52  ;;  %v2424_v53 = vpop.f32.mrf.mxu3 }
 0x2f2   : > { %v2681_v28 = vpop.f32.mrf.mxu0 }
 0x2f3   : > { %v2761_v35 = vadd.f32 %v2681_v28, %v2483_v38  ;;  %v2485_v46 = vadd.f32 %v2409_v62, %v2207_v48  ;;  %v2533_v38 = vld [vmem:[#allocation2 + $0x16a] sm:$0xff]  ;;  %v1653_v48 = vadd.f32 %v5476_v4, %v5174_v34 }
 0x2f5   : > { %4245 = vmatmul.msk.f32.gmra.mxu0 %vm225_vm1, %v2531_v23  ;;  %v1867_v31 = vpop.f32.mrf.mxu1  ;;  %v2797_v28 = vadd.f32 %v5566_v25, %v2761_v35  ;;  %v2146_v10 = vpop.f32.mrf.mxu2  ;;  %v1929_v23 = vadd.f32 %v1855_v22, %v1651_v47 }
 0x2f7   : > { %v2208_v11 = vadd.f32 %v5584_v7, %v1929_v23  ;;  %v2829_v54 = vmax.f32 %v2797_v28, 0.0 }
 0x2f9   : > { %v2486_v15 = vadd.f32 %v5587_v14, %v2208_v11  ;;  %v2427_v14 = vpop.f32.mrf.mxu3 }
 0x2fa   : > { %v2684_v60 = vpop.f32.mrf.mxu0 }
 0x2fb   : > { %v2762_v27 = vadd.f32 %v2684_v60, %v2484_v21  ;;  %v1930_v60 = vadd.f32 %v5592_v57, %v1652_v12 }
 0x2fd   : > { %4246 = vmatmul.msk.f32.gmra.mxu0 %vm225_vm1, %v2532_v3  ;;  %v2798_v26 = vadd.f32 %v5566_v25, %v2762_v27  ;;  %v1870_v21 = vpop.f32.mrf.mxu1  ;;  %v2149_v7 = vpop.f32.mrf.mxu2  ;;  %v2209_v52 = vadd.f32 %v5596_v0, %v1930_v60  ;;  %v1654_v0 = vadd.f32 %v5487_v16, %v5186_v39 }
 0x2ff   : > { %v2830_v18 = vmax.f32 %v2798_v26, 0.0  ;;  %v2487_v27 = vadd.f32 %v5599_v61, %v2209_v52  ;;  %v1932_v4 = vadd.f32 %v1864_v59, %v1654_v0 }
 0x301   : > { %v2430_v23 = vpop.f32.mrf.mxu3  ;;  %v2211_v61 = vadd.f32 %v2143_v32, %v1932_v4 }
 0x302   : > { %v2687_v36 = vpop.f32.mrf.mxu0 }
 0x303   : > { %v2763_v43 = vadd.f32 %v2687_v36, %v2485_v46  ;;  %v1931_v36 = vadd.f32 %v1861_v13, %v1653_v48  ;;  %v1655_v13 = vadd.f32 %v5497_v40, %v5198_v20 }
 0x305   : > { %v2799_v45 = vadd.f32 %v5566_v25, %v2763_v43  ;;  %4247 = vmatmul.msk.f32.gmra.mxu0 %vm225_vm1, %v2533_v38  ;;  %v2210_v38 = vadd.f32 %v2140_v30, %v1931_v36  ;;  %v2152_v28 = vpop.f32.mrf.mxu2 }
 0x307   : > { %v2831_v29 = vmax.f32 %v2799_v45, 0.0  ;;  %v2488_v43 = vadd.f32 %v2418_v42, %v2210_v38  ;;  %v1933_v42 = vadd.f32 %v1867_v31, %v1655_v13 }
 0x309   : > { %v5627_v62 = vmax.f32 %v2829_v54, %v2831_v29  ;;  %v2537_v29 = vld [vmem:[#allocation2 + $0x19a] sm:$0xff]  ;;  %v2433_v16 = vpop.f32.mrf.mxu3  ;;  %v2212_v59 = vadd.f32 %v2146_v10, %v1933_v42 }
 0x30a   : > { %v2690_v35 = vpop.f32.mrf.mxu0 }
 0x30b   : > { %v2764_v22 = vadd.f32 %v2690_v35, %v2486_v15  ;;  %v1656_v35 = vadd.f32 %v5507_v44, %v5208_v37  ;;  %v2490_v20 = vadd.f32 %v2424_v53, %v2212_v59  ;;  %v1657_v37 = vadd.f32 %v5511_v5, %v5218_v50 }
 0x30c   : > { %v1659_v5 = vadd.f32 %v5519_v1, %v5238_v58 }
 0x30d   : > { %v2800_v3 = vadd.f32 %v5566_v25, %v2764_v22  ;;  %4248 = vmatmul.msk.f32.gmra.mxu0 %vm225_vm1, %v5478_v17  ;;  %v1873_v17 = vpop.f32.mrf.mxu1  ;;  %v2155_v54 = vpop.f32.mrf.mxu2  ;;  %v2538_v22 = vld [vmem:[#allocation2 + $0x1a2] sm:$0xff]  ;;  %v1934_v52 = vadd.f32 %v1870_v21, %v1656_v35 }
 0x30e   : > { %v1935_v38 = vadd.f32 %v1873_v17, %v1657_v37 }
 0x30f   : > { %v2832_v24 = vmax.f32 %v2800_v3, 0.0 }
 0x310   : > { %v2214_v21 = vadd.f32 %v2152_v28, %v1935_v38 }
 0x311   : > { %v5638_v47 = vmax.f32 %v2830_v18, %v2832_v24  ;;  %v2436_v10 = vpop.f32.mrf.mxu3  ;;  %v2213_v24 = vadd.f32 %v2149_v7, %v1934_v52 }
 0x312   : > { %v2693_v46 = vpop.f32.mrf.mxu0 }
 0x313   : > { %v2765_v57 = vadd.f32 %v2693_v46, %v2487_v27  ;;  %v2491_v44 = vadd.f32 %v2427_v14, %v2213_v24 }
 0x315   : > { %4249 = vmatmul.msk.f32.gmra.mxu0 %vm225_vm1, %v5489_v33  ;;  %v1876_v11 = vpop.f32.mrf.mxu1  ;;  %v2489_v33 = vadd.f32 %v2421_v19, %v2211_v61  ;;  %v2801_v12 = vadd.f32 %v5566_v25, %v2765_v57  ;;  %v2158_v31 = vpop.f32.mrf.mxu2 }
 0x31a   : > { %v2696_v45 = vpop.f32.mrf.mxu0 }
 0x31b   : > { %v2766_v34 = vadd.f32 %v2696_v45, %v2488_v43  ;;  %v2439_v43 = vpop.f32.mrf.mxu3  ;;  %v1658_v45 = vadd.f32 %v5515_v6, %v5228_v55 }
 0x31d   : > { %4250 = vmatmul.msk.f32.gmra.mxu0 %vm225_vm1, %v5499_v9  ;;  %v2833_v9 = vmax.f32 %v2801_v12, 0.0  ;;  %v1879_v19 = vpop.f32.mrf.mxu1  ;;  %v2802_v60 = vadd.f32 %v5566_v25, %v2766_v34  ;;  %v2161_v0 = vpop.f32.mrf.mxu2  ;;  %v2492_v34 = vadd.f32 %v2430_v23, %v2214_v21  ;;  %v1936_v61 = vadd.f32 %v1876_v11, %v1658_v45  ;;  %v6269_v21 = vld [vmem:[#allocation9_spill] sm:$0xff] }
 0x31e   : > { %v1937_v12 = vadd.f32 %v1879_v19, %v1659_v5  ;;  %v1660_v11 = vadd.f32 %v5523_v49, %v5248_v63 }
 0x31f   : > { %v2834_v48 = vmax.f32 %v2802_v60, 0.0 }
 0x320   : > { %v2216_v55 = vadd.f32 %v2158_v31, %v1937_v12 }
 0x322   : > { %v2699_v30 = vpop.f32.mrf.mxu0 }
 0x323   : > { %v2767_v39 = vadd.f32 %v2699_v30, %v2489_v33  ;;  %v2215_v33 = vadd.f32 %v2155_v54, %v1936_v61  ;;  %v2442_v30 = vpop.f32.mrf.mxu3  ;;  %v2494_v54 = vadd.f32 %v2436_v10, %v2216_v55 }
 0x325   : > { %v2803_v15 = vadd.f32 %v5566_v25, %v2767_v39  ;;  %4251 = vmatmul.msk.f32.gmra.mxu0 %vm225_vm1, %v2537_v29  ;;  %v1882_v36 = vpop.f32.mrf.mxu1  ;;  %v2164_v50 = vpop.f32.mrf.mxu2  ;;  %v2493_v14 = vadd.f32 %v2433_v16, %v2215_v33 }
 0x327   : > { %v2835_v32 = vmax.f32 %v2803_v15, 0.0 }
 0x329   : > { %v5653_v40 = vmax.f32 %v2833_v9, %v2835_v32  ;;  %v1938_v32 = vadd.f32 %v1882_v36, %v1660_v11 }
 0x32a   : > { %v2702_v26 = vpop.f32.mrf.mxu0 }
 0x32b   : > { %v2768_v3 = vadd.f32 %v2702_v26, %v2490_v20  ;;  %v2445_v9 = vpop.f32.mrf.mxu3  ;;  %v2217_v20 = vadd.f32 %v2161_v0, %v1938_v32  ;;  %v6268_v0 = vld [vmem:[#allocation4_spill] sm:$0xff] }
 0x32d   : > { %v2804_v18 = vadd.f32 %v5566_v25, %v2768_v3  ;;  %4252 = vmatmul.msk.f32.gmra.mxu0 %vm225_vm1, %v2538_v22  ;;  %v1885_v13 = vpop.f32.mrf.mxu1  ;;  %v2167_v58 = vpop.f32.mrf.mxu2  ;;  %v1661_v22 = vadd.f32 %v5527_v51, %v5258_v2  ;;  %v2495_v60 = vadd.f32 %v2439_v43, %v2217_v20  ;;  %v1663_v43 = vadd.f32 %v6269_v21, %v6268_v0  ;;  %v6273_v20 = vld [vmem:[#allocation24_spill] sm:$0xff] }
 0x32f   : > { %v2836_v27 = vmax.f32 %v2804_v18, 0.0  ;;  %v1939_v18 = vadd.f32 %v1885_v13, %v1661_v22 }
 0x331   : > { %v5660_v53 = vmax.f32 %v2834_v48, %v2836_v27  ;;  %v2218_v24 = vadd.f32 %v2164_v50, %v1939_v18  ;;  %v6267_v48 = vld [vmem:[#allocation8_spill] sm:$0xff] }
 0x332   : > { %v2705_v46 = vpop.f32.mrf.mxu0  ;;  %v1662_v27 = vadd.f32 %v6267_v48, %v5268_v8 }
 0x333   : > { %v2769_v57 = vadd.f32 %v2705_v46, %v2491_v44  ;;  %v2448_v10 = vpop.f32.mrf.mxu3  ;;  %v2496_v37 = vadd.f32 %v2442_v30, %v2218_v24 }
 0x335   : > { %v2805_v17 = vadd.f32 %v5566_v25, %v2769_v57  ;;  %v1888_v42 = vpop.f32.mrf.mxu1  ;;  %v2170_v52 = vpop.f32.mrf.mxu2 }
 0x336   : > { %v1940_v36 = vadd.f32 %v1888_v42, %v1662_v27 }
 0x337   : > { %v2837_v6 = vmax.f32 %v2805_v17, 0.0 }
 0x338   : > { %v2219_v2 = vadd.f32 %v2167_v58, %v1940_v36 }
 0x33a   : > { %v2708_v7 = vpop.f32.mrf.mxu0  ;;  %v2497_v45 = vadd.f32 %v2445_v9, %v2219_v2 }
 0x33b   : > { %v2770_v4 = vadd.f32 %v2708_v7, %v2492_v34  ;;  %v2451_v51 = vpop.f32.mrf.mxu3 }
 0x33d   : > { %v2806_v16 = vadd.f32 %v5566_v25, %v2770_v4  ;;  %v1891_v49 = vpop.f32.mrf.mxu1  ;;  %v2173_v38 = vpop.f32.mrf.mxu2 }
 0x33e   : > { %v1941_v61 = vadd.f32 %v1891_v49, %v1663_v43 }
 0x33f   : > { %v2838_v19 = vmax.f32 %v2806_v16, 0.0  ;;  %v6270_v16 = vld [vmem:[#allocation5_spill] sm:$0xff] }
 0x340   : > { %v2220_v33 = vadd.f32 %v2170_v52, %v1941_v61 }
 0x342   : > { %v2711_v29 = vpop.f32.mrf.mxu0  ;;  %v2498_v30 = vadd.f32 %v2448_v10, %v2220_v33 }
 0x343   : > { %v2771_v28 = vadd.f32 %v2711_v29, %v2493_v14  ;;  %v2454_v17 = vpop.f32.mrf.mxu3 }
 0x345   : > { %v2807_v39 = vadd.f32 %v5566_v25, %v2771_v28  ;;  %v1894_v57 = vpop.f32.mrf.mxu1  ;;  %v2176_v14 = vpop.f32.mrf.mxu2 }
 0x347   : > { %v2839_v23 = vmax.f32 %v2807_v39, 0.0 }
 0x349   : > { %v5670_v15 = vmax.f32 %v2837_v6, %v2839_v23 }
 0x34a   : > { %v2714_v1 = vpop.f32.mrf.mxu0 }
 0x34b   : > { %v2772_v59 = vadd.f32 %v2714_v1, %v2494_v54  ;;  %v2457_v1 = vpop.f32.mrf.mxu3 }
 0x34d   : > { %v2808_v35 = vadd.f32 %v5566_v25, %v2772_v59  ;;  %v1897_v8 = vpop.f32.mrf.mxu1  ;;  %v2179_v54 = vpop.f32.mrf.mxu2  ;;  %v6271_v59 = vld [vmem:[#allocation16_spill] sm:$0xff] }
 0x34e   : > { %v1664_v9 = vadd.f32 %v6271_v59, %v6270_v16 }
 0x34f   : > { %v2840_v26 = vmax.f32 %v2808_v35, 0.0  ;;  %v6272_v35 = vld [vmem:[#allocation6_spill] sm:$0xff] }
 0x350   : > { %v1942_v32 = vadd.f32 %v1894_v57, %v1664_v9 }
 0x351   : > { %v5676_v63 = vmax.f32 %v2838_v19, %v2840_v26  ;;  %v1666_v19 = vadd.f32 %v6273_v20, %v6272_v35  ;;  %v6281_v35 = vld [vmem:[#allocation15_spill] sm:$0xff] }
 0x352   : > { %v2717_v3 = vpop.f32.mrf.mxu0 }
 0x353   : > { %v2773_v31 = vadd.f32 %v2717_v3, %v2495_v60  ;;  %v2221_v60 = vadd.f32 %v2173_v38, %v1942_v32  ;;  %v6274_v3 = vld [vmem:[#allocation11_spill] sm:$0xff]  ;;  %v2460_v24 = vpop.f32.mrf.mxu3  ;;  %v6280_v32 = vld [vmem:[#allocation12_spill] sm:$0xff] }
 0x354   : > { %v1670_v20 = vadd.f32 %v6281_v35, %v6280_v32 }
 0x355   : > { %v2809_v7 = vadd.f32 %v5566_v25, %v2773_v31  ;;  %v1900_v42 = vpop.f32.mrf.mxu1  ;;  %v2182_v49 = vpop.f32.mrf.mxu2  ;;  %v6275_v31 = vld [vmem:[#allocation18_spill] sm:$0xff]  ;;  %v2499_v10 = vadd.f32 %v2451_v51, %v2221_v60 }
 0x356   : > { %v1665_v52 = vadd.f32 %v6275_v31, %v6274_v3  ;;  %v1944_v18 = vadd.f32 %v1900_v42, %v1666_v19  ;;  %v6283_v3 = vld [vmem:[#allocation14_spill] sm:$0xff] }
 0x357   : > { %v2841_v50 = vmax.f32 %v2809_v7, 0.0 }
 0x358   : > { %v2223_v48 = vadd.f32 %v2179_v54, %v1944_v18 }
 0x35a   : > { %v2720_v44 = vpop.f32.mrf.mxu0  ;;  %v2501_v57 = vadd.f32 %v2457_v1, %v2223_v48  ;;  %v6279_v1 = vld [vmem:[#allocation30_spill] sm:$0xff] }
 0x35b   : > { %v2774_v46 = vadd.f32 %v2720_v44, %v2496_v37  ;;  %v1943_v37 = vadd.f32 %v1897_v8, %v1665_v52  ;;  %v6276_v44 = vld [vmem:[#allocation7_spill] sm:$0xff]  ;;  %v2463_v8 = vpop.f32.mrf.mxu3 }
 0x35d   : > { %v2810_v12 = vadd.f32 %v5566_v25, %v2774_v46  ;;  %v1903_v26 = vpop.f32.mrf.mxu1  ;;  %v6277_v46 = vld [vmem:[#allocation13_spill] sm:$0xff]  ;;  %v2222_v0 = vadd.f32 %v2176_v14, %v1943_v37  ;;  %v6285_v37 = vld [vmem:[#allocation20_spill] sm:$0xff] }
 0x35e   : > { %v1667_v36 = vadd.f32 %v6277_v46, %v6276_v44 }
 0x35f   : > { %v2842_v6 = vmax.f32 %v2810_v12, 0.0 }
 0x362   : > { %v2723_v34 = vpop.f32.mrf.mxu0 }
 0x363   : > { %v2775_v4 = vadd.f32 %v2723_v34, %v2497_v45  ;;  %v1945_v45 = vadd.f32 %v1903_v26, %v1667_v36  ;;  %v2500_v34 = vadd.f32 %v2454_v17, %v2222_v0  ;;  %v2466_v42 = vpop.f32.mrf.mxu3 }
 0x365   : > { %v2811_v13 = vadd.f32 %v5566_v25, %v2775_v4  ;;  %v1906_v38 = vpop.f32.mrf.mxu1  ;;  %v2185_v4 = vpop.f32.mrf.mxu2  ;;  %v2224_v51 = vadd.f32 %v2182_v49, %v1945_v45  ;;  %v6282_v49 = vld [vmem:[#allocation10_spill] sm:$0xff] }
 0x366   : > { %v1669_v31 = vadd.f32 %v6283_v3, %v6282_v49 }
 0x367   : > { %v2843_v5 = vmax.f32 %v2811_v13, 0.0 }
 0x369   : > { %v5684_v29 = vmax.f32 %v2841_v50, %v2843_v5  ;;  %v2502_v50 = vadd.f32 %v2460_v24, %v2224_v51 }
 0x36a   : > { %v2726_v28 = vpop.f32.mrf.mxu0 }
 0x36b   : > { %v2776_v39 = vadd.f32 %v2726_v28, %v2498_v30  ;;  %v2469_v60 = vpop.f32.mrf.mxu3 }
 0x36d   : > { %v2812_v55 = vadd.f32 %v5566_v25, %v2776_v39  ;;  %v1909_v39 = vpop.f32.mrf.mxu1  ;;  %v2188_v17 = vpop.f32.mrf.mxu2 }
 0x36e   : > { %v1947_v48 = vadd.f32 %v1909_v39, %v1669_v31 }
 0x36f   : > { %v2844_v23 = vmax.f32 %v2812_v55, 0.0 }
 0x371   : > { %v5688_v11 = vmax.f32 %v2842_v6, %v2844_v23 }
 0x372   : > { %v2729_v58 = vpop.f32.mrf.mxu0 }
 0x373   : > { %v2777_v27 = vadd.f32 %v2729_v58, %v2499_v10  ;;  %v6278_v58 = vld [vmem:[#allocation17_spill] sm:$0xff] }
 0x374   : > { %v1668_v16 = vadd.f32 %v6279_v1, %v6278_v58  ;;  %v4285_v1 = vld [vmem:[%s6062_s3 + $0x8] sm:$0xff] }
 0x375   : > { %v2813_v21 = vadd.f32 %v5566_v25, %v2777_v27  ;;  %v1912_v59 = vpop.f32.mrf.mxu1  ;;  %v2191_v19 = vpop.f32.mrf.mxu2  ;;  %v6284_v27 = vld [vmem:[#allocation21_spill] sm:$0xff]  ;;  %3123 = vmatpush.msrb.mxu3 %v4285_v1 }
 0x376   : > { %v1946_v9 = vadd.f32 %v1906_v38, %v1668_v16  ;;  %v1948_v52 = vadd.f32 %v1912_v59, %v1670_v20  ;;  %v1671_v44 = vadd.f32 %v6285_v37, %v6284_v27 }
 0x377   : > { %v2845_v61 = vmax.f32 %v2813_v21, 0.0 }
 0x378   : > { %v2227_v10 = vadd.f32 %v2191_v19, %v1948_v52  ;;  %v6292_v52 = vmov 0.0  }
 0x37a   : > { %v2732_v22 = vpop.f32.mrf.mxu0  ;;  %v2505_v46 = vadd.f32 %v2469_v60, %v2227_v10  ;;  %v3073_v10 = vld [vmem:[%s6062_s3] sm:$0xff] }
 0x37b   : > { %v2778_v13 = vadd.f32 %v2732_v22, %v2500_v34  ;;  %v2225_v22 = vadd.f32 %v2185_v4, %v1946_v9 }
 0x37d   : > { %v2814_v28 = vadd.f32 %v5566_v25, %v2778_v13  ;;  %v2503_v18 = vadd.f32 %v2463_v8, %v2225_v22  ;;  %v1915_v36 = vpop.f32.mrf.mxu1 }
 0x37e   : > { %v1949_v38 = vadd.f32 %v1915_v36, %v1671_v44 }
 0x37f   : > { %v2846_v55 = vmax.f32 %v2814_v28, 0.0 }
 0x382   : > { %v2735_v2 = vpop.f32.mrf.mxu0 }
 0x383   : > { %v2779_v43 = vadd.f32 %v2735_v2, %v2501_v57  ;;  %v2226_v2 = vadd.f32 %v2188_v17, %v1947_v48 }
 0x385   : > { %v2815_v7 = vadd.f32 %v5566_v25, %v2779_v43  ;;  %v2194_v43 = vpop.f32.mrf.mxu2  ;;  %v2504_v45 = vadd.f32 %v2466_v42, %v2226_v2 }
 0x386   : > { %v2228_v4 = vadd.f32 %v2194_v43, %v1949_v38 }
 0x387   : > { %v2847_v33 = vmax.f32 %v2815_v7, 0.0  ;;  %v2472_v7 = vpop.f32.mrf.mxu3 }
 0x389   : > { %v2865_v5 = vmax.f32 %v2845_v61, %v2847_v33  ;;  %v2506_v33 = vadd.f32 %v2472_v7, %v2228_v4 }
 0x38a   : > { %v2738_v30 = vpop.f32.mrf.mxu0 }
 0x38b   : > { %v2780_v14 = vadd.f32 %v2738_v30, %v2502_v50 }
 0x38d   : > { %v2816_v12 = vadd.f32 %v5566_v25, %v2780_v14 }
 0x38f   : > { %v2848_v6 = vmax.f32 %v2816_v12, 0.0 }
 0x391   : > { %v2866_v23 = vmax.f32 %v2846_v55, %v2848_v6 }
 0x392   : > { %v2741_v54 = vpop.f32.mrf.mxu0 }
 0x393   : > { %v2781_v24 = vadd.f32 %v2741_v54, %v2503_v18  ;;  %v4302_v18 = vld [vmem:[%s6062_s3 + $0x10] sm:$0xff] }
 0x395   : > { %v2817_v0 = vadd.f32 %v5566_v25, %v2781_v24 }
 0x397   : > { %v2849_v51 = vmax.f32 %v2817_v0, 0.0 }
 0x39a   : > { %v2744_v26 = vpop.f32.mrf.mxu0 }
 0x39b   : > { %v2782_v61 = vadd.f32 %v2744_v26, %v2504_v45 }
 0x39d   : > { %v2818_v30 = vadd.f32 %v5566_v25, %v2782_v61 }
 0x39f   : > { %v2850_v12 = vmax.f32 %v2818_v30, 0.0 }
 0x3a2   : > { %v2747_v57 = vpop.f32.mrf.mxu0 }
 0x3a3   : > { %v2783_v21 = vadd.f32 %v2747_v57, %v2505_v46 }
 0x3a5   : > { %v2819_v34 = vadd.f32 %v5566_v25, %v2783_v21 }
 0x3a7   : > { %v2851_v13 = vmax.f32 %v2819_v34, 0.0 }
 0x3a9   : > { %v2867_v8 = vmax.f32 %v2849_v51, %v2851_v13 }
 0x3aa   : > { %v2750_v50 = vpop.f32.mrf.mxu0 }
 0x3ab   : > { %v2784_v28 = vadd.f32 %v2750_v50, %v2506_v33 }
 0x3ad   : > { %v2820_v14 = vadd.f32 %v5566_v25, %v2784_v28  ;;  %v2869_v25 = vlaneseq }
 0x3af   : > { %v2852_v39 = vmax.f32 %v2820_v14, 0.0  ;;  %v4311_v14 = vld [vmem:[%s6062_s3 + $0x18] sm:$0xff] }
 0x3b0   : > { %3346 = vmatpush.msra.mxu3 %v4311_v14 }
 0x3b1   : > { %v2868_v55 = vmax.f32 %v2850_v12, %v2852_v39 }
 0x3b3   : > { %2944 = vmatpush.msra.mxu1 %v2868_v55  ;;  %2985 = vmatpush.msra.mxu2 %v2868_v55 }
 0x3b5   : > { %2945 = vmatpush.msra.mxu1 %v2867_v8  ;;  %2986 = vmatpush.msra.mxu2 %v2867_v8 }
 0x3b7   : > { %2946 = vmatpush.msra.mxu1 %v2866_v23  ;;  %2987 = vmatpush.msra.mxu2 %v2866_v23 }
 0x3b9   : > { %2947 = vmatpush.msra.mxu1 %v2865_v5  ;;  %2988 = vmatpush.msra.mxu2 %v2865_v5  ;;  %v2870_v5 = vshrl.u32 %v2869_v25, 7 }
 0x3bb   : > { %2948 = vmatpush.msra.mxu1 %v5688_v11  ;;  %2989 = vmatpush.msra.mxu2 %v5688_v11  ;;  %v4397_v11 = vmov 1.0   ;;  %v2872_v6 = vadd.s32 16, %v2870_v5  ;;  %v2873_v54 = vadd.s32 24, %v2870_v5  ;;  %v2874_v59 = vadd.s32 32, %v2870_v5 }
 0x3bc   : > { %v2875_v35 = vadd.s32 40, %v2870_v5  ;;  %v2876_v26 = vadd.s32 48, %v2870_v5  ;;  %v2877_v49 = vadd.s32 56, %v2870_v5 }
 0x3bd   : > { %2949 = vmatpush.msra.mxu1 %v5684_v29  ;;  %2990 = vmatpush.msra.mxu2 %v5684_v29  ;;  %v2880_v29 = vmul.u32 2, %v2870_v5  ;;  %v2882_v23 = vmul.u32 2, %v2872_v6  ;;  %v2883_v58 = vmul.u32 2, %v2873_v54  ;;  %v2884_v9 = vmul.u32 2, %v2874_v59 }
 0x3be   : > { %v2885_v20 = vmul.u32 2, %v2875_v35  ;;  %v2886_v22 = vmul.u32 2, %v2876_v26  ;;  %v2887_v3 = vmul.u32 2, %v2877_v49  ;;  %v4347_v49 = vld [vmem:[%s6062_s3 + $0x38] sm:$0xff] }
 0x3bf   : > { %2950 = vmatpush.msra.mxu1 %v5676_v63  ;;  %2991 = vmatpush.msra.mxu2 %v5676_v63  ;;  %v2871_v63 = vadd.s32 8, %v2870_v5  ;;  %v2914_v42 = vadd.s32 1, %v2882_v23  ;;  %v2915_v16 = vadd.s32 1, %v2883_v58  ;;  %v2916_v32 = vadd.s32 1, %v2884_v9 }
 0x3c0   : > { %v2917_v19 = vadd.s32 1, %v2885_v20  ;;  %v2918_v60 = vadd.s32 1, %v2886_v22  ;;  %v2919_v31 = vadd.s32 1, %v2887_v3 }
 0x3c1   : > { %2951 = vmatpush.msra.mxu1 %v5670_v15  ;;  %2992 = vmatpush.msra.mxu2 %v5670_v15  ;;  %v5732_v15 = vand.u32 127, %v2869_v25 }
 0x3c3   : > { %2952 = vmatpush.msra.mxu1 %v5660_v53  ;;  %2993 = vmatpush.msra.mxu2 %v5660_v53  ;;  %v5734_v53 = vadd.s32 1, %v2880_v29  ;;  %vm5743_vm4 = vcmp.eq.s32.totalorder %v5732_v15, %v2880_v29  ;;  %vm2922_vm7 = vcmp.eq.s32.totalorder %v5732_v15, %v2914_v42  ;;  %vm2890_vm8 = vcmp.eq.s32.totalorder %v5732_v15, %v2882_v23  ;;  %v4329_v29 = vld [vmem:[%s6062_s3 + $0x28] sm:$0xff] }
 0x3c4   : > { %vm2923_vm9 = vcmp.eq.s32.totalorder %v5732_v15, %v2915_v16  ;;  %vm2891_vm10 = vcmp.eq.s32.totalorder %v5732_v15, %v2883_v58  ;;  %vm2924_vm11 = vcmp.eq.s32.totalorder %v5732_v15, %v2916_v32  ;;  %vm2892_vm12 = vcmp.eq.s32.totalorder %v5732_v15, %v2884_v9 }
 0x3c5   : > { %2953 = vmatpush.msra.mxu1 %v5653_v40  ;;  %2994 = vmatpush.msra.mxu2 %v5653_v40  ;;  %v6286_v40 = vld [vmem:[#allocation28_spill] sm:$0xff]  ;;  %vm2920_vm3 = vcmp.eq.s32.totalorder %v5732_v15, %v5734_v53  ;;  %vm2925_vm13 = vcmp.eq.s32.totalorder %v5732_v15, %v2917_v19  ;;  %vm2893_vm14 = vcmp.eq.s32.totalorder %v5732_v15, %v2885_v20 }
 0x3c6   : > { %vm2926_vm15 = vcmp.eq.s32.totalorder %v5732_v15, %v2918_v60  ;;  %vm2894_vm0 = vcmp.eq.s32.totalorder %v5732_v15, %v2886_v22  ;;  %vm2927_vm1 = vcmp.eq.s32.totalorder %v5732_v15, %v2919_v31  ;;  %vm2895_vm2 = vcmp.eq.s32.totalorder %v5732_v15, %v2887_v3  ;;  %v4338_v22 = vld [vmem:[%s6062_s3 + $0x30] sm:$0xff]  ;;  %v4356_v60 = vld [vmem:[%s6062_s3 + $0x40] sm:$0xff] }
 0x3c7   : > { %2954 = vmatpush.msra.mxu1 %v5638_v47  ;;  %2995 = vmatpush.msra.mxu2 %v5638_v47  ;;  %v6289_v47 = vld [vmem:[#allocation22_spill] sm:$0xff] }
 0x3c9   : > { %2955 = vmatpush.msra.mxu1 %v5627_v62  ;;  %2996 = vmatpush.msra.mxu2 %v5627_v62 }
 0x3cb   : > { %2956 = vmatpush.msra.mxu1 %v5612_v56  ;;  %2997 = vmatpush.msra.mxu2 %v5612_v56  ;;  %v2881_v56 = vmul.u32 2, %v2871_v63  ;;  %v4320_v63 = vld [vmem:[%s6062_s3 + $0x20] sm:$0xff] }
 0x3cd   : > { %2957 = vmatpush.msra.mxu1 %v5603_v41  ;;  %2998 = vmatpush.msra.mxu2 %v5603_v41  ;;  %v5754_v41 = vadd.s32 1, %v2881_v56  ;;  %vm5759_vm6 = vcmp.eq.s32.totalorder %v5732_v15, %v2881_v56 }
 0x3cf   : > { %2958 = vmatpush.msra.mxu1 %v6286_v40  ;;  %2999 = vmatpush.msra.mxu2 %v6286_v40  ;;  %vm2921_vm5 = vcmp.eq.s32.totalorder %v5732_v15, %v5754_v41 }
 0x3d0   : > { %v4262_v62 = vsel %vm2921_vm5, 1.0, %v6292_v52 }
 0x3d1   : > { %2959 = vmatpush.msra.mxu1 %v6289_v47  ;;  %3000 = vmatpush.msra.mxu2 %v6289_v47 }
 0x3d2   : > { %4277 = vmatmul.msk.f32.vlgmr.msra.gmra.mxu2 %vm2920_vm3, %v4397_v11  ;;  %4269 = vmatmul.msk.f32.vlgmr.msra.gmra.mxu1 %vm5743_vm4, %v4397_v11 }
 0x3d3   : > { %3263 = vmatpush.msrb.mxu2 %v4302_v18  ;;  %3188 = vmatpush.msrb.mxu1 %v3073_v10 }
 0x3d5   : > { %3512 = vmatpush.msra.mxu2 %v4329_v29  ;;  %3429 = vmatpush.msra.mxu1 %v4320_v63 }
 0x3da   : > { %4278 = vmatmul.msk.f32.gmra.mxu2 %vm2921_vm5, %v4397_v11  ;;  %4270 = vmatmul.msk.f32.gmra.mxu1 %vm5759_vm6, %v4397_v11 }
 0x3e2   : > { %4279 = vmatmul.msk.f32.gmra.mxu2 %vm2922_vm7, %v4397_v11  ;;  %4271 = vmatmul.msk.f32.gmra.mxu1 %vm2890_vm8, %v4397_v11  ;;  %vm3034_vm7 = vcmask 64512   ;;  %vm3036_vm8 = vcmask 58368  }
 0x3e3   : > { %3038 = vst.msk [vmem:[#allocation3 + $0x10] sm:$0xff] %vm3034_vm7, %v6292_v52 }
 0x3e4   : > { %3039 = vst.msk [vmem:[#allocation3 + $0x18] sm:$0x3] %vm3036_vm8, %v6292_v52 }
 0x3e5   : > { %3035 = vst.msk [vmem:[#allocation3] sm:$0xff] %vm3034_vm7, %v6292_v52 }
 0x3e6   : > { %3037 = vst.msk [vmem:[#allocation3 + $0x8] sm:$0x3] %vm3036_vm8, %v6292_v52 }
 0x3e7   : > { %3040 = vst.msk [vmem:[#allocation3 + $0x20] sm:$0xff] %vm3034_vm7, %v6292_v52 }
 0x3e8   : > { %3041 = vst.msk [vmem:[#allocation3 + $0x28] sm:$0x3] %vm3036_vm8, %v6292_v52 }
 0x3e9   : > { %3042 = vst.msk [vmem:[#allocation3 + $0x30] sm:$0xff] %vm3034_vm7, %v6292_v52 }
 0x3ea   : > { %4280 = vmatmul.msk.f32.gmra.mxu2 %vm2923_vm9, %v4397_v11  ;;  %4272 = vmatmul.msk.f32.gmra.mxu1 %vm2891_vm10, %v4397_v11  ;;  %3043 = vst.msk [vmem:[#allocation3 + $0x38] sm:$0x3] %vm3036_vm8, %v6292_v52  ;;  %vm3820_vm9 = vcmask 261120  }
 0x3eb   : > { %3044 = vst.msk [vmem:[#allocation3 + $0x40] sm:$0xff] %vm3034_vm7, %v6292_v52 }
 0x3ec   : > { %3045 = vst.msk [vmem:[#allocation3 + $0x48] sm:$0x3] %vm3036_vm8, %v6292_v52  ;;  %v3065_v24 = vld [vmem:[#allocation3] sm:$0xff] }
 0x3ed   : > { %3046 = vst.msk [vmem:[#allocation3 + $0x50] sm:$0xff] %vm3034_vm7, %v6292_v52  ;;  %v3074_v48 = vld [vmem:[#allocation3 + $0x1] sm:$0xff] }
 0x3ee   : > { %v3214_v27 = vld [vmem:[#allocation3 + $0x2] sm:$0xff]  ;;  %3047 = vst.msk [vmem:[#allocation3 + $0x58] sm:$0x3] %vm3036_vm8, %v6292_v52  ;;  %4286 = vmatmul.msk.f32.vlgmr.msrb.gmra.mxu3 %vm3034_vm7, %v3074_v48 }
 0x3ef   : > { %3048 = vst.msk [vmem:[#allocation3 + $0x60] sm:$0xff] %vm3034_vm7, %v6292_v52  ;;  %3596 = vmatpush.msrb.mxu3 %v4338_v22 }
 0x3f0   : > { %3049 = vst.msk [vmem:[#allocation3 + $0x68] sm:$0x3] %vm3036_vm8, %v6292_v52 }
 0x3f1   : > { %3050 = vst.msk [vmem:[#allocation3 + $0x70] sm:$0xff] %vm3034_vm7, %v6292_v52 }
 0x3f2   : > { %4281 = vmatmul.msk.f32.gmra.mxu2 %vm2924_vm11, %v4397_v11  ;;  %4273 = vmatmul.msk.f32.gmra.mxu1 %vm2892_vm12, %v4397_v11  ;;  %3051 = vst.msk [vmem:[#allocation3 + $0x78] sm:$0x3] %vm3036_vm8, %v6292_v52 }
 0x3f3   : > { %3052 = vst.msk [vmem:[#allocation3 + $0x80] sm:$0xff] %vm3034_vm7, %v6292_v52 }
 0x3f4   : > { %3053 = vst.msk [vmem:[#allocation3 + $0x88] sm:$0x3] %vm3036_vm8, %v6292_v52 }
 0x3f5   : > { %3054 = vst.msk [vmem:[#allocation3 + $0x90] sm:$0xff] %vm3034_vm7, %v6292_v52 }
 0x3f6   : > { %3055 = vst.msk [vmem:[#allocation3 + $0x98] sm:$0x3] %vm3036_vm8, %v6292_v52 }
 0x3fa   : > { %4282 = vmatmul.msk.f32.gmra.mxu2 %vm2925_vm13, %v4397_v11  ;;  %4274 = vmatmul.msk.f32.gmra.mxu1 %vm2893_vm14, %v4397_v11 }
 0x402   : > { %4283 = vmatmul.msk.f32.gmra.mxu2 %vm2926_vm15, %v4397_v11  ;;  %4275 = vmatmul.msk.f32.gmra.mxu1 %vm2894_vm0, %v4397_v11 }
 0x40a   : > { %4284 = vmatmul.msk.f32.gmra.mxu2 %vm2927_vm1, %v4397_v11  ;;  %4276 = vmatmul.msk.f32.gmra.mxu1 %vm2895_vm2, %v4397_v11 }
 0x412   : > { %4294 = vmatmul.msk.f32.vlgmr.msrb.gmra.mxu1 %vm3034_vm7, %v3065_v24  ;;  %4303 = vmatmul.msk.f32.vlgmr.msrb.gmra.mxu2 %vm3034_vm7, %v3214_v27 }
 0x413   : > { %3762 = vmatpush.msrb.mxu2 %v4356_v60  ;;  %3679 = vmatpush.msrb.mxu1 %v4347_v49 }
 0x44f   : > { %v2961_v37 = vpop.f32.mrf.mxu1 }
 0x455   : > { %v3002_v44 = vpop.f32.mrf.mxu2 }
 0x456   : > { %v3026_v46 = vmax.f32 %v2961_v37, %v3002_v44 }
 0x457   : > { %v2964_v36 = vpop.f32.mrf.mxu1 }
 0x458   : > { %3057 = vst.msk [vmem:[#allocation3 + $0x11] sm:$0xff] %vm3034_vm7, %v3026_v46 }
 0x45d   : > { %v3005_v57 = vpop.f32.mrf.mxu2 }
 0x45e   : > { %v3027_v2 = vmax.f32 %v2964_v36, %v3005_v57 }
 0x45f   : > { %v5833_v0 = vld [vmem:[#allocation3 + $0x11] sm:$0xff]  ;;  %v2967_v43 = vpop.f32.mrf.mxu1 }
 0x460   : > { %v5835_v21 = vld [vmem:[#allocation3 + $0x12] sm:$0xff]  ;;  %3058 = vst.msk [vmem:[#allocation3 + $0x21] sm:$0xff] %vm3034_vm7, %v3027_v2  ;;  %4287 = vmatmul.msk.f32.gmra.mxu3 %vm3034_vm7, %v5833_v0 }
 0x461   : > { %v5837_v38 = vld [vmem:[#allocation3 + $0x10] sm:$0xff]  ;;  %4304 = vmatmul.msk.f32.gmra.mxu2 %vm3034_vm7, %v5835_v21 }
 0x462   : > { %4295 = vmatmul.msk.f32.gmra.mxu1 %vm3034_vm7, %v5837_v38 }
 0x465   : > { %v3008_v45 = vpop.f32.mrf.mxu2 }
 0x466   : > { %v3028_v34 = vmax.f32 %v2967_v43, %v3008_v45 }
 0x467   : > { %v5846_v7 = vld [vmem:[#allocation3 + $0x21] sm:$0xff]  ;;  %v2970_v51 = vpop.f32.mrf.mxu1 }
 0x468   : > { %v5848_v4 = vld [vmem:[#allocation3 + $0x22] sm:$0xff]  ;;  %3059 = vst.msk [vmem:[#allocation3 + $0x31] sm:$0xff] %vm3034_vm7, %v3028_v34  ;;  %4288 = vmatmul.msk.f32.gmra.mxu3 %vm3034_vm7, %v5846_v7 }
 0x469   : > { %v5850_v61 = vld [vmem:[#allocation3 + $0x20] sm:$0xff]  ;;  %4305 = vmatmul.msk.f32.gmra.mxu2 %vm3034_vm7, %v5848_v4 }
 0x46a   : > { %4296 = vmatmul.msk.f32.gmra.mxu1 %vm3034_vm7, %v5850_v61 }
 0x46d   : > { %v3011_v13 = vpop.f32.mrf.mxu2 }
 0x46e   : > { %v3029_v33 = vmax.f32 %v2970_v51, %v3011_v13 }
 0x46f   : > { %v5859_v8 = vld [vmem:[#allocation3 + $0x31] sm:$0xff]  ;;  %v2973_v30 = vpop.f32.mrf.mxu1 }
 0x470   : > { %v5861_v50 = vld [vmem:[#allocation3 + $0x32] sm:$0xff]  ;;  %3060 = vst.msk [vmem:[#allocation3 + $0x41] sm:$0xff] %vm3034_vm7, %v3029_v33  ;;  %4289 = vmatmul.msk.f32.gmra.mxu3 %vm3034_vm7, %v5859_v8 }
 0x471   : > { %v5863_v28 = vld [vmem:[#allocation3 + $0x30] sm:$0xff]  ;;  %4306 = vmatmul.msk.f32.gmra.mxu2 %vm3034_vm7, %v5861_v50  ;;  %v3125_v3 = vpop.f32.mrf.mxu3 }
 0x472   : > { %4297 = vmatmul.msk.f32.gmra.mxu1 %vm3034_vm7, %v5863_v28 }
 0x475   : > { %v3014_v12 = vpop.f32.mrf.mxu2 }
 0x476   : > { %v3030_v39 = vmax.f32 %v2973_v30, %v3014_v12 }
 0x477   : > { %v5875_v55 = vld [vmem:[#allocation3 + $0x41] sm:$0xff]  ;;  %v2976_v40 = vpop.f32.mrf.mxu1 }
 0x478   : > { %v5877_v25 = vld [vmem:[#allocation3 + $0x42] sm:$0xff]  ;;  %3061 = vst.msk [vmem:[#allocation3 + $0x51] sm:$0xff] %vm3034_vm7, %v3030_v39  ;;  %4290 = vmatmul.msk.f32.gmra.mxu3 %vm3034_vm7, %v5875_v55 }
 0x479   : > { %v5879_v5 = vld [vmem:[#allocation3 + $0x40] sm:$0xff]  ;;  %4307 = vmatmul.msk.f32.gmra.mxu2 %vm3034_vm7, %v5877_v25 }
 0x47a   : > { %4298 = vmatmul.msk.f32.gmra.mxu1 %vm3034_vm7, %v5879_v5 }
 0x47d   : > { %v3017_v56 = vpop.f32.mrf.mxu2 }
 0x47e   : > { %v3031_v47 = vmax.f32 %v2976_v40, %v3017_v56  ;;  %v3554_v40 = vld [vmem:[#allocation3 + $0x90] sm:$0xff] }
 0x47f   : > { %v5894_v11 = vld [vmem:[#allocation3 + $0x51] sm:$0xff]  ;;  %v2979_v42 = vpop.f32.mrf.mxu1 }
 0x480   : > { %v5896_v6 = vld [vmem:[#allocation3 + $0x52] sm:$0xff]  ;;  %3062 = vst.msk [vmem:[#allocation3 + $0x61] sm:$0xff] %vm3034_vm7, %v3031_v47  ;;  %4291 = vmatmul.msk.f32.gmra.mxu3 %vm3034_vm7, %v5894_v11 }
 0x481   : > { %v5898_v23 = vld [vmem:[#allocation3 + $0x50] sm:$0xff]  ;;  %4308 = vmatmul.msk.f32.gmra.mxu2 %vm3034_vm7, %v5896_v6 }
 0x482   : > { %4299 = vmatmul.msk.f32.gmra.mxu1 %vm3034_vm7, %v5898_v23  ;;  %v3720_v56 = vld [vmem:[#allocation3 + $0x92] sm:$0xff] }
 0x485   : > { %v3020_v54 = vpop.f32.mrf.mxu2 }
 0x486   : > { %v3032_v58 = vmax.f32 %v2979_v42, %v3020_v54 }
 0x487   : > { %v5907_v1 = vld [vmem:[#allocation3 + $0x61] sm:$0xff]  ;;  %v2982_v20 = vpop.f32.mrf.mxu1 }
 0x488   : > { %v5909_v16 = vld [vmem:[#allocation3 + $0x62] sm:$0xff]  ;;  %3063 = vst.msk [vmem:[#allocation3 + $0x71] sm:$0xff] %vm3034_vm7, %v3032_v58  ;;  %4292 = vmatmul.msk.f32.gmra.mxu3 %vm3034_vm7, %v5907_v1 }
 0x489   : > { %v5911_v59 = vld [vmem:[#allocation3 + $0x60] sm:$0xff]  ;;  %4309 = vmatmul.msk.f32.gmra.mxu2 %vm3034_vm7, %v5909_v16 }
 0x48a   : > { %4300 = vmatmul.msk.f32.gmra.mxu1 %vm3034_vm7, %v5911_v59 }
 0x48d   : > { %v3023_v19 = vpop.f32.mrf.mxu2 }
 0x48e   : > { %v3033_v26 = vmax.f32 %v2982_v20, %v3023_v19 }
 0x48f   : > { %v5920_v9 = vld [vmem:[#allocation3 + $0x71] sm:$0xff]  ;;  %v3190_v31 = vpop.f32.mrf.mxu1 }
 0x490   : > { %v5922_v32 = vld [vmem:[#allocation3 + $0x72] sm:$0xff]  ;;  %4293 = vmatmul.msk.f32.gmra.mxu3 %vm3034_vm7, %v5920_v9  ;;  %3064 = vst.msk [vmem:[#allocation3 + $0x81] sm:$0xff] %vm3034_vm7, %v3033_v26  ;;  %v3191_v18 = vadd.f32 %v3190_v31, %v3125_v3 }
 0x491   : > { %v5924_v35 = vld [vmem:[#allocation3 + $0x70] sm:$0xff]  ;;  %4310 = vmatmul.msk.f32.gmra.mxu2 %vm3034_vm7, %v5922_v32 }
 0x492   : > { %4301 = vmatmul.msk.f32.gmra.mxu1 %vm3034_vm7, %v5924_v35 }
 0x495   : > { %v3265_v10 = vpop.f32.mrf.mxu2 }
 0x496   : > { %v5978_v24 = vadd.f32 %v3265_v10, %v3191_v18 }
 0x497   : > { %v3304_v48 = vld [vmem:[#allocation3 + $0x80] sm:$0xff] }
 0x498   : > { %4312 = vmatmul.msk.f32.vlgmr.msra.gmra.mxu3 %vm3034_vm7, %v5837_v38  ;;  %v3470_v27 = vld [vmem:[#allocation3 + $0x82] sm:$0xff] }
 0x499   : > { %4330 = vmatmul.msk.f32.vlgmr.msra.gmra.mxu2 %vm3034_vm7, %v5835_v21  ;;  %v3387_v37 = vld [vmem:[#allocation3 + $0x81] sm:$0xff] }
 0x49a   : > { %4321 = vmatmul.msk.f32.vlgmr.msra.gmra.mxu1 %vm3034_vm7, %v5833_v0 }
 0x4a0   : > { %4313 = vmatmul.msk.f32.gmra.mxu3 %vm3034_vm7, %v5850_v61 }
 0x4a1   : > { %4331 = vmatmul.msk.f32.gmra.mxu2 %vm3034_vm7, %v5848_v4 }
 0x4a2   : > { %4322 = vmatmul.msk.f32.gmra.mxu1 %vm3034_vm7, %v5846_v7 }
 0x4a8   : > { %4314 = vmatmul.msk.f32.gmra.mxu3 %vm3034_vm7, %v5863_v28 }
 0x4a9   : > { %4332 = vmatmul.msk.f32.gmra.mxu2 %vm3034_vm7, %v5861_v50 }
 0x4aa   : > { %4323 = vmatmul.msk.f32.gmra.mxu1 %vm3034_vm7, %v5859_v8 }
 0x4b0   : > { %4315 = vmatmul.msk.f32.gmra.mxu3 %vm3034_vm7, %v5879_v5 }
 0x4b1   : > { %4333 = vmatmul.msk.f32.gmra.mxu2 %vm3034_vm7, %v5877_v25 }
 0x4b2   : > { %4324 = vmatmul.msk.f32.gmra.mxu1 %vm3034_vm7, %v5875_v55 }
 0x4b8   : > { %4316 = vmatmul.msk.f32.gmra.mxu3 %vm3034_vm7, %v5898_v23 }
 0x4b9   : > { %4334 = vmatmul.msk.f32.gmra.mxu2 %vm3034_vm7, %v5896_v6 }
 0x4ba   : > { %4325 = vmatmul.msk.f32.gmra.mxu1 %vm3034_vm7, %v5894_v11 }
 0x4c0   : > { %4317 = vmatmul.msk.f32.gmra.mxu3 %vm3034_vm7, %v5911_v59 }
 0x4c1   : > { %4335 = vmatmul.msk.f32.gmra.mxu2 %vm3034_vm7, %v5909_v16 }
 0x4c2   : > { %4326 = vmatmul.msk.f32.gmra.mxu1 %vm3034_vm7, %v5907_v1 }
 0x4c8   : > { %4318 = vmatmul.msk.f32.gmra.mxu3 %vm3034_vm7, %v5924_v35 }
 0x4c9   : > { %4336 = vmatmul.msk.f32.gmra.mxu2 %vm3034_vm7, %v5922_v32 }
 0x4ca   : > { %4327 = vmatmul.msk.f32.gmra.mxu1 %vm3034_vm7, %v5920_v9 }
 0x4d0   : > { %4319 = vmatmul.msk.f32.gmra.mxu3 %vm3034_vm7, %v3304_v48 }
 0x4d1   : > { %4337 = vmatmul.msk.f32.gmra.mxu2 %vm3034_vm7, %v3470_v27 }
 0x4d2   : > { %4328 = vmatmul.msk.f32.gmra.mxu1 %vm3034_vm7, %v3387_v37 }
 0x4d8   : > { %4339 = vmatmul.msk.f32.vlgmr.msrb.gmra.mxu3 %vm3034_vm7, %v5850_v61 }
 0x4d9   : > { %4357 = vmatmul.msk.f32.vlgmr.msrb.gmra.mxu2 %vm3034_vm7, %v5848_v4 }
 0x4da   : > { %4348 = vmatmul.msk.f32.vlgmr.msrb.gmra.mxu1 %vm3034_vm7, %v5846_v7 }
 0x4df   : > { %v3193_v44 = vpop.f32.mrf.mxu1 }
 0x4e0   : > { %4340 = vmatmul.msk.f32.gmra.mxu3 %vm3034_vm7, %v5863_v28 }
 0x4e1   : > { %4358 = vmatmul.msk.f32.gmra.mxu2 %vm3034_vm7, %v5861_v50 }
 0x4e2   : > { %4349 = vmatmul.msk.f32.gmra.mxu1 %vm3034_vm7, %v5859_v8 }
 0x4e3   : > { %v3128_v46 = vpop.f32.mrf.mxu3 }
 0x4e4   : > { %v3268_v36 = vpop.f32.mrf.mxu2  ;;  %v3194_v57 = vadd.f32 %v3193_v44, %v3128_v46 }
 0x4e6   : > { %v3290_v2 = vadd.f32 %v3268_v36, %v3194_v57 }
 0x4e7   : > { %v3196_v0 = vpop.f32.mrf.mxu1 }
 0x4e8   : > { %4341 = vmatmul.msk.f32.gmra.mxu3 %vm3034_vm7, %v5879_v5 }
 0x4e9   : > { %4359 = vmatmul.msk.f32.gmra.mxu2 %vm3034_vm7, %v5877_v25 }
 0x4ea   : > { %4350 = vmatmul.msk.f32.gmra.mxu1 %vm3034_vm7, %v5875_v55 }
 0x4eb   : > { %v3131_v21 = vpop.f32.mrf.mxu3 }
 0x4ec   : > { %v3271_v43 = vpop.f32.mrf.mxu2  ;;  %v3197_v38 = vadd.f32 %v3196_v0, %v3131_v21 }
 0x4ee   : > { %v3291_v45 = vadd.f32 %v3271_v43, %v3197_v38 }
 0x4ef   : > { %v3199_v34 = vpop.f32.mrf.mxu1 }
 0x4f0   : > { %4342 = vmatmul.msk.f32.gmra.mxu3 %vm3034_vm7, %v5898_v23 }
 0x4f1   : > { %4360 = vmatmul.msk.f32.gmra.mxu2 %vm3034_vm7, %v5896_v6  ;;  %v3637_v6 = vld [vmem:[#allocation3 + $0x91] sm:$0xff] }
 0x4f2   : > { %4351 = vmatmul.msk.f32.gmra.mxu1 %vm3034_vm7, %v5894_v11 }
 0x4f3   : > { %v3134_v7 = vpop.f32.mrf.mxu3 }
 0x4f4   : > { %v3274_v4 = vpop.f32.mrf.mxu2  ;;  %v3200_v51 = vadd.f32 %v3199_v34, %v3134_v7 }
 0x4f6   : > { %v3292_v61 = vadd.f32 %v3274_v4, %v3200_v51 }
 0x4f7   : > { %v3202_v13 = vpop.f32.mrf.mxu1 }
 0x4f8   : > { %4343 = vmatmul.msk.f32.gmra.mxu3 %vm3034_vm7, %v5911_v59 }
 0x4f9   : > { %4361 = vmatmul.msk.f32.gmra.mxu2 %vm3034_vm7, %v5909_v16 }
 0x4fa   : > { %4352 = vmatmul.msk.f32.gmra.mxu1 %vm3034_vm7, %v5907_v1 }
 0x4fb   : > { %v3137_v33 = vpop.f32.mrf.mxu3 }
 0x4fc   : > { %v3277_v8 = vpop.f32.mrf.mxu2  ;;  %v3203_v50 = vadd.f32 %v3202_v13, %v3137_v33 }
 0x4fe   : > { %v3293_v30 = vadd.f32 %v3277_v8, %v3203_v50 }
 0x4ff   : > { %v3205_v28 = vpop.f32.mrf.mxu1 }
 0x500   : > { %4344 = vmatmul.msk.f32.gmra.mxu3 %vm3034_vm7, %v5924_v35 }
 0x501   : > { %4362 = vmatmul.msk.f32.gmra.mxu2 %vm3034_vm7, %v5922_v32 }
 0x502   : > { %4353 = vmatmul.msk.f32.gmra.mxu1 %vm3034_vm7, %v5920_v9 }
 0x503   : > { %v3140_v14 = vpop.f32.mrf.mxu3 }
 0x504   : > { %v3280_v12 = vpop.f32.mrf.mxu2  ;;  %v3206_v39 = vadd.f32 %v3205_v28, %v3140_v14 }
 0x506   : > { %v3294_v55 = vadd.f32 %v3280_v12, %v3206_v39 }
 0x507   : > { %v3208_v25 = vpop.f32.mrf.mxu1 }
 0x508   : > { %4345 = vmatmul.msk.f32.gmra.mxu3 %vm3034_vm7, %v3304_v48 }
 0x509   : > { %4363 = vmatmul.msk.f32.gmra.mxu2 %vm3034_vm7, %v3470_v27 }
 0x50a   : > { %4354 = vmatmul.msk.f32.gmra.mxu1 %vm3034_vm7, %v3387_v37 }
 0x50b   : > { %v3143_v5 = vpop.f32.mrf.mxu3 }
 0x50c   : > { %v3283_v29 = vpop.f32.mrf.mxu2  ;;  %v3209_v63 = vadd.f32 %v3208_v25, %v3143_v5 }
 0x50e   : > { %v3295_v47 = vadd.f32 %v3283_v29, %v3209_v63 }
 0x50f   : > { %v3211_v11 = vpop.f32.mrf.mxu1 }
 0x510   : > { %4346 = vmatmul.msk.f32.gmra.mxu3 %vm3034_vm7, %v3554_v40 }
 0x511   : > { %4364 = vmatmul.msk.f32.gmra.mxu2 %vm3034_vm7, %v3720_v56 }
 0x512   : > { %4355 = vmatmul.msk.f32.gmra.mxu1 %vm3034_vm7, %v3637_v6 }
 0x513   : > { %v3146_v23 = vpop.f32.mrf.mxu3 }
 0x514   : > { %v3286_v42 = vpop.f32.mrf.mxu2  ;;  %v3212_v54 = vadd.f32 %v3211_v11, %v3146_v23 }
 0x516   : > { %v6031_v58 = vadd.f32 %v3286_v42, %v3212_v54  ;;  %v4387_v42 = vld [vmem:[%s6063_s4] ss:$0 sm:$0xff] }
 0x517   : > { %v3431_v1 = vpop.f32.mrf.mxu1 }
 0x51b   : > { %v3348_v16 = vpop.f32.mrf.mxu3 }
 0x51c   : > { %v3514_v59 = vpop.f32.mrf.mxu2  ;;  %v3372_v9 = vadd.f32 %v3348_v16, %v5978_v24 }
 0x51e   : > { %v3455_v32 = vadd.f32 %v3431_v1, %v3372_v9 }
 0x51f   : > { %v3434_v35 = vpop.f32.mrf.mxu1 }
 0x520   : > { %v3538_v20 = vadd.f32 %v3514_v59, %v3455_v32 }
 0x523   : > { %v3351_v19 = vpop.f32.mrf.mxu3 }
 0x524   : > { %v3517_v26 = vpop.f32.mrf.mxu2  ;;  %v3373_v22 = vadd.f32 %v3351_v19, %v3290_v2 }
 0x526   : > { %v3456_v60 = vadd.f32 %v3434_v35, %v3373_v22 }
 0x527   : > { %v3437_v49 = vpop.f32.mrf.mxu1 }
 0x528   : > { %v3539_v3 = vadd.f32 %v3517_v26, %v3456_v60 }
 0x52b   : > { %v3354_v31 = vpop.f32.mrf.mxu3 }
 0x52c   : > { %v3520_v18 = vpop.f32.mrf.mxu2  ;;  %v3374_v10 = vadd.f32 %v3354_v31, %v3291_v45 }
 0x52e   : > { %v3457_v48 = vadd.f32 %v3437_v49, %v3374_v10 }
 0x52f   : > { %v3440_v27 = vpop.f32.mrf.mxu1 }
 0x530   : > { %v3540_v37 = vadd.f32 %v3520_v18, %v3457_v48 }
 0x533   : > { %v3357_v44 = vpop.f32.mrf.mxu3 }
 0x534   : > { %v3523_v46 = vpop.f32.mrf.mxu2  ;;  %v3375_v36 = vadd.f32 %v3357_v44, %v3292_v61 }
 0x536   : > { %v3458_v57 = vadd.f32 %v3440_v27, %v3375_v36 }
 0x537   : > { %v3443_v24 = vpop.f32.mrf.mxu1 }
 0x538   : > { %v3541_v0 = vadd.f32 %v3523_v46, %v3458_v57 }
 0x53b   : > { %v3360_v21 = vpop.f32.mrf.mxu3 }
 0x53c   : > { %v3526_v43 = vpop.f32.mrf.mxu2  ;;  %v3376_v38 = vadd.f32 %v3360_v21, %v3293_v30 }
 0x53e   : > { %v3459_v34 = vadd.f32 %v3443_v24, %v3376_v38 }
 0x53f   : > { %v3446_v2 = vpop.f32.mrf.mxu1 }
 0x540   : > { %v3542_v7 = vadd.f32 %v3526_v43, %v3459_v34 }
 0x543   : > { %v3363_v4 = vpop.f32.mrf.mxu3 }
 0x544   : > { %v3529_v51 = vpop.f32.mrf.mxu2  ;;  %v3377_v13 = vadd.f32 %v3363_v4, %v3294_v55 }
 0x546   : > { %v3460_v33 = vadd.f32 %v3446_v2, %v3377_v13 }
 0x547   : > { %v3449_v45 = vpop.f32.mrf.mxu1 }
 0x548   : > { %v3543_v8 = vadd.f32 %v3529_v51, %v3460_v33 }
 0x54b   : > { %v3366_v50 = vpop.f32.mrf.mxu3 }
 0x54c   : > { %v3532_v28 = vpop.f32.mrf.mxu2  ;;  %v3378_v14 = vadd.f32 %v3366_v50, %v3295_v47 }
 0x54e   : > { %v3461_v12 = vadd.f32 %v3449_v45, %v3378_v14 }
 0x54f   : > { %v3452_v61 = vpop.f32.mrf.mxu1 }
 0x550   : > { %v3544_v39 = vadd.f32 %v3532_v28, %v3461_v12 }
 0x553   : > { %v3369_v25 = vpop.f32.mrf.mxu3 }
 0x554   : > { %v3535_v5 = vpop.f32.mrf.mxu2  ;;  %v3379_v28 = vadd.f32 %v3369_v25, %v6031_v58 }
 0x557   : > { %v3681_v29 = vpop.f32.mrf.mxu1 }
 0x55b   : > { %v3598_v63 = vpop.f32.mrf.mxu3 }
 0x55c   : > { %v3764_v30 = vpop.f32.mrf.mxu2  ;;  %v3622_v40 = vadd.f32 %v3598_v63, %v3538_v20 }
 0x55e   : > { %v3705_v11 = vadd.f32 %v3681_v29, %v3622_v40 }
 0x55f   : > { %v3684_v56 = vpop.f32.mrf.mxu1 }
 0x560   : > { %v3788_v55 = vadd.f32 %v3764_v30, %v3705_v11 }
 0x562   : > { %v3800_v16 = vadd.f32 %v4387_v42, %v3788_v55 }
 0x563   : > { %v3601_v6 = vpop.f32.mrf.mxu3 }
 0x564   : > { %v3767_v23 = vpop.f32.mrf.mxu2  ;;  %v3623_v54 = vadd.f32 %v3601_v6, %v3539_v3  ;;  %v3808_v19 = vmax.f32 %v3800_v16, 0.0 }
 0x566   : > { %v3706_v47 = vadd.f32 %v3684_v56, %v3623_v54 }
 0x567   : > { %v3687_v1 = vpop.f32.mrf.mxu1 }
 0x568   : > { %v3789_v59 = vadd.f32 %v3767_v23, %v3706_v47 }
 0x56a   : > { %v3801_v9 = vadd.f32 %v4387_v42, %v3789_v59 }
 0x56b   : > { %v3604_v32 = vpop.f32.mrf.mxu3 }
 0x56c   : > { %v3770_v35 = vpop.f32.mrf.mxu2  ;;  %v3809_v26 = vmax.f32 %v3801_v9, 0.0  ;;  %v3624_v20 = vadd.f32 %v3604_v32, %v3540_v37 }
 0x56e   : > { %v3816_v60 = vmax.f32 %v3808_v19, %v3809_v26  ;;  %v3707_v49 = vadd.f32 %v3687_v1, %v3624_v20 }
 0x56f   : > { %v3690_v22 = vpop.f32.mrf.mxu1 }
 0x570   : > { %v3790_v10 = vadd.f32 %v3770_v35, %v3707_v49 }
 0x572   : > { %v3802_v3 = vadd.f32 %v4387_v42, %v3790_v10 }
 0x573   : > { %v3607_v31 = vpop.f32.mrf.mxu3 }
 0x574   : > { %v3773_v18 = vpop.f32.mrf.mxu2  ;;  %v3625_v48 = vadd.f32 %v3607_v31, %v3541_v0  ;;  %v3810_v21 = vmax.f32 %v3802_v3, 0.0 }
 0x576   : > { %v3708_v27 = vadd.f32 %v3690_v22, %v3625_v48 }
 0x577   : > { %v3693_v44 = vpop.f32.mrf.mxu1 }
 0x578   : > { %v3791_v46 = vadd.f32 %v3773_v18, %v3708_v27 }
 0x57a   : > { %v3803_v36 = vadd.f32 %v4387_v42, %v3791_v46 }
 0x57b   : > { %v3610_v57 = vpop.f32.mrf.mxu3 }
 0x57c   : > { %v3776_v24 = vpop.f32.mrf.mxu2  ;;  %v3811_v43 = vmax.f32 %v3803_v36, 0.0  ;;  %v3626_v38 = vadd.f32 %v3610_v57, %v3542_v7  ;;  %v3462_v7 = vadd.f32 %v3452_v61, %v3379_v28  ;;  %v4253_v61 = vsel %vm5743_vm4, 1.0, %v6292_v52 }
 0x57d   : > { %vm3881_vm4 = vcmask 130048  }
 0x57e   : > { %v3817_v34 = vmax.f32 %v3810_v21, %v3811_v43  ;;  %v3709_v2 = vadd.f32 %v3693_v44, %v3626_v38  ;;  %v3545_v23 = vadd.f32 %v3535_v5, %v3462_v7  ;;  %v4261_v5 = vsel %vm2920_vm3, 1.0, %v6292_v52 }
 0x57f   : > { %v3696_v37 = vpop.f32.mrf.mxu1 }
 0x580   : > { %v3792_v13 = vadd.f32 %v3776_v24, %v3709_v2 }
 0x582   : > { %v3804_v50 = vadd.f32 %v4387_v42, %v3792_v13 }
 0x583   : > { %v3613_v4 = vpop.f32.mrf.mxu3 }
 0x584   : > { %v3779_v51 = vpop.f32.mrf.mxu2  ;;  %v3627_v33 = vadd.f32 %v3613_v4, %v3543_v8  ;;  %v3812_v63 = vmax.f32 %v3804_v50, 0.0 }
 0x586   : > { %v3710_v45 = vadd.f32 %v3696_v37, %v3627_v33 }
 0x587   : > { %v3699_v29 = vpop.f32.mrf.mxu1 }
 0x588   : > { %v3793_v0 = vadd.f32 %v3779_v51, %v3710_v45 }
 0x58a   : > { %v3805_v14 = vadd.f32 %v4387_v42, %v3793_v0 }
 0x58b   : > { %v3616_v12 = vpop.f32.mrf.mxu3 }
 0x58c   : > { %v3813_v30 = vmax.f32 %v3805_v14, 0.0  ;;  %v3628_v40 = vadd.f32 %v3616_v12, %v3544_v39  ;;  %v3782_v56 = vpop.f32.mrf.mxu2  ;;  %v4254_v39 = vsel %vm5759_vm6, 1.0, %v6292_v52 }
 0x58e   : > { %v3818_v11 = vmax.f32 %v3812_v63, %v3813_v30  ;;  %v3711_v6 = vadd.f32 %v3699_v29, %v3628_v40 }
 0x58f   : > { %v3702_v54 = vpop.f32.mrf.mxu1 }
 0x590   : > { %v3794_v47 = vadd.f32 %v3782_v56, %v3711_v6 }
 0x592   : > { %v3806_v59 = vadd.f32 %v4387_v42, %v3794_v47 }
 0x593   : > { %v3619_v55 = vpop.f32.mrf.mxu3 }
 0x594   : > { %v3629_v8 = vadd.f32 %v3619_v55, %v3545_v23  ;;  %v3785_v1 = vpop.f32.mrf.mxu2  ;;  %v3814_v25 = vmax.f32 %v3806_v59, 0.0 }
 0x596   : > { %v3712_v16 = vadd.f32 %v3702_v54, %v3629_v8 }
 0x598   : > { %v3795_v9 = vadd.f32 %v3785_v1, %v3712_v16 }
 0x59a   : > { %v3807_v58 = vadd.f32 %v4387_v42, %v3795_v9 }
 0x59c   : > { %v3815_v32 = vmax.f32 %v3807_v58, 0.0 }
 0x59e   : > { %v3819_v35 = vmax.f32 %v3814_v25, %v3815_v32 }
 0x5a0   : > { %3839 = vmatpush.msra.mxu3 %v3819_v35 }
 0x5a2   : > { %3840 = vmatpush.msra.mxu3 %v3818_v11 }
 0x5a4   : > { %3841 = vmatpush.msra.mxu3 %v3817_v34 }
 0x5a6   : > { %3842 = vmatpush.msra.mxu3 %v3816_v60 }
 0x5a7   : > { %4365 = vmatmul.msk.f32.vlgmr.msra.gmra.mxu3 %vm3820_vm9, %v4253_v61 }
 0x5a8   : > { %3868 = vmatpush.msrb.mxu3 %v3819_v35 }
 0x5aa   : > { %3869 = vmatpush.msrb.mxu3 %v3818_v11 }
 0x5ac   : > { %3870 = vmatpush.msrb.mxu3 %v3817_v34 }
 0x5ae   : > { %3871 = vmatpush.msrb.mxu3 %v3816_v60 }
 0x5af   : > { %4366 = vmatmul.msk.f32.gmra.mxu3 %vm3820_vm9, %v4254_v39 }
 0x5b7   : > { %4367 = vmatmul.msk.f32.vlgmr.msrb.gmra.mxu3 %vm3820_vm9, %v4261_v5 }
 0x5bf   : > { %4368 = vmatmul.msk.f32.gmra.mxu3 %vm3820_vm9, %v4262_v62 }
 0x62a   : > { %v3844_v42 = vpop.f32.mrf.mxu3 }
 0x632   : > { %v3847_v19 = vpop.f32.mrf.mxu3 }
 0x63a   : > { %v3873_v17 = vpop.f32.mrf.mxu3 }
 0x63b   : > { %v3879_v26 = vmax.f32 %v3844_v42, %v3873_v17 }
 0x63d   : > { %3882 = vst.msk [vmem:[%s224_s21] sm:$0xff] %vm3881_vm4, %v3879_v26 }
 0x642   : > { %v3876_v53 = vpop.f32.mrf.mxu3 }
 0x643   : > { %v3880_v20 = vmax.f32 %v3847_v19, %v3876_v53 }
 0x645   : > { %3883 = vst.msk [vmem:[%s224_s21 + $0x8] sm:$0xff] %vm3881_vm4, %v3880_v20 }
 0x646 PF: > { %s15_s18 = sadd.s32 1, %s4394_s18  }
 0x647   : > { %p12_p4 = scmp.ge.s32.totalorder %s15_s18, 4  }
 0x649   :  { %14 = sbr.rel (!%p12_p4) target bundleno = 1 (0x1), region = 90 }

</bundles_post_ra>
